<compile_context>
chip_gen: v6e
topology: v6e:2x2x1
jax: 0.10.0
libtpu: 0.0.40
codegen_flags: <defaults>
</compile_context>

<pallas_src>
import functools
import math

import jax
import jax.numpy as jnp
from jax.experimental import pallas as pl
from jax.experimental.pallas import tpu as pltpu


_VMEM_LIMIT = 48 * 1024 * 1024  # fits v5e/v6e (128 MiB phys) and v7x (64 MiB phys)


# ----------------------------------------------------------------------------
# Tile-size helpers (largest legal tile that divides the dim, prefer >=2 grid steps)
# ----------------------------------------------------------------------------
def _row_tile(m, target=256):
    """Row (sublane) tile: divides m, multiple of 8 (or == m), <= target."""
    if m <= 8:
        return m
    cands = [t for t in range(8, min(m, target) + 1, 8) if m % t == 0]
    if not cands:
        return m  # block == full dim is always legal
    best = max(cands)
    if best == m:  # try to expose >= 2 grid steps for megacore sharding
        smaller = [t for t in cands if t < m]
        if smaller:
            best = max(smaller)
    return best


def _lane_tile(n, target=512):
    """Lane tile: divides n and is a multiple of 128, else the full dim."""
    if n <= 128 or n % 128 != 0:
        return n
    cands = [t for t in range(128, min(n, target) + 1, 128) if n % t == 0]
    return max(cands) if cands else n


def _attn_group(bn, n, d, heads, budget=6 << 20):
    """How many (batch-row) attention problems to pack per grid step."""
    per_row = 4 * (4 * n * d + 2 * heads * n * n)  # rough f32 live bytes per row
    cap = max(1, budget // max(per_row, 1))
    g = min(bn, cap)
    if g >= bn and bn > 1:
        g = max(1, bn // 2)  # keep >= 2 grid steps when possible
    while bn % g:
        g -= 1
    return g


# ----------------------------------------------------------------------------
# In-kernel math helpers
# ----------------------------------------------------------------------------
def _gelu_exact(x):
    """Exact GELU = 0.5*x*(1+erf(x/sqrt(2))).

    erf via Abramowitz & Stegun 7.1.26 (|abs err| <= 1.5e-7, ~f32 ulp scale) using only
    exp/abs/where/mul/div so it lowers cleanly in Mosaic.
    """
    # TODO(synk): switch to lax.erf if/when an exact erf lowering is guaranteed in Mosaic.
    z = x * (1.0 / math.sqrt(2.0))
    az = jnp.abs(z)
    t = 1.0 / (1.0 + 0.3275911 * az)
    poly = ((((1.061405429 * t - 1.453152027) * t + 1.421413741) * t
             - 0.284496736) * t + 0.254829592) * t
    erf_abs = 1.0 - poly * jnp.exp(-az * az)
    erf = jnp.where(z >= 0.0, erf_abs, -erf_abs)
    return 0.5 * x * (1.0 + erf)


# ----------------------------------------------------------------------------
# Fused  LN? -> matmul -> +bias -> GELU? -> +residual?  kernel
# ----------------------------------------------------------------------------
def _fused_matmul_kernel(*refs, has_ln, activation, has_residual, eps):
    it = iter(refs)
    x_ref = next(it)
    if has_ln:
        g_ref = next(it)
        beta_ref = next(it)
    w_ref = next(it)
    b_ref = next(it)
    r_ref = next(it) if has_residual else None
    o_ref = next(it)

    x = x_ref[...].astype(jnp.float32)                    # (tm, K) full feature rows
    if has_ln:
        mu = jnp.mean(x, axis=-1, keepdims=True)
        var = jnp.mean((x - mu) * (x - mu), axis=-1, keepdims=True)
        x = (x - mu) * jax.lax.rsqrt(var + eps)
        x = x * g_ref[...].astype(jnp.float32) + beta_ref[...].astype(jnp.float32)

    acc = jnp.dot(x, w_ref[...].astype(jnp.float32),
                  preferred_element_type=jnp.float32)     # MXU, f32 accumulate
    acc = acc + b_ref[...].astype(jnp.float32)
    if activation == "gelu":
        acc = _gelu_exact(acc)
    if has_residual:
        acc = acc + r_ref[...].astype(jnp.float32)
    o_ref[...] = acc.astype(o_ref.dtype)


def fused_matmul(x, w, b, *, ln=None, activation=None, residual=None, eps=1e-6):
    """y = act(LN(x) @ w + b) + residual   (each stage optional).  x:(M,K) w:(K,N) b:(N,)."""
    M, K = x.shape
    N = w.shape[1]
    tm = _row_tile(M)
    tn = _lane_tile(N)

    in_specs = [pl.BlockSpec((tm, K), lambda i, j: (i, 0))]   # full-K rows (LN needs them)
    args = [x]
    if ln is not None:
        g, beta = ln
        in_specs += [pl.BlockSpec((1, K), lambda i, j: (0, 0)),
                     pl.BlockSpec((1, K), lambda i, j: (0, 0))]
        args += [g.reshape(1, K), beta.reshape(1, K)]
    in_specs += [pl.BlockSpec((K, tn), lambda i, j: (0, j)),
                 pl.BlockSpec((1, tn), lambda i, j: (0, j))]
    args += [w, b.reshape(1, N)]
    if residual is not None:
        in_specs += [pl.BlockSpec((tm, tn), lambda i, j: (i, j))]
        args += [residual]

    kernel = functools.partial(_fused_matmul_kernel, has_ln=ln is not None,
                               activation=activation, has_residual=residual is not None,
                               eps=eps)
    return pl.pallas_call(
        kernel,
        out_shape=jax.ShapeDtypeStruct((M, N), x.dtype),
        grid=(M // tm, N // tn),
        in_specs=in_specs,
        out_specs=pl.BlockSpec((tm, tn), lambda i, j: (i, j)),
        compiler_params=pltpu.CompilerParams(
            dimension_semantics=("parallel", "parallel"),
            vmem_limit_bytes=_VMEM_LIMIT),
    )(*args)


# ----------------------------------------------------------------------------
# Row-tiled LayerNorm (used for the final norm only; block LNs are fused into matmuls)
# ----------------------------------------------------------------------------
def _layernorm_kernel(x_ref, g_ref, b_ref, o_ref, *, eps):
    x = x_ref[...].astype(jnp.float32)
    mu = jnp.mean(x, axis=-1, keepdims=True)
    var = jnp.mean((x - mu) * (x - mu), axis=-1, keepdims=True)
    y = (x - mu) * jax.lax.rsqrt(var + eps)
    o_ref[...] = (y * g_ref[...] + b_ref[...]).astype(o_ref.dtype)


def layernorm(x, gamma, beta, eps=1e-6):
    M, D = x.shape
    tm = _row_tile(M, target=1024)
    return pl.pallas_call(
        functools.partial(_layernorm_kernel, eps=eps),
        out_shape=jax.ShapeDtypeStruct((M, D), x.dtype),
        grid=(M // tm,),
        in_specs=[pl.BlockSpec((tm, D), lambda i: (i, 0)),
                  pl.BlockSpec((1, D), lambda i: (0, 0)),
                  pl.BlockSpec((1, D), lambda i: (0, 0))],
        out_specs=pl.BlockSpec((tm, D), lambda i: (i, 0)),
        compiler_params=pltpu.CompilerParams(
            dimension_semantics=("parallel",),
            vmem_limit_bytes=_VMEM_LIMIT),
    )(x, gamma.reshape(1, D), beta.reshape(1, D))


# ----------------------------------------------------------------------------
# Attention on fused QKV: (Bn, N, 3D) -> (Bn, N, D), grouped batch rows per grid step
# ----------------------------------------------------------------------------
def _attn_kernel(qkv_ref, o_ref, *, num_heads, scale):
    t = qkv_ref[...].astype(jnp.float32)                  # (Gb, N, 3D)
    d = t.shape[-1] // 3
    hd = d // num_heads
    q = t[..., 0:d] * scale                               # fold scale into q (O(N*hd))
    k = t[..., d:2 * d]
    v = t[..., 2 * d:3 * d]

    outs = []
    for h in range(num_heads):                            # static unroll over heads
        lo, hi = h * hd, (h + 1) * hd
        qh, kh, vh = q[..., lo:hi], k[..., lo:hi], v[..., lo:hi]
        s = jnp.einsum("bnd,bmd->bnm", qh, kh, preferred_element_type=jnp.float32)
        s = s - jnp.max(s, axis=-1, keepdims=True)
        p = jnp.exp(s)
        p = p * pl.reciprocal(jnp.sum(p, axis=-1, keepdims=True), approx=True)
        outs.append(jnp.einsum("bnm,bmd->bnd", p, vh, preferred_element_type=jnp.float32))
    # single lane-dense (Gb, N, D) store
    o_ref[...] = jnp.concatenate(outs, axis=-1).astype(o_ref.dtype)


def attention(qkv3, num_heads):
    Bn, N, D3 = qkv3.shape
    D = D3 // 3
    scale = (D // num_heads) ** -0.5
    Gb = _attn_group(Bn, N, D, num_heads)
    return pl.pallas_call(
        functools.partial(_attn_kernel, num_heads=num_heads, scale=scale),
        out_shape=jax.ShapeDtypeStruct((Bn, N, D), qkv3.dtype),
        grid=(Bn // Gb,),
        in_specs=[pl.BlockSpec((Gb, N, D3), lambda i: (i, 0, 0))],
        out_specs=pl.BlockSpec((Gb, N, D), lambda i: (i, 0, 0)),
        compiler_params=pltpu.CompilerParams(
            dimension_semantics=("parallel",),
            vmem_limit_bytes=_VMEM_LIMIT),
    )(qkv3)


# ----------------------------------------------------------------------------
# Model pieces (glue in plain JAX, compute via Pallas kernels above)
# ----------------------------------------------------------------------------
def patch_embed(x_nchw, w, b, patch_size):
    """Conv2d(stride=ps, kernel=ps) as a matmul over unfolded patches."""
    BV, C, H, W = x_nchw.shape
    ps = patch_size
    Hp, Wp = H // ps, W // ps
    x = x_nchw.reshape(BV, C, Hp, ps, Wp, ps)
    x = x.transpose(0, 2, 4, 1, 3, 5)                     # (BV, Hp, Wp, C, ps, ps)
    x = x.reshape(BV * Hp * Wp, C * ps * ps)              # patch rows, (c, kh, kw) order
    y = fused_matmul(x, w, b)
    return y.reshape(BV, Hp * Wp, -1)


def lga_regroup(x, view_num, g):
    """Long-range grouping: strided tokens of all views go in the same group."""
    BV, N, D = x.shape
    B = BV // view_num
    Hp = int(round(math.sqrt(N)))
    s = Hp // g
    x = x.reshape(B, view_num, s, g, s, g, D)
    x = x.transpose(0, 3, 5, 1, 2, 4, 6)                  # (B, g1, g2, V, s1, s2, D)
    return x.reshape(B * g * g, view_num * s * s, D)


def lga_ungroup(x, view_num, g, BV, N):
    B = BV // view_num
    Hp = int(round(math.sqrt(N)))
    s = Hp // g
    D = x.shape[-1]
    x = x.reshape(B, g, g, view_num, s, s, D)
    x = x.transpose(0, 3, 4, 1, 5, 2, 6)                  # (B, V, s1, g1, s2, g2, D)
    return x.reshape(BV, N, D)


def block_forward(x, p, num_heads, lga=False, view_num=None, patch_group=None):
    """Pre-norm transformer block: x + Attn(LN1(x)); x + MLP(LN2(x)).  drop rates = 0."""
    Bv, N, D = x.shape
    if lga:
        # TODO(synk): exact LGA token-grouping order of the original LRGT Block is not given
        # in the reference source; a strided (long-range) cross-view grouping is used, kept
        # as XLA transposes (a scalar-prefetch index_map gather is a possible further opt).
        xg = lga_regroup(x, view_num, patch_group)
    else:
        xg = x
    Bg, Ng, _ = xg.shape
    xf = xg.reshape(Bg * Ng, D)

    # LN1 fused into the single QKV matmul; columns [0:D]=q, [D:2D]=k, [2D:3D]=v.
    qkv = fused_matmul(xf, p["qkv_w"], p["qkv_b"], ln=(p["ln1_g"], p["ln1_b"]))
    att = attention(qkv.reshape(Bg, Ng, 3 * D), num_heads)
    # proj with the residual add fused into the epilogue.
    xf = fused_matmul(att.reshape(Bg * Ng, D), p["proj_w"], p["proj_b"], residual=xf)

    if lga:
        x = lga_ungroup(xf.reshape(Bg, Ng, D), view_num, patch_group, Bv, N)
        xf = x.reshape(Bv * N, D)

    # MLP: LN2 + fc1 + exact GELU fused; fc2 + residual fused.
    h = fused_matmul(xf, p["fc1_w"], p["fc1_b"],
                     ln=(p["ln2_g"], p["ln2_b"]), activation="gelu")
    xf = fused_matmul(h, p["fc2_w"], p["fc2_b"], residual=xf)
    return xf.reshape(Bv, N, D)


def distilled_vit_forward(x_bvchw, params, cfg):
    """DistilledVisionTransformer.forward: (B,V,C,H,W) -> (B*V, num_patches, embed_dim)."""
    B, V, C, H, W = x_bvchw.shape
    x = x_bvchw.reshape(B * V, C, H, W)                   # 'b v c h w -> (b v) c h w'
    x = patch_embed(x, params["patch_w"], params["patch_b"], cfg["patch_size"])
    x = x + params["pos_embed"][:, 2:, :]                 # distilled: skip cls+dist slots
    # pos_drop: p = 0.0 -> identity

    for layer, blk_p in enumerate(params["blocks"]):
        lga = layer in cfg["lga_layer"]
        x = block_forward(x, blk_p, cfg["num_heads"], lga=lga,
                          view_num=V, patch_group=cfg["patch_group"])

    M = x.shape[0] * x.shape[1]
    x = layernorm(x.reshape(M, cfg["embed_dim"]),
                  params["norm_g"], params["norm_b"]).reshape(x.shape)
    return x


# ----------------------------------------------------------------------------
# Deterministic parameter construction (synthetic trunc_normal(std=0.02) ~ normal*0.02)
# ----------------------------------------------------------------------------
def init_params(key, cfg):
    C, ps, D = cfg["in_chans"], cfg["patch_size"], cfg["embed_dim"]
    NP = cfg["num_patches"]
    hidden = int(D * cfg["mlp_ratio"])

    keys = iter(jax.random.split(key, 8 + 16 * cfg["depth"]))
    nrm = lambda shape: (0.02 * jax.random.normal(next(keys), shape)).astype(jnp.float32)

    params = {
        "patch_w": nrm((C * ps * ps, D)),
        "patch_b": jnp.zeros((D,), jnp.float32),
        "pos_embed": nrm((1, NP + 2, D)),
        "norm_g": jnp.ones((D,), jnp.float32),
        "norm_b": jnp.zeros((D,), jnp.float32),
        "blocks": [],
    }
    for _ in range(cfg["depth"]):
        blk = {
            "ln1_g": jnp.ones((D,), jnp.float32), "ln1_b": jnp.zeros((D,), jnp.float32),
            # fused QKV: column blocks correspond to to_q / to_k / to_v of the PyTorch model
            "qkv_w": nrm((D, 3 * D)), "qkv_b": jnp.zeros((3 * D,), jnp.float32),
            "proj_w": nrm((D, D)), "proj_b": jnp.zeros((D,), jnp.float32),
            "ln2_g": jnp.ones((D,), jnp.float32), "ln2_b": jnp.zeros((D,), jnp.float32),
            "fc1_w": nrm((D, hidden)), "fc1_b": jnp.zeros((hidden,), jnp.float32),
            "fc2_w": nrm((hidden, D)), "fc2_b": jnp.zeros((D,), jnp.float32),
        }
        params["blocks"].append(blk)
    return params


# ----------------------------------------------------------------------------
if __name__ == "__main__":
    cfg = dict(
        img_size=16,
        patch_size=4,
        in_chans=3,
        embed_dim=32,
        depth=4,
        num_heads=4,
        mlp_ratio=4.0,
        patch_group=2,
        lga_layer=(1, 3),
    )
    cfg["num_patches"] = (cfg["img_size"] // cfg["patch_size"]) ** 2  # 16

    key = jax.random.PRNGKey(0)
    k_param, k_input = jax.random.split(key)
    params = init_params(k_param, cfg)

    B, V = 2, 2
    x = jax.random.normal(
        k_input, (B, V, cfg["in_chans"], cfg["img_size"], cfg["img_size"]), jnp.float32
    )

    fwd = jax.jit(functools.partial(distilled_vit_forward, cfg=cfg))
    out = fwd(x, params)
    out = jax.block_until_ready(out)

    assert out.shape == (B * V, cfg["num_patches"], cfg["embed_dim"])
    assert bool(jnp.all(jnp.isfinite(out)))
    print("KERNEL_OK")
</pallas_src>

<mosaic_0001>
module attributes {stable_mosaic.version = 11 : i64} {
  func.func @_fused_matmul_kernel(%arg0: i32, %arg1: i32, %arg2: memref<32x48xf32, #tpu.memory_space<vmem>>, %arg3: memref<48x32xf32, #tpu.memory_space<vmem>>, %arg4: memref<1x32xf32, #tpu.memory_space<vmem>>, %arg5: memref<32x32xf32, #tpu.memory_space<vmem>>) attributes {dimension_semantics = [#tpu.dimension_semantics<parallel>, #tpu.dimension_semantics<parallel>], iteration_bounds = array<i64: 2, 1>, scalar_prefetch = 0 : i64, scratch_operands = 0 : i64, tpu.core_type = #tpu.core_type<tc>, window_params = [{transform_indices = @transform_0, window_bounds = array<i64: 32, 48>}, {transform_indices = @transform_1, window_bounds = array<i64: 48, 32>}, {transform_indices = @transform_2, window_bounds = array<i64: 1, 32>}, {transform_indices = @transform_3, window_bounds = array<i64: 32, 32>}]} {
    %c0 = arith.constant 0 : index
    %c0_0 = arith.constant 0 : index
    %0 = vector.load %arg2[%c0, %c0_0] : memref<32x48xf32, #tpu.memory_space<vmem>>, vector<32x48xf32>
    %c0_1 = arith.constant 0 : index
    %c0_2 = arith.constant 0 : index
    %1 = vector.load %arg3[%c0_1, %c0_2] : memref<48x32xf32, #tpu.memory_space<vmem>>, vector<48x32xf32>
    %cst = arith.constant dense<0.000000e+00> : vector<32x32xf32>
    %2 = tpu.matmul %0, %1, %cst {dimension_numbers = #tpu.dot_dimension_numbers<[1], [0], [0], [1], [0, 0, 1, 1], [], []>} : vector<32x48xf32>, vector<48x32xf32>, vector<32x32xf32> -> vector<32x32xf32>
    %c0_3 = arith.constant 0 : index
    %c0_4 = arith.constant 0 : index
    %3 = vector.load %arg4[%c0_3, %c0_4] : memref<1x32xf32, #tpu.memory_space<vmem>>, vector<1x32xf32>
    %4 = vector.broadcast %3 : vector<1x32xf32> to vector<32x32xf32>
    %5 = arith.addf %2, %4 : vector<32x32xf32>
    %c0_5 = arith.constant 0 : index
    %c0_6 = arith.constant 0 : index
    %6 = vector.load %arg5[%c0_5, %c0_6] : memref<32x32xf32, #tpu.memory_space<vmem>>, vector<32x32xf32>
    tpu.vector_store %arg5[%c0_5, %c0_6], %5 {strides = array<i32>} : memref<32x32xf32, #tpu.memory_space<vmem>>, vector<32x32xf32>,
    return
  }
  func.func @transform_0(%arg0: i32, %arg1: i32) -> (i32, i32) {
    %c0_i32 = arith.constant 0 : i32
    %c0_i32_0 = arith.constant 0 : i32
    return %arg0, %c0_i32 : i32, i32
  }
  func.func @transform_1(%arg0: i32, %arg1: i32) -> (i32, i32) {
    %c0_i32 = arith.constant 0 : i32
    %c0_i32_0 = arith.constant 0 : i32
    return %c0_i32, %arg1 : i32, i32
  }
  func.func @transform_2(%arg0: i32, %arg1: i32) -> (i32, i32) {
    %c0_i32 = arith.constant 0 : i32
    %c0_i32_0 = arith.constant 0 : i32
    return %c0_i32, %arg1 : i32, i32
  }
  func.func @transform_3(%arg0: i32, %arg1: i32) -> (i32, i32) {
    %c0_i32 = arith.constant 0 : i32
    return %arg0, %arg1 : i32, i32
  }
}

module attributes {stable_mosaic.version = 11 : i64} {
  func.func @_fused_matmul_kernel(%arg0: i32, %arg1: i32, %arg2: memref<32x32xf32, #tpu.memory_space<vmem>>, %arg3: memref<1x32xf32, #tpu.memory_space<vmem>>, %arg4: memref<1x32xf32, #tpu.memory_space<vmem>>, %arg5: memref<32x96xf32, #tpu.memory_space<vmem>>, %arg6: memref<1x96xf32, #tpu.memory_space<vmem>>, %arg7: memref<32x96xf32, #tpu.memory_space<vmem>>) attributes {dimension_semantics = [#tpu.dimension_semantics<parallel>, #tpu.dimension_semantics<parallel>], iteration_bounds = array<i64: 2, 1>, scalar_prefetch = 0 : i64, scratch_operands = 0 : i64, tpu.core_type = #tpu.core_type<tc>, window_params = [{transform_indices = @transform_0, window_bounds = array<i64: 32, 32>}, {pipeline_mode = #tpu.pipeline_mode<synchronous>, transform_indices = @transform_1, window_bounds = array<i64: 1, 32>}, {pipeline_mode = #tpu.pipeline_mode<synchronous>, transform_indices = @transform_2, window_bounds = array<i64: 1, 32>}, {transform_indices = @transform_3, window_bounds = array<i64: 32, 96>}, {transform_indices = @transform_4, window_bounds = array<i64: 1, 96>}, {transform_indices = @transform_5, window_bounds = array<i64: 32, 96>}]} {
    %c0 = arith.constant 0 : index
    %c0_0 = arith.constant 0 : index
    %0 = vector.load %arg2[%c0, %c0_0] : memref<32x32xf32, #tpu.memory_space<vmem>>, vector<32x32xf32>
    %cst = arith.constant dense<0.000000e+00> : vector<32xf32>
    %1 = vector.multi_reduction <add>, %0, %cst [1] : vector<32x32xf32> to vector<32xf32>
    %2 = vector.shape_cast %1 : vector<32xf32> to vector<32x1xf32>
    %cst_1 = arith.constant 3.200000e+01 : f32
    %3 = vector.broadcast %cst_1 : f32 to vector<32x1xf32>
    %4 = arith.divf %2, %3 : vector<32x1xf32>
    %5 = vector.broadcast %4 : vector<32x1xf32> to vector<32x32xf32>
    %6 = arith.subf %0, %5 : vector<32x32xf32>
    %7 = vector.broadcast %4 : vector<32x1xf32> to vector<32x32xf32>
    %8 = arith.subf %0, %7 : vector<32x32xf32>
    %9 = arith.mulf %6, %8 : vector<32x32xf32>
    %cst_2 = arith.constant dense<0.000000e+00> : vector<32xf32>
    %10 = vector.multi_reduction <add>, %9, %cst_2 [1] : vector<32x32xf32> to vector<32xf32>
    %11 = vector.shape_cast %10 : vector<32xf32> to vector<32x1xf32>
    %cst_3 = arith.constant 3.200000e+01 : f32
    %12 = vector.broadcast %cst_3 : f32 to vector<32x1xf32>
    %13 = arith.divf %11, %12 : vector<32x1xf32>
    %14 = vector.broadcast %4 : vector<32x1xf32> to vector<32x32xf32>
    %15 = arith.subf %0, %14 : vector<32x32xf32>
    %cst_4 = arith.constant 9.99999997E-7 : f32
    %16 = vector.broadcast %cst_4 : f32 to vector<32x1xf32>
    %17 = arith.addf %13, %16 : vector<32x1xf32>
    %18 = math.rsqrt %17 : vector<32x1xf32>
    %19 = vector.broadcast %18 : vector<32x1xf32> to vector<32x32xf32>
    %20 = arith.mulf %15, %19 : vector<32x32xf32>
    %c0_5 = arith.constant 0 : index
    %c0_6 = arith.constant 0 : index
    %21 = vector.load %arg3[%c0_5, %c0_6] : memref<1x32xf32, #tpu.memory_space<vmem>>, vector<1x32xf32>
    %22 = vector.broadcast %21 : vector<1x32xf32> to vector<32x32xf32>
    %23 = arith.mulf %20, %22 : vector<32x32xf32>
    %c0_7 = arith.constant 0 : index
    %c0_8 = arith.constant 0 : index
    %24 = vector.load %arg4[%c0_7, %c0_8] : memref<1x32xf32, #tpu.memory_space<vmem>>, vector<1x32xf32>
    %25 = vector.broadcast %24 : vector<1x32xf32> to vector<32x32xf32>
    %26 = arith.addf %23, %25 : vector<32x32xf32>
    %c0_9 = arith.constant 0 : index
    %c0_10 = arith.constant 0 : index
    %27 = vector.load %arg5[%c0_9, %c0_10] : memref<32x96xf32, #tpu.memory_space<vmem>>, vector<32x96xf32>
    %cst_11 = arith.constant dense<0.000000e+00> : vector<32x96xf32>
    %28 = tpu.matmul %26, %27, %cst_11 {dimension_numbers = #tpu.dot_dimension_numbers<[1], [0], [0], [1], [0, 0, 1, 1], [], []>} : vector<32x32xf32>, vector<32x96xf32>, vector<32x96xf32> -> vector<32x96xf32>
    %c0_12 = arith.constant 0 : index
    %c0_13 = arith.constant 0 : index
    %29 = vector.load %arg6[%c0_12, %c0_13] : memref<1x96xf32, #tpu.memory_space<vmem>>, vector<1x96xf32>
    %30 = vector.broadcast %29 : vector<1x96xf32> to vector<32x96xf32>
    %31 = arith.addf %28, %30 : vector<32x96xf32>
    %c0_14 = arith.constant 0 : index
    %c0_15 = arith.constant 0 : index
    %32 = vector.load %arg7[%c0_14, %c0_15] : memref<32x96xf32, #tpu.memory_space<vmem>>, vector<32x96xf32>
    tpu.vector_store %arg7[%c0_14, %c0_15], %31 {strides = array<i32>} : memref<32x96xf32, #tpu.memory_space<vmem>>, vector<32x96xf32>,
    return
  }
  func.func @transform_0(%arg0: i32, %arg1: i32) -> (i32, i32) {
    %c0_i32 = arith.constant 0 : i32
    %c0_i32_0 = arith.constant 0 : i32
    return %arg0, %c0_i32 : i32, i32
  }
  func.func @transform_1(%arg0: i32, %arg1: i32) -> (i32, i32) {
    %c0_i32 = arith.constant 0 : i32
    %c0_i32_0 = arith.constant 0 : i32
    %c0_i32_1 = arith.constant 0 : i32
    return %c0_i32, %c0_i32_0 : i32, i32
  }
  func.func @transform_2(%arg0: i32, %arg1: i32) -> (i32, i32) {
    %c0_i32 = arith.constant 0 : i32
    %c0_i32_0 = arith.constant 0 : i32
    %c0_i32_1 = arith.constant 0 : i32
    return %c0_i32, %c0_i32_0 : i32, i32
  }
  func.func @transform_3(%arg0: i32, %arg1: i32) -> (i32, i32) {
    %c0_i32 = arith.constant 0 : i32
    %c0_i32_0 = arith.constant 0 : i32
    return %c0_i32, %arg1 : i32, i32
  }
  func.func @transform_4(%arg0: i32, %arg1: i32) -> (i32, i32) {
    %c0_i32 = arith.constant 0 : i32
    %c0_i32_0 = arith.constant 0 : i32
    return %c0_i32, %arg1 : i32, i32
  }
  func.func @transform_5(%arg0: i32, %arg1: i32) -> (i32, i32) {
    %c0_i32 = arith.constant 0 : i32
    return %arg0, %arg1 : i32, i32
  }
}

module attributes {stable_mosaic.version = 11 : i64} {
  func.func @_attn_kernel(%arg0: i32, %arg1: memref<2x16x96xf32, #tpu.memory_space<vmem>>, %arg2: memref<2x16x32xf32, #tpu.memory_space<vmem>>) attributes {dimension_semantics = [#tpu.dimension_semantics<parallel>], iteration_bounds = array<i64: 2>, scalar_prefetch = 0 : i64, scratch_operands = 0 : i64, tpu.core_type = #tpu.core_type<tc>, window_params = [{transform_indices = @transform_0, window_bounds = array<i64: 2, 16, 96>}, {transform_indices = @transform_1, window_bounds = array<i64: 2, 16, 32>}]} {
    %c0 = arith.constant 0 : index
    %c0_0 = arith.constant 0 : index
    %c0_1 = arith.constant 0 : index
    %0 = vector.load %arg1[%c0, %c0_0, %c0_1] : memref<2x16x96xf32, #tpu.memory_space<vmem>>, vector<2x16x96xf32>
    %1 = vector.extract_strided_slice %0 {offsets = [0, 0, 0], sizes = [2, 16, 32], strides = [1, 1, 1]} : vector<2x16x96xf32> to vector<2x16x32xf32>
    %cst = arith.constant 0.353553385 : f32
    %2 = vector.broadcast %cst : f32 to vector<2x16x32xf32>
    %3 = arith.mulf %1, %2 : vector<2x16x32xf32>
    %4 = vector.extract_strided_slice %0 {offsets = [0, 0, 32], sizes = [2, 16, 32], strides = [1, 1, 1]} : vector<2x16x96xf32> to vector<2x16x32xf32>
    %5 = vector.extract_strided_slice %0 {offsets = [0, 0, 64], sizes = [2, 16, 32], strides = [1, 1, 1]} : vector<2x16x96xf32> to vector<2x16x32xf32>
    %6 = vector.extract_strided_slice %3 {offsets = [0, 0, 0], sizes = [2, 16, 8], strides = [1, 1, 1]} : vector<2x16x32xf32> to vector<2x16x8xf32>
    %7 = vector.extract_strided_slice %4 {offsets = [0, 0, 0], sizes = [2, 16, 8], strides = [1, 1, 1]} : vector<2x16x32xf32> to vector<2x16x8xf32>
    %8 = vector.extract_strided_slice %5 {offsets = [0, 0, 0], sizes = [2, 16, 8], strides = [1, 1, 1]} : vector<2x16x32xf32> to vector<2x16x8xf32>
    "tpu.trace_start"() <{level = 10 : i32, message = "bnd,bmd->bnm"}> : () -> ()
    %cst_2 = arith.constant dense<0.000000e+00> : vector<2x16x16xf32>
    %9 = tpu.matmul %6, %7, %cst_2 {dimension_numbers = #tpu.dot_dimension_numbers<[2], [2], [1], [1], [0, 0, 0, 1, 1, 1], [0], [0]>} : vector<2x16x8xf32>, vector<2x16x8xf32>, vector<2x16x16xf32> -> vector<2x16x16xf32>
    "tpu.trace_stop"() : () -> ()
    %cst_3 = arith.constant dense<0xFF800000> : vector<2x16xf32>
    %10 = vector.multi_reduction <maximumf>, %9, %cst_3 [2] : vector<2x16x16xf32> to vector<2x16xf32>
    %11 = vector.shape_cast %10 : vector<2x16xf32> to vector<2x16x1xf32>
    %12 = vector.broadcast %11 : vector<2x16x1xf32> to vector<2x16x16xf32>
    %13 = arith.subf %9, %12 : vector<2x16x16xf32>
    %14 = math.exp %13 : vector<2x16x16xf32>
    %cst_4 = arith.constant dense<0.000000e+00> : vector<2x16xf32>
    %15 = vector.multi_reduction <add>, %14, %cst_4 [2] : vector<2x16x16xf32> to vector<2x16xf32>
    %16 = vector.shape_cast %15 : vector<2x16xf32> to vector<2x16x1xf32>
    %17 = tpu.reciprocal %16 {approx = true} : vector<2x16x1xf32> -> vector<2x16x1xf32>
    %18 = vector.broadcast %17 : vector<2x16x1xf32> to vector<2x16x16xf32>
    %19 = arith.mulf %14, %18 : vector<2x16x16xf32>
    "tpu.trace_start"() <{level = 10 : i32, message = "bnm,bmd->bnd"}> : () -> ()
    %cst_5 = arith.constant dense<0.000000e+00> : vector<2x16x8xf32>
    %20 = tpu.matmul %19, %8, %cst_5 {dimension_numbers = #tpu.dot_dimension_numbers<[2], [1], [1], [2], [0, 0, 0, 1, 1, 2], [0], [0]>} : vector<2x16x16xf32>, vector<2x16x8xf32>, vector<2x16x8xf32> -> vector<2x16x8xf32>
    "tpu.trace_stop"() : () -> ()
    %21 = vector.extract_strided_slice %3 {offsets = [0, 0, 8], sizes = [2, 16, 8], strides = [1, 1, 1]} : vector<2x16x32xf32> to vector<2x16x8xf32>
    %22 = vector.extract_strided_slice %4 {offsets = [0, 0, 8], sizes = [2, 16, 8], strides = [1, 1, 1]} : vector<2x16x32xf32> to vector<2x16x8xf32>
    %23 = vector.extract_strided_slice %5 {offsets = [0, 0, 8], sizes = [2, 16, 8], strides = [1, 1, 1]} : vector<2x16x32xf32> to vector<2x16x8xf32>
    "tpu.trace_start"() <{level = 10 : i32, message = "bnd,bmd->bnm"}> : () -> ()
    %cst_6 = arith.constant dense<0.000000e+00> : vector<2x16x16xf32>
    %24 = tpu.matmul %21, %22, %cst_6 {dimension_numbers = #tpu.dot_dimension_numbers<[2], [2], [1], [1], [0, 0, 0, 1, 1, 1], [0], [0]>} : vector<2x16x8xf32>, vector<2x16x8xf32>, vector<2x16x16xf32> -> vector<2x16x16xf32>
    "tpu.trace_stop"() : () -> ()
    %cst_7 = arith.constant dense<0xFF800000> : vector<2x16xf32>
    %25 = vector.multi_reduction <maximumf>, %24, %cst_7 [2] : vector<2x16x16xf32> to vector<2x16xf32>
    %26 = vector.shape_cast %25 : vector<2x16xf32> to vector<2x16x1xf32>
    %27 = vector.broadcast %26 : vector<2x16x1xf32> to vector<2x16x16xf32>
    %28 = arith.subf %24, %27 : vector<2x16x16xf32>
    %29 = math.exp %28 : vector<2x16x16xf32>
    %cst_8 = arith.constant dense<0.000000e+00> : vector<2x16xf32>
    %30 = vector.multi_reduction <add>, %29, %cst_8 [2] : vector<2x16x16xf32> to vector<2x16xf32>
    %31 = vector.shape_cast %30 : vector<2x16xf32> to vector<2x16x1xf32>
    %32 = tpu.reciprocal %31 {approx = true} : vector<2x16x1xf32> -> vector<2x16x1xf32>
    %33 = vector.broadcast %32 : vector<2x16x1xf32> to vector<2x16x16xf32>
    %34 = arith.mulf %29, %33 : vector<2x16x16xf32>
    "tpu.trace_start"() <{level = 10 : i32, message = "bnm,bmd->bnd"}> : () -> ()
    %cst_9 = arith.constant dense<0.000000e+00> : vector<2x16x8xf32>
    %35 = tpu.matmul %34, %23, %cst_9 {dimension_numbers = #tpu.dot_dimension_numbers<[2], [1], [1], [2], [0, 0, 0, 1, 1, 2], [0], [0]>} : vector<2x16x16xf32>, vector<2x16x8xf32>, vector<2x16x8xf32> -> vector<2x16x8xf32>
    "tpu.trace_stop"() : () -> ()
    %36 = vector.extract_strided_slice %3 {offsets = [0, 0, 16], sizes = [2, 16, 8], strides = [1, 1, 1]} : vector<2x16x32xf32> to vector<2x16x8xf32>
    %37 = vector.extract_strided_slice %4 {offsets = [0, 0, 16], sizes = [2, 16, 8], strides = [1, 1, 1]} : vector<2x16x32xf32> to vector<2x16x8xf32>
    %38 = vector.extract_strided_slice %5 {offsets = [0, 0, 16], sizes = [2, 16, 8], strides = [1, 1, 1]} : vector<2x16x32xf32> to vector<2x16x8xf32>
    "tpu.trace_start"() <{level = 10 : i32, message = "bnd,bmd->bnm"}> : () -> ()
    %cst_10 = arith.constant dense<0.000000e+00> : vector<2x16x16xf32>
    %39 = tpu.matmul %36, %37, %cst_10 {dimension_numbers = #tpu.dot_dimension_numbers<[2], [2], [1], [1], [0, 0, 0, 1, 1, 1], [0], [0]>} : vector<2x16x8xf32>, vector<2x16x8xf32>, vector<2x16x16xf32> -> vector<2x16x16xf32>
    "tpu.trace_stop"() : () -> ()
    %cst_11 = arith.constant dense<0xFF800000> : vector<2x16xf32>
    %40 = vector.multi_reduction <maximumf>, %39, %cst_11 [2] : vector<2x16x16xf32> to vector<2x16xf32>
    %41 = vector.shape_cast %40 : vector<2x16xf32> to vector<2x16x1xf32>
    %42 = vector.broadcast %41 : vector<2x16x1xf32> to vector<2x16x16xf32>
    %43 = arith.subf %39, %42 : vector<2x16x16xf32>
    %44 = math.exp %43 : vector<2x16x16xf32>
    %cst_12 = arith.constant dense<0.000000e+00> : vector<2x16xf32>
    %45 = vector.multi_reduction <add>, %44, %cst_12 [2] : vector<2x16x16xf32> to vector<2x16xf32>
    %46 = vector.shape_cast %45 : vector<2x16xf32> to vector<2x16x1xf32>
    %47 = tpu.reciprocal %46 {approx = true} : vector<2x16x1xf32> -> vector<2x16x1xf32>
    %48 = vector.broadcast %47 : vector<2x16x1xf32> to vector<2x16x16xf32>
    %49 = arith.mulf %44, %48 : vector<2x16x16xf32>
    "tpu.trace_start"() <{level = 10 : i32, message = "bnm,bmd->bnd"}> : () -> ()
    %cst_13 = arith.constant dense<0.000000e+00> : vector<2x16x8xf32>
    %50 = tpu.matmul %49, %38, %cst_13 {dimension_numbers = #tpu.dot_dimension_numbers<[2], [1], [1], [2], [0, 0, 0, 1, 1, 2], [0], [0]>} : vector<2x16x16xf32>, vector<2x16x8xf32>, vector<2x16x8xf32> -> vector<2x16x8xf32>
    "tpu.trace_stop"() : () -> ()
    %51 = vector.extract_strided_slice %3 {offsets = [0, 0, 24], sizes = [2, 16, 8], strides = [1, 1, 1]} : vector<2x16x32xf32> to vector<2x16x8xf32>
    %52 = vector.extract_strided_slice %4 {offsets = [0, 0, 24], sizes = [2, 16, 8], strides = [1, 1, 1]} : vector<2x16x32xf32> to vector<2x16x8xf32>
    %53 = vector.extract_strided_slice %5 {offsets = [0, 0, 24], sizes = [2, 16, 8], strides = [1, 1, 1]} : vector<2x16x32xf32> to vector<2x16x8xf32>
    "tpu.trace_start"() <{level = 10 : i32, message = "bnd,bmd->bnm"}> : () -> ()
    %cst_14 = arith.constant dense<0.000000e+00> : vector<2x16x16xf32>
    %54 = tpu.matmul %51, %52, %cst_14 {dimension_numbers = #tpu.dot_dimension_numbers<[2], [2], [1], [1], [0, 0, 0, 1, 1, 1], [0], [0]>} : vector<2x16x8xf32>, vector<2x16x8xf32>, vector<2x16x16xf32> -> vector<2x16x16xf32>
    "tpu.trace_stop"() : () -> ()
    %cst_15 = arith.constant dense<0xFF800000> : vector<2x16xf32>
    %55 = vector.multi_reduction <maximumf>, %54, %cst_15 [2] : vector<2x16x16xf32> to vector<2x16xf32>
    %56 = vector.shape_cast %55 : vector<2x16xf32> to vector<2x16x1xf32>
    %57 = vector.broadcast %56 : vector<2x16x1xf32> to vector<2x16x16xf32>
    %58 = arith.subf %54, %57 : vector<2x16x16xf32>
    %59 = math.exp %58 : vector<2x16x16xf32>
    %cst_16 = arith.constant dense<0.000000e+00> : vector<2x16xf32>
    %60 = vector.multi_reduction <add>, %59, %cst_16 [2] : vector<2x16x16xf32> to vector<2x16xf32>
    %61 = vector.shape_cast %60 : vector<2x16xf32> to vector<2x16x1xf32>
    %62 = tpu.reciprocal %61 {approx = true} : vector<2x16x1xf32> -> vector<2x16x1xf32>
    %63 = vector.broadcast %62 : vector<2x16x1xf32> to vector<2x16x16xf32>
    %64 = arith.mulf %59, %63 : vector<2x16x16xf32>
    "tpu.trace_start"() <{level = 10 : i32, message = "bnm,bmd->bnd"}> : () -> ()
    %cst_17 = arith.constant dense<0.000000e+00> : vector<2x16x8xf32>
    %65 = tpu.matmul %64, %53, %cst_17 {dimension_numbers = #tpu.dot_dimension_numbers<[2], [1], [1], [2], [0, 0, 0, 1, 1, 2], [0], [0]>} : vector<2x16x16xf32>, vector<2x16x8xf32>, vector<2x16x8xf32> -> vector<2x16x8xf32>
    "tpu.trace_stop"() : () -> ()
    %66 = tpu.concatenate %20, %35, %50, %65 in 2 : vector<2x16x8xf32>, vector<2x16x8xf32>, vector<2x16x8xf32>, vector<2x16x8xf32> -> vector<2x16x32xf32>
    %c0_18 = arith.constant 0 : index
    %c0_19 = arith.constant 0 : index
    %c0_20 = arith.constant 0 : index
    %67 = vector.load %arg2[%c0_18, %c0_19, %c0_20] : memref<2x16x32xf32, #tpu.memory_space<vmem>>, vector<2x16x32xf32>
    tpu.vector_store %arg2[%c0_18, %c0_19, %c0_20], %66 {strides = array<i32>} : memref<2x16x32xf32, #tpu.memory_space<vmem>>, vector<2x16x32xf32>,
    return
  }
  func.func @transform_0(%arg0: i32) -> (i32, i32, i32) {
    %c0_i32 = arith.constant 0 : i32
    %c0_i32_0 = arith.constant 0 : i32
    %c0_i32_1 = arith.constant 0 : i32
    return %arg0, %c0_i32, %c0_i32_0 : i32, i32, i32
  }
  func.func @transform_1(%arg0: i32) -> (i32, i32, i32) {
    %c0_i32 = arith.constant 0 : i32
    %c0_i32_0 = arith.constant 0 : i32
    %c0_i32_1 = arith.constant 0 : i32
    return %arg0, %c0_i32, %c0_i32_0 : i32, i32, i32
  }
}

module attributes {stable_mosaic.version = 11 : i64} {
  func.func @_fused_matmul_kernel(%arg0: i32, %arg1: i32, %arg2: memref<32x32xf32, #tpu.memory_space<vmem>>, %arg3: memref<32x32xf32, #tpu.memory_space<vmem>>, %arg4: memref<1x32xf32, #tpu.memory_space<vmem>>, %arg5: memref<32x32xf32, #tpu.memory_space<vmem>>, %arg6: memref<32x32xf32, #tpu.memory_space<vmem>>) attributes {dimension_semantics = [#tpu.dimension_semantics<parallel>, #tpu.dimension_semantics<parallel>], iteration_bounds = array<i64: 2, 1>, scalar_prefetch = 0 : i64, scratch_operands = 0 : i64, tpu.core_type = #tpu.core_type<tc>, window_params = [{transform_indices = @transform_0, window_bounds = array<i64: 32, 32>}, {transform_indices = @transform_1, window_bounds = array<i64: 32, 32>}, {transform_indices = @transform_2, window_bounds = array<i64: 1, 32>}, {transform_indices = @transform_3, window_bounds = array<i64: 32, 32>}, {transform_indices = @transform_4, window_bounds = array<i64: 32, 32>}]} {
    %c0 = arith.constant 0 : index
    %c0_0 = arith.constant 0 : index
    %0 = vector.load %arg2[%c0, %c0_0] : memref<32x32xf32, #tpu.memory_space<vmem>>, vector<32x32xf32>
    %c0_1 = arith.constant 0 : index
    %c0_2 = arith.constant 0 : index
    %1 = vector.load %arg3[%c0_1, %c0_2] : memref<32x32xf32, #tpu.memory_space<vmem>>, vector<32x32xf32>
    %cst = arith.constant dense<0.000000e+00> : vector<32x32xf32>
    %2 = tpu.matmul %0, %1, %cst {dimension_numbers = #tpu.dot_dimension_numbers<[1], [0], [0], [1], [0, 0, 1, 1], [], []>} : vector<32x32xf32>, vector<32x32xf32>, vector<32x32xf32> -> vector<32x32xf32>
    %c0_3 = arith.constant 0 : index
    %c0_4 = arith.constant 0 : index
    %3 = vector.load %arg4[%c0_3, %c0_4] : memref<1x32xf32, #tpu.memory_space<vmem>>, vector<1x32xf32>
    %4 = vector.broadcast %3 : vector<1x32xf32> to vector<32x32xf32>
    %5 = arith.addf %2, %4 : vector<32x32xf32>
    %c0_5 = arith.constant 0 : index
    %c0_6 = arith.constant 0 : index
    %6 = vector.load %arg5[%c0_5, %c0_6] : memref<32x32xf32, #tpu.memory_space<vmem>>, vector<32x32xf32>
    %7 = arith.addf %5, %6 : vector<32x32xf32>
    %c0_7 = arith.constant 0 : index
    %c0_8 = arith.constant 0 : index
    %8 = vector.load %arg6[%c0_7, %c0_8] : memref<32x32xf32, #tpu.memory_space<vmem>>, vector<32x32xf32>
    tpu.vector_store %arg6[%c0_7, %c0_8], %7 {strides = array<i32>} : memref<32x32xf32, #tpu.memory_space<vmem>>, vector<32x32xf32>,
    return
  }
  func.func @transform_0(%arg0: i32, %arg1: i32) -> (i32, i32) {
    %c0_i32 = arith.constant 0 : i32
    %c0_i32_0 = arith.constant 0 : i32
    return %arg0, %c0_i32 : i32, i32
  }
  func.func @transform_1(%arg0: i32, %arg1: i32) -> (i32, i32) {
    %c0_i32 = arith.constant 0 : i32
    %c0_i32_0 = arith.constant 0 : i32
    return %c0_i32, %arg1 : i32, i32
  }
  func.func @transform_2(%arg0: i32, %arg1: i32) -> (i32, i32) {
    %c0_i32 = arith.constant 0 : i32
    %c0_i32_0 = arith.constant 0 : i32
    return %c0_i32, %arg1 : i32, i32
  }
  func.func @transform_3(%arg0: i32, %arg1: i32) -> (i32, i32) {
    %c0_i32 = arith.constant 0 : i32
    return %arg0, %arg1 : i32, i32
  }
  func.func @transform_4(%arg0: i32, %arg1: i32) -> (i32, i32) {
    %c0_i32 = arith.constant 0 : i32
    return %arg0, %arg1 : i32, i32
  }
}

module attributes {stable_mosaic.version = 11 : i64} {
  func.func @_fused_matmul_kernel(%arg0: i32, %arg1: i32, %arg2: memref<32x32xf32, #tpu.memory_space<vmem>>, %arg3: memref<1x32xf32, #tpu.memory_space<vmem>>, %arg4: memref<1x32xf32, #tpu.memory_space<vmem>>, %arg5: memref<32x128xf32, #tpu.memory_space<vmem>>, %arg6: memref<1x128xf32, #tpu.memory_space<vmem>>, %arg7: memref<32x128xf32, #tpu.memory_space<vmem>>) attributes {dimension_semantics = [#tpu.dimension_semantics<parallel>, #tpu.dimension_semantics<parallel>], iteration_bounds = array<i64: 2, 1>, scalar_prefetch = 0 : i64, scratch_operands = 0 : i64, tpu.core_type = #tpu.core_type<tc>, window_params = [{transform_indices = @transform_0, window_bounds = array<i64: 32, 32>}, {pipeline_mode = #tpu.pipeline_mode<synchronous>, transform_indices = @transform_1, window_bounds = array<i64: 1, 32>}, {pipeline_mode = #tpu.pipeline_mode<synchronous>, transform_indices = @transform_2, window_bounds = array<i64: 1, 32>}, {transform_indices = @transform_3, window_bounds = array<i64: 32, 128>}, {transform_indices = @transform_4, window_bounds = array<i64: 1, 128>}, {transform_indices = @transform_5, window_bounds = array<i64: 32, 128>}]} {
    %c0 = arith.constant 0 : index
    %c0_0 = arith.constant 0 : index
    %0 = vector.load %arg2[%c0, %c0_0] : memref<32x32xf32, #tpu.memory_space<vmem>>, vector<32x32xf32>
    %cst = arith.constant dense<0.000000e+00> : vector<32xf32>
    %1 = vector.multi_reduction <add>, %0, %cst [1] : vector<32x32xf32> to vector<32xf32>
    %2 = vector.shape_cast %1 : vector<32xf32> to vector<32x1xf32>
    %cst_1 = arith.constant 3.200000e+01 : f32
    %3 = vector.broadcast %cst_1 : f32 to vector<32x1xf32>
    %4 = arith.divf %2, %3 : vector<32x1xf32>
    %5 = vector.broadcast %4 : vector<32x1xf32> to vector<32x32xf32>
    %6 = arith.subf %0, %5 : vector<32x32xf32>
    %7 = vector.broadcast %4 : vector<32x1xf32> to vector<32x32xf32>
    %8 = arith.subf %0, %7 : vector<32x32xf32>
    %9 = arith.mulf %6, %8 : vector<32x32xf32>
    %cst_2 = arith.constant dense<0.000000e+00> : vector<32xf32>
    %10 = vector.multi_reduction <add>, %9, %cst_2 [1] : vector<32x32xf32> to vector<32xf32>
    %11 = vector.shape_cast %10 : vector<32xf32> to vector<32x1xf32>
    %cst_3 = arith.constant 3.200000e+01 : f32
    %12 = vector.broadcast %cst_3 : f32 to vector<32x1xf32>
    %13 = arith.divf %11, %12 : vector<32x1xf32>
    %14 = vector.broadcast %4 : vector<32x1xf32> to vector<32x32xf32>
    %15 = arith.subf %0, %14 : vector<32x32xf32>
    %cst_4 = arith.constant 9.99999997E-7 : f32
    %16 = vector.broadcast %cst_4 : f32 to vector<32x1xf32>
    %17 = arith.addf %13, %16 : vector<32x1xf32>
    %18 = math.rsqrt %17 : vector<32x1xf32>
    %19 = vector.broadcast %18 : vector<32x1xf32> to vector<32x32xf32>
    %20 = arith.mulf %15, %19 : vector<32x32xf32>
    %c0_5 = arith.constant 0 : index
    %c0_6 = arith.constant 0 : index
    %21 = vector.load %arg3[%c0_5, %c0_6] : memref<1x32xf32, #tpu.memory_space<vmem>>, vector<1x32xf32>
    %22 = vector.broadcast %21 : vector<1x32xf32> to vector<32x32xf32>
    %23 = arith.mulf %20, %22 : vector<32x32xf32>
    %c0_7 = arith.constant 0 : index
    %c0_8 = arith.constant 0 : index
    %24 = vector.load %arg4[%c0_7, %c0_8] : memref<1x32xf32, #tpu.memory_space<vmem>>, vector<1x32xf32>
    %25 = vector.broadcast %24 : vector<1x32xf32> to vector<32x32xf32>
    %26 = arith.addf %23, %25 : vector<32x32xf32>
    %c0_9 = arith.constant 0 : index
    %c0_10 = arith.constant 0 : index
    %27 = vector.load %arg5[%c0_9, %c0_10] : memref<32x128xf32, #tpu.memory_space<vmem>>, vector<32x128xf32>
    %cst_11 = arith.constant dense<0.000000e+00> : vector<32x128xf32>
    %28 = tpu.matmul %26, %27, %cst_11 {dimension_numbers = #tpu.dot_dimension_numbers<[1], [0], [0], [1], [0, 0, 1, 1], [], []>} : vector<32x32xf32>, vector<32x128xf32>, vector<32x128xf32> -> vector<32x128xf32>
    %c0_12 = arith.constant 0 : index
    %c0_13 = arith.constant 0 : index
    %29 = vector.load %arg6[%c0_12, %c0_13] : memref<1x128xf32, #tpu.memory_space<vmem>>, vector<1x128xf32>
    %30 = vector.broadcast %29 : vector<1x128xf32> to vector<32x128xf32>
    %31 = arith.addf %28, %30 : vector<32x128xf32>
    %cst_14 = arith.constant 0.707106769 : f32
    %32 = vector.broadcast %cst_14 : f32 to vector<32x128xf32>
    %33 = arith.mulf %31, %32 : vector<32x128xf32>
    %34 = math.absf %33 : vector<32x128xf32>
    %cst_15 = arith.constant 0.327591091 : f32
    %35 = vector.broadcast %cst_15 : f32 to vector<32x128xf32>
    %36 = arith.mulf %35, %34 : vector<32x128xf32>
    %cst_16 = arith.constant 1.000000e+00 : f32
    %37 = vector.broadcast %cst_16 : f32 to vector<32x128xf32>
    %38 = arith.addf %37, %36 : vector<32x128xf32>
    %cst_17 = arith.constant 1.000000e+00 : f32
    %39 = vector.broadcast %cst_17 : f32 to vector<32x128xf32>
    %40 = arith.divf %39, %38 : vector<32x128xf32>
    %cst_18 = arith.constant 1.06140542 : f32
    %41 = vector.broadcast %cst_18 : f32 to vector<32x128xf32>
    %42 = arith.mulf %41, %40 : vector<32x128xf32>
    %cst_19 = arith.constant 1.45315206 : f32
    %43 = vector.broadcast %cst_19 : f32 to vector<32x128xf32>
    %44 = arith.subf %42, %43 : vector<32x128xf32>
    %45 = arith.mulf %44, %40 : vector<32x128xf32>
    %cst_20 = arith.constant 1.42141378 : f32
    %46 = vector.broadcast %cst_20 : f32 to vector<32x128xf32>
    %47 = arith.addf %45, %46 : vector<32x128xf32>
    %48 = arith.mulf %47, %40 : vector<32x128xf32>
    %cst_21 = arith.constant 0.284496725 : f32
    %49 = vector.broadcast %cst_21 : f32 to vector<32x128xf32>
    %50 = arith.subf %48, %49 : vector<32x128xf32>
    %51 = arith.mulf %50, %40 : vector<32x128xf32>
    %cst_22 = arith.constant 0.254829586 : f32
    %52 = vector.broadcast %cst_22 : f32 to vector<32x128xf32>
    %53 = arith.addf %51, %52 : vector<32x128xf32>
    %54 = arith.mulf %53, %40 : vector<32x128xf32>
    %cst_23 = arith.constant 0.000000e+00 : f32
    %55 = vector.broadcast %cst_23 : f32 to vector<32x128xf32>
    %56 = arith.subf %55, %34 : vector<32x128xf32>
    %57 = arith.mulf %56, %34 : vector<32x128xf32>
    %58 = math.exp %57 : vector<32x128xf32>
    %59 = arith.mulf %54, %58 : vector<32x128xf32>
    %cst_24 = arith.constant 1.000000e+00 : f32
    %60 = vector.broadcast %cst_24 : f32 to vector<32x128xf32>
    %61 = arith.subf %60, %59 : vector<32x128xf32>
    %cst_25 = arith.constant 0.000000e+00 : f32
    %62 = vector.broadcast %cst_25 : f32 to vector<32x128xf32>
    %63 = arith.cmpf oge, %33, %62 : vector<32x128xf32>
    %cst_26 = arith.constant 0.000000e+00 : f32
    %64 = vector.broadcast %cst_26 : f32 to vector<32x128xf32>
    %65 = arith.subf %64, %61 : vector<32x128xf32>
    %66 = arith.select %63, %61, %65 : vector<32x128xi1>, vector<32x128xf32>
    %cst_27 = arith.constant 5.000000e-01 : f32
    %67 = vector.broadcast %cst_27 : f32 to vector<32x128xf32>
    %68 = arith.mulf %67, %31 : vector<32x128xf32>
    %cst_28 = arith.constant 1.000000e+00 : f32
    %69 = vector.broadcast %cst_28 : f32 to vector<32x128xf32>
    %70 = arith.addf %69, %66 : vector<32x128xf32>
    %71 = arith.mulf %68, %70 : vector<32x128xf32>
    %c0_29 = arith.constant 0 : index
    %c0_30 = arith.constant 0 : index
    %72 = vector.load %arg7[%c0_29, %c0_30] : memref<32x128xf32, #tpu.memory_space<vmem>>, vector<32x128xf32>
    tpu.vector_store %arg7[%c0_29, %c0_30], %71 {strides = array<i32>} : memref<32x128xf32, #tpu.memory_space<vmem>>, vector<32x128xf32>,
    return
  }
  func.func @transform_0(%arg0: i32, %arg1: i32) -> (i32, i32) {
    %c0_i32 = arith.constant 0 : i32
    %c0_i32_0 = arith.constant 0 : i32
    return %arg0, %c0_i32 : i32, i32
  }
  func.func @transform_1(%arg0: i32, %arg1: i32) -> (i32, i32) {
    %c0_i32 = arith.constant 0 : i32
    %c0_i32_0 = arith.constant 0 : i32
    %c0_i32_1 = arith.constant 0 : i32
    return %c0_i32, %c0_i32_0 : i32, i32
  }
  func.func @transform_2(%arg0: i32, %arg1: i32) -> (i32, i32) {
    %c0_i32 = arith.constant 0 : i32
    %c0_i32_0 = arith.constant 0 : i32
    %c0_i32_1 = arith.constant 0 : i32
    return %c0_i32, %c0_i32_0 : i32, i32
  }
  func.func @transform_3(%arg0: i32, %arg1: i32) -> (i32, i32) {
    %c0_i32 = arith.constant 0 : i32
    %c0_i32_0 = arith.constant 0 : i32
    return %c0_i32, %arg1 : i32, i32
  }
  func.func @transform_4(%arg0: i32, %arg1: i32) -> (i32, i32) {
    %c0_i32 = arith.constant 0 : i32
    %c0_i32_0 = arith.constant 0 : i32
    return %c0_i32, %arg1 : i32, i32
  }
  func.func @transform_5(%arg0: i32, %arg1: i32) -> (i32, i32) {
    %c0_i32 = arith.constant 0 : i32
    return %arg0, %arg1 : i32, i32
  }
}

module attributes {stable_mosaic.version = 11 : i64} {
  func.func @_fused_matmul_kernel(%arg0: i32, %arg1: i32, %arg2: memref<32x128xf32, #tpu.memory_space<vmem>>, %arg3: memref<128x32xf32, #tpu.memory_space<vmem>>, %arg4: memref<1x32xf32, #tpu.memory_space<vmem>>, %arg5: memref<32x32xf32, #tpu.memory_space<vmem>>, %arg6: memref<32x32xf32, #tpu.memory_space<vmem>>) attributes {dimension_semantics = [#tpu.dimension_semantics<parallel>, #tpu.dimension_semantics<parallel>], iteration_bounds = array<i64: 2, 1>, scalar_prefetch = 0 : i64, scratch_operands = 0 : i64, tpu.core_type = #tpu.core_type<tc>, window_params = [{transform_indices = @transform_0, window_bounds = array<i64: 32, 128>}, {transform_indices = @transform_1, window_bounds = array<i64: 128, 32>}, {transform_indices = @transform_2, window_bounds = array<i64: 1, 32>}, {transform_indices = @transform_3, window_bounds = array<i64: 32, 32>}, {transform_indices = @transform_4, window_bounds = array<i64: 32, 32>}]} {
    %c0 = arith.constant 0 : index
    %c0_0 = arith.constant 0 : index
    %0 = vector.load %arg2[%c0, %c0_0] : memref<32x128xf32, #tpu.memory_space<vmem>>, vector<32x128xf32>
    %c0_1 = arith.constant 0 : index
    %c0_2 = arith.constant 0 : index
    %1 = vector.load %arg3[%c0_1, %c0_2] : memref<128x32xf32, #tpu.memory_space<vmem>>, vector<128x32xf32>
    %cst = arith.constant dense<0.000000e+00> : vector<32x32xf32>
    %2 = tpu.matmul %0, %1, %cst {dimension_numbers = #tpu.dot_dimension_numbers<[1], [0], [0], [1], [0, 0, 1, 1], [], []>} : vector<32x128xf32>, vector<128x32xf32>, vector<32x32xf32> -> vector<32x32xf32>
    %c0_3 = arith.constant 0 : index
    %c0_4 = arith.constant 0 : index
    %3 = vector.load %arg4[%c0_3, %c0_4] : memref<1x32xf32, #tpu.memory_space<vmem>>, vector<1x32xf32>
    %4 = vector.broadcast %3 : vector<1x32xf32> to vector<32x32xf32>
    %5 = arith.addf %2, %4 : vector<32x32xf32>
    %c0_5 = arith.constant 0 : index
    %c0_6 = arith.constant 0 : index
    %6 = vector.load %arg5[%c0_5, %c0_6] : memref<32x32xf32, #tpu.memory_space<vmem>>, vector<32x32xf32>
    %7 = arith.addf %5, %6 : vector<32x32xf32>
    %c0_7 = arith.constant 0 : index
    %c0_8 = arith.constant 0 : index
    %8 = vector.load %arg6[%c0_7, %c0_8] : memref<32x32xf32, #tpu.memory_space<vmem>>, vector<32x32xf32>
    tpu.vector_store %arg6[%c0_7, %c0_8], %7 {strides = array<i32>} : memref<32x32xf32, #tpu.memory_space<vmem>>, vector<32x32xf32>,
    return
  }
  func.func @transform_0(%arg0: i32, %arg1: i32) -> (i32, i32) {
    %c0_i32 = arith.constant 0 : i32
    %c0_i32_0 = arith.constant 0 : i32
    return %arg0, %c0_i32 : i32, i32
  }
  func.func @transform_1(%arg0: i32, %arg1: i32) -> (i32, i32) {
    %c0_i32 = arith.constant 0 : i32
    %c0_i32_0 = arith.constant 0 : i32
    return %c0_i32, %arg1 : i32, i32
  }
  func.func @transform_2(%arg0: i32, %arg1: i32) -> (i32, i32) {
    %c0_i32 = arith.constant 0 : i32
    %c0_i32_0 = arith.constant 0 : i32
    return %c0_i32, %arg1 : i32, i32
  }
  func.func @transform_3(%arg0: i32, %arg1: i32) -> (i32, i32) {
    %c0_i32 = arith.constant 0 : i32
    return %arg0, %arg1 : i32, i32
  }
  func.func @transform_4(%arg0: i32, %arg1: i32) -> (i32, i32) {
    %c0_i32 = arith.constant 0 : i32
    return %arg0, %arg1 : i32, i32
  }
}

module attributes {stable_mosaic.version = 11 : i64} {
  func.func @_layernorm_kernel(%arg0: i32, %arg1: memref<32x32xf32, #tpu.memory_space<vmem>>, %arg2: memref<1x32xf32, #tpu.memory_space<vmem>>, %arg3: memref<1x32xf32, #tpu.memory_space<vmem>>, %arg4: memref<32x32xf32, #tpu.memory_space<vmem>>) attributes {dimension_semantics = [#tpu.dimension_semantics<parallel>], iteration_bounds = array<i64: 2>, scalar_prefetch = 0 : i64, scratch_operands = 0 : i64, tpu.core_type = #tpu.core_type<tc>, window_params = [{transform_indices = @transform_0, window_bounds = array<i64: 32, 32>}, {pipeline_mode = #tpu.pipeline_mode<synchronous>, transform_indices = @transform_1, window_bounds = array<i64: 1, 32>}, {pipeline_mode = #tpu.pipeline_mode<synchronous>, transform_indices = @transform_2, window_bounds = array<i64: 1, 32>}, {transform_indices = @transform_3, window_bounds = array<i64: 32, 32>}]} {
    %c0 = arith.constant 0 : index
    %c0_0 = arith.constant 0 : index
    %0 = vector.load %arg1[%c0, %c0_0] : memref<32x32xf32, #tpu.memory_space<vmem>>, vector<32x32xf32>
    %cst = arith.constant dense<0.000000e+00> : vector<32xf32>
    %1 = vector.multi_reduction <add>, %0, %cst [1] : vector<32x32xf32> to vector<32xf32>
    %2 = vector.shape_cast %1 : vector<32xf32> to vector<32x1xf32>
    %cst_1 = arith.constant 3.200000e+01 : f32
    %3 = vector.broadcast %cst_1 : f32 to vector<32x1xf32>
    %4 = arith.divf %2, %3 : vector<32x1xf32>
    %5 = vector.broadcast %4 : vector<32x1xf32> to vector<32x32xf32>
    %6 = arith.subf %0, %5 : vector<32x32xf32>
    %7 = vector.broadcast %4 : vector<32x1xf32> to vector<32x32xf32>
    %8 = arith.subf %0, %7 : vector<32x32xf32>
    %9 = arith.mulf %6, %8 : vector<32x32xf32>
    %cst_2 = arith.constant dense<0.000000e+00> : vector<32xf32>
    %10 = vector.multi_reduction <add>, %9, %cst_2 [1] : vector<32x32xf32> to vector<32xf32>
    %11 = vector.shape_cast %10 : vector<32xf32> to vector<32x1xf32>
    %cst_3 = arith.constant 3.200000e+01 : f32
    %12 = vector.broadcast %cst_3 : f32 to vector<32x1xf32>
    %13 = arith.divf %11, %12 : vector<32x1xf32>
    %14 = vector.broadcast %4 : vector<32x1xf32> to vector<32x32xf32>
    %15 = arith.subf %0, %14 : vector<32x32xf32>
    %cst_4 = arith.constant 9.99999997E-7 : f32
    %16 = vector.broadcast %cst_4 : f32 to vector<32x1xf32>
    %17 = arith.addf %13, %16 : vector<32x1xf32>
    %18 = math.rsqrt %17 : vector<32x1xf32>
    %19 = vector.broadcast %18 : vector<32x1xf32> to vector<32x32xf32>
    %20 = arith.mulf %15, %19 : vector<32x32xf32>
    %c0_5 = arith.constant 0 : index
    %c0_6 = arith.constant 0 : index
    %21 = vector.load %arg2[%c0_5, %c0_6] : memref<1x32xf32, #tpu.memory_space<vmem>>, vector<1x32xf32>
    %22 = vector.broadcast %21 : vector<1x32xf32> to vector<32x32xf32>
    %23 = arith.mulf %20, %22 : vector<32x32xf32>
    %c0_7 = arith.constant 0 : index
    %c0_8 = arith.constant 0 : index
    %24 = vector.load %arg3[%c0_7, %c0_8] : memref<1x32xf32, #tpu.memory_space<vmem>>, vector<1x32xf32>
    %25 = vector.broadcast %24 : vector<1x32xf32> to vector<32x32xf32>
    %26 = arith.addf %23, %25 : vector<32x32xf32>
    %c0_9 = arith.constant 0 : index
    %c0_10 = arith.constant 0 : index
    %27 = vector.load %arg4[%c0_9, %c0_10] : memref<32x32xf32, #tpu.memory_space<vmem>>, vector<32x32xf32>
    tpu.vector_store %arg4[%c0_9, %c0_10], %26 {strides = array<i32>} : memref<32x32xf32, #tpu.memory_space<vmem>>, vector<32x32xf32>,
    return
  }
  func.func @transform_0(%arg0: i32) -> (i32, i32) {
    %c0_i32 = arith.constant 0 : i32
    %c0_i32_0 = arith.constant 0 : i32
    return %arg0, %c0_i32 : i32, i32
  }
  func.func @transform_1(%arg0: i32) -> (i32, i32) {
    %c0_i32 = arith.constant 0 : i32
    %c0_i32_0 = arith.constant 0 : i32
    %c0_i32_1 = arith.constant 0 : i32
    return %c0_i32, %c0_i32_0 : i32, i32
  }
  func.func @transform_2(%arg0: i32) -> (i32, i32) {
    %c0_i32 = arith.constant 0 : i32
    %c0_i32_0 = arith.constant 0 : i32
    %c0_i32_1 = arith.constant 0 : i32
    return %c0_i32, %c0_i32_0 : i32, i32
  }
  func.func @transform_3(%arg0: i32) -> (i32, i32) {
    %c0_i32 = arith.constant 0 : i32
    %c0_i32_0 = arith.constant 0 : i32
    return %arg0, %c0_i32 : i32, i32
  }
}

module attributes {stable_mosaic.version = 11 : i64} {
  func.func @_attn_kernel(%arg0: i32, %arg1: memref<4x8x96xf32, #tpu.memory_space<vmem>>, %arg2: memref<4x8x32xf32, #tpu.memory_space<vmem>>) attributes {dimension_semantics = [#tpu.dimension_semantics<parallel>], iteration_bounds = array<i64: 2>, scalar_prefetch = 0 : i64, scratch_operands = 0 : i64, tpu.core_type = #tpu.core_type<tc>, window_params = [{transform_indices = @transform_0, window_bounds = array<i64: 4, 8, 96>}, {transform_indices = @transform_1, window_bounds = array<i64: 4, 8, 32>}]} {
    %c0 = arith.constant 0 : index
    %c0_0 = arith.constant 0 : index
    %c0_1 = arith.constant 0 : index
    %0 = vector.load %arg1[%c0, %c0_0, %c0_1] : memref<4x8x96xf32, #tpu.memory_space<vmem>>, vector<4x8x96xf32>
    %1 = vector.extract_strided_slice %0 {offsets = [0, 0, 0], sizes = [4, 8, 32], strides = [1, 1, 1]} : vector<4x8x96xf32> to vector<4x8x32xf32>
    %cst = arith.constant 0.353553385 : f32
    %2 = vector.broadcast %cst : f32 to vector<4x8x32xf32>
    %3 = arith.mulf %1, %2 : vector<4x8x32xf32>
    %4 = vector.extract_strided_slice %0 {offsets = [0, 0, 32], sizes = [4, 8, 32], strides = [1, 1, 1]} : vector<4x8x96xf32> to vector<4x8x32xf32>
    %5 = vector.extract_strided_slice %0 {offsets = [0, 0, 64], sizes = [4, 8, 32], strides = [1, 1, 1]} : vector<4x8x96xf32> to vector<4x8x32xf32>
    %6 = vector.extract_strided_slice %3 {offsets = [0, 0, 0], sizes = [4, 8, 8], strides = [1, 1, 1]} : vector<4x8x32xf32> to vector<4x8x8xf32>
    %7 = vector.extract_strided_slice %4 {offsets = [0, 0, 0], sizes = [4, 8, 8], strides = [1, 1, 1]} : vector<4x8x32xf32> to vector<4x8x8xf32>
    %8 = vector.extract_strided_slice %5 {offsets = [0, 0, 0], sizes = [4, 8, 8], strides = [1, 1, 1]} : vector<4x8x32xf32> to vector<4x8x8xf32>
    "tpu.trace_start"() <{level = 10 : i32, message = "bnd,bmd->bnm"}> : () -> ()
    %cst_2 = arith.constant dense<0.000000e+00> : vector<4x8x8xf32>
    %9 = tpu.matmul %6, %7, %cst_2 {dimension_numbers = #tpu.dot_dimension_numbers<[2], [2], [1], [1], [0, 0, 0, 1, 1, 1], [0], [0]>} : vector<4x8x8xf32>, vector<4x8x8xf32>, vector<4x8x8xf32> -> vector<4x8x8xf32>
    "tpu.trace_stop"() : () -> ()
    %cst_3 = arith.constant dense<0xFF800000> : vector<4x8xf32>
    %10 = vector.multi_reduction <maximumf>, %9, %cst_3 [2] : vector<4x8x8xf32> to vector<4x8xf32>
    %11 = vector.shape_cast %10 : vector<4x8xf32> to vector<4x8x1xf32>
    %12 = vector.broadcast %11 : vector<4x8x1xf32> to vector<4x8x8xf32>
    %13 = arith.subf %9, %12 : vector<4x8x8xf32>
    %14 = math.exp %13 : vector<4x8x8xf32>
    %cst_4 = arith.constant dense<0.000000e+00> : vector<4x8xf32>
    %15 = vector.multi_reduction <add>, %14, %cst_4 [2] : vector<4x8x8xf32> to vector<4x8xf32>
    %16 = vector.shape_cast %15 : vector<4x8xf32> to vector<4x8x1xf32>
    %17 = tpu.reciprocal %16 {approx = true} : vector<4x8x1xf32> -> vector<4x8x1xf32>
    %18 = vector.broadcast %17 : vector<4x8x1xf32> to vector<4x8x8xf32>
    %19 = arith.mulf %14, %18 : vector<4x8x8xf32>
    "tpu.trace_start"() <{level = 10 : i32, message = "bnm,bmd->bnd"}> : () -> ()
    %cst_5 = arith.constant dense<0.000000e+00> : vector<4x8x8xf32>
    %20 = tpu.matmul %19, %8, %cst_5 {dimension_numbers = #tpu.dot_dimension_numbers<[2], [1], [1], [2], [0, 0, 0, 1, 1, 2], [0], [0]>} : vector<4x8x8xf32>, vector<4x8x8xf32>, vector<4x8x8xf32> -> vector<4x8x8xf32>
    "tpu.trace_stop"() : () -> ()
    %21 = vector.extract_strided_slice %3 {offsets = [0, 0, 8], sizes = [4, 8, 8], strides = [1, 1, 1]} : vector<4x8x32xf32> to vector<4x8x8xf32>
    %22 = vector.extract_strided_slice %4 {offsets = [0, 0, 8], sizes = [4, 8, 8], strides = [1, 1, 1]} : vector<4x8x32xf32> to vector<4x8x8xf32>
    %23 = vector.extract_strided_slice %5 {offsets = [0, 0, 8], sizes = [4, 8, 8], strides = [1, 1, 1]} : vector<4x8x32xf32> to vector<4x8x8xf32>
    "tpu.trace_start"() <{level = 10 : i32, message = "bnd,bmd->bnm"}> : () -> ()
    %cst_6 = arith.constant dense<0.000000e+00> : vector<4x8x8xf32>
    %24 = tpu.matmul %21, %22, %cst_6 {dimension_numbers = #tpu.dot_dimension_numbers<[2], [2], [1], [1], [0, 0, 0, 1, 1, 1], [0], [0]>} : vector<4x8x8xf32>, vector<4x8x8xf32>, vector<4x8x8xf32> -> vector<4x8x8xf32>
    "tpu.trace_stop"() : () -> ()
    %cst_7 = arith.constant dense<0xFF800000> : vector<4x8xf32>
    %25 = vector.multi_reduction <maximumf>, %24, %cst_7 [2] : vector<4x8x8xf32> to vector<4x8xf32>
    %26 = vector.shape_cast %25 : vector<4x8xf32> to vector<4x8x1xf32>
    %27 = vector.broadcast %26 : vector<4x8x1xf32> to vector<4x8x8xf32>
    %28 = arith.subf %24, %27 : vector<4x8x8xf32>
    %29 = math.exp %28 : vector<4x8x8xf32>
    %cst_8 = arith.constant dense<0.000000e+00> : vector<4x8xf32>
    %30 = vector.multi_reduction <add>, %29, %cst_8 [2] : vector<4x8x8xf32> to vector<4x8xf32>
    %31 = vector.shape_cast %30 : vector<4x8xf32> to vector<4x8x1xf32>
    %32 = tpu.reciprocal %31 {approx = true} : vector<4x8x1xf32> -> vector<4x8x1xf32>
    %33 = vector.broadcast %32 : vector<4x8x1xf32> to vector<4x8x8xf32>
    %34 = arith.mulf %29, %33 : vector<4x8x8xf32>
    "tpu.trace_start"() <{level = 10 : i32, message = "bnm,bmd->bnd"}> : () -> ()
    %cst_9 = arith.constant dense<0.000000e+00> : vector<4x8x8xf32>
    %35 = tpu.matmul %34, %23, %cst_9 {dimension_numbers = #tpu.dot_dimension_numbers<[2], [1], [1], [2], [0, 0, 0, 1, 1, 2], [0], [0]>} : vector<4x8x8xf32>, vector<4x8x8xf32>, vector<4x8x8xf32> -> vector<4x8x8xf32>
    "tpu.trace_stop"() : () -> ()
    %36 = vector.extract_strided_slice %3 {offsets = [0, 0, 16], sizes = [4, 8, 8], strides = [1, 1, 1]} : vector<4x8x32xf32> to vector<4x8x8xf32>
    %37 = vector.extract_strided_slice %4 {offsets = [0, 0, 16], sizes = [4, 8, 8], strides = [1, 1, 1]} : vector<4x8x32xf32> to vector<4x8x8xf32>
    %38 = vector.extract_strided_slice %5 {offsets = [0, 0, 16], sizes = [4, 8, 8], strides = [1, 1, 1]} : vector<4x8x32xf32> to vector<4x8x8xf32>
    "tpu.trace_start"() <{level = 10 : i32, message = "bnd,bmd->bnm"}> : () -> ()
    %cst_10 = arith.constant dense<0.000000e+00> : vector<4x8x8xf32>
    %39 = tpu.matmul %36, %37, %cst_10 {dimension_numbers = #tpu.dot_dimension_numbers<[2], [2], [1], [1], [0, 0, 0, 1, 1, 1], [0], [0]>} : vector<4x8x8xf32>, vector<4x8x8xf32>, vector<4x8x8xf32> -> vector<4x8x8xf32>
    "tpu.trace_stop"() : () -> ()
    %cst_11 = arith.constant dense<0xFF800000> : vector<4x8xf32>
    %40 = vector.multi_reduction <maximumf>, %39, %cst_11 [2] : vector<4x8x8xf32> to vector<4x8xf32>
    %41 = vector.shape_cast %40 : vector<4x8xf32> to vector<4x8x1xf32>
    %42 = vector.broadcast %41 : vector<4x8x1xf32> to vector<4x8x8xf32>
    %43 = arith.subf %39, %42 : vector<4x8x8xf32>
    %44 = math.exp %43 : vector<4x8x8xf32>
    %cst_12 = arith.constant dense<0.000000e+00> : vector<4x8xf32>
    %45 = vector.multi_reduction <add>, %44, %cst_12 [2] : vector<4x8x8xf32> to vector<4x8xf32>
    %46 = vector.shape_cast %45 : vector<4x8xf32> to vector<4x8x1xf32>
    %47 = tpu.reciprocal %46 {approx = true} : vector<4x8x1xf32> -> vector<4x8x1xf32>
    %48 = vector.broadcast %47 : vector<4x8x1xf32> to vector<4x8x8xf32>
    %49 = arith.mulf %44, %48 : vector<4x8x8xf32>
    "tpu.trace_start"() <{level = 10 : i32, message = "bnm,bmd->bnd"}> : () -> ()
    %cst_13 = arith.constant dense<0.000000e+00> : vector<4x8x8xf32>
    %50 = tpu.matmul %49, %38, %cst_13 {dimension_numbers = #tpu.dot_dimension_numbers<[2], [1], [1], [2], [0, 0, 0, 1, 1, 2], [0], [0]>} : vector<4x8x8xf32>, vector<4x8x8xf32>, vector<4x8x8xf32> -> vector<4x8x8xf32>
    "tpu.trace_stop"() : () -> ()
    %51 = vector.extract_strided_slice %3 {offsets = [0, 0, 24], sizes = [4, 8, 8], strides = [1, 1, 1]} : vector<4x8x32xf32> to vector<4x8x8xf32>
    %52 = vector.extract_strided_slice %4 {offsets = [0, 0, 24], sizes = [4, 8, 8], strides = [1, 1, 1]} : vector<4x8x32xf32> to vector<4x8x8xf32>
    %53 = vector.extract_strided_slice %5 {offsets = [0, 0, 24], sizes = [4, 8, 8], strides = [1, 1, 1]} : vector<4x8x32xf32> to vector<4x8x8xf32>
    "tpu.trace_start"() <{level = 10 : i32, message = "bnd,bmd->bnm"}> : () -> ()
    %cst_14 = arith.constant dense<0.000000e+00> : vector<4x8x8xf32>
    %54 = tpu.matmul %51, %52, %cst_14 {dimension_numbers = #tpu.dot_dimension_numbers<[2], [2], [1], [1], [0, 0, 0, 1, 1, 1], [0], [0]>} : vector<4x8x8xf32>, vector<4x8x8xf32>, vector<4x8x8xf32> -> vector<4x8x8xf32>
    "tpu.trace_stop"() : () -> ()
    %cst_15 = arith.constant dense<0xFF800000> : vector<4x8xf32>
    %55 = vector.multi_reduction <maximumf>, %54, %cst_15 [2] : vector<4x8x8xf32> to vector<4x8xf32>
    %56 = vector.shape_cast %55 : vector<4x8xf32> to vector<4x8x1xf32>
    %57 = vector.broadcast %56 : vector<4x8x1xf32> to vector<4x8x8xf32>
    %58 = arith.subf %54, %57 : vector<4x8x8xf32>
    %59 = math.exp %58 : vector<4x8x8xf32>
    %cst_16 = arith.constant dense<0.000000e+00> : vector<4x8xf32>
    %60 = vector.multi_reduction <add>, %59, %cst_16 [2] : vector<4x8x8xf32> to vector<4x8xf32>
    %61 = vector.shape_cast %60 : vector<4x8xf32> to vector<4x8x1xf32>
    %62 = tpu.reciprocal %61 {approx = true} : vector<4x8x1xf32> -> vector<4x8x1xf32>
    %63 = vector.broadcast %62 : vector<4x8x1xf32> to vector<4x8x8xf32>
    %64 = arith.mulf %59, %63 : vector<4x8x8xf32>
    "tpu.trace_start"() <{level = 10 : i32, message = "bnm,bmd->bnd"}> : () -> ()
    %cst_17 = arith.constant dense<0.000000e+00> : vector<4x8x8xf32>
    %65 = tpu.matmul %64, %53, %cst_17 {dimension_numbers = #tpu.dot_dimension_numbers<[2], [1], [1], [2], [0, 0, 0, 1, 1, 2], [0], [0]>} : vector<4x8x8xf32>, vector<4x8x8xf32>, vector<4x8x8xf32> -> vector<4x8x8xf32>
    "tpu.trace_stop"() : () -> ()
    %66 = tpu.concatenate %20, %35, %50, %65 in 2 : vector<4x8x8xf32>, vector<4x8x8xf32>, vector<4x8x8xf32>, vector<4x8x8xf32> -> vector<4x8x32xf32>
    %c0_18 = arith.constant 0 : index
    %c0_19 = arith.constant 0 : index
    %c0_20 = arith.constant 0 : index
    %67 = vector.load %arg2[%c0_18, %c0_19, %c0_20] : memref<4x8x32xf32, #tpu.memory_space<vmem>>, vector<4x8x32xf32>
    tpu.vector_store %arg2[%c0_18, %c0_19, %c0_20], %66 {strides = array<i32>} : memref<4x8x32xf32, #tpu.memory_space<vmem>>, vector<4x8x32xf32>,
    return
  }
  func.func @transform_0(%arg0: i32) -> (i32, i32, i32) {
    %c0_i32 = arith.constant 0 : i32
    %c0_i32_0 = arith.constant 0 : i32
    %c0_i32_1 = arith.constant 0 : i32
    return %arg0, %c0_i32, %c0_i32_0 : i32, i32, i32
  }
  func.func @transform_1(%arg0: i32) -> (i32, i32, i32) {
    %c0_i32 = arith.constant 0 : i32
    %c0_i32_0 = arith.constant 0 : i32
    %c0_i32_1 = arith.constant 0 : i32
    return %arg0, %c0_i32, %c0_i32_0 : i32, i32, i32
  }
}

</mosaic_0001>

<bundles_post_ra>
// kernel: distilled_vit_forward.22
= control target key start
LH: loop header
LB: loop body
LE: loop exit
PB: predicated region body
PF: predicated region fallthrough
CT: control target
= control target key end

     0   :  { %s573_s12 = smov 0   ;;  %s575_s13 = smov 0   ;;  %s634_s0 = inlined_call_operand.vmem [shape: f32[64,48], index: 0, kind: input, shape index: {}]   ;;  %s635_s1 = inlined_call_operand.vmem [shape: f32[48,32], index: 1, kind: input, shape index: {}]   ;;  %s636_s2 = inlined_call_operand.vmem [shape: f32[1,32], index: 2, kind: input, shape index: {}]   ;;  %s637_s3 = inlined_call_operand.vmem [shape: f32[64,32], index: 3, kind: output, shape index: {}]  }
   0x1   :  { %s577_s14 = smov 0  }
   0x2 LB: > { %s25_s15 = sadd.s32 1, %s547_s13  ;;  %p453_p0 = scmp.ge.s32.totalorder %s551_s14, 1  ;;  %s551_s14 = sphi %s577_s14, %s13_s14   ;;  %s547_s13 = sphi %s575_s13, %s639_s13   ;;  %s543_s12 = sphi %s573_s12, %s638_s12  }
   0x3   : > { %p27_p1 = scmp.ge.s32.totalorder %s25_s15, 2  ;;  %p169_p2 = scmp.lt.s32.totalorder %s551_s14, 3 }
   0x5   : > { %s641_s15 = smov (%p27_p1, %s25_s15), 0  ;;  %p170_p3 = pnand %p453_p0, %p169_p2 }
   0x6   : > { %s454_s20 = sshll.u32 (!%p170_p3), %s543_s12, 2 }
   0x7   : > { %173 = sbr.rel (%p170_p3) target bundleno = 224 (0xe0), region = 32  ;;  %p204_p4 = scmp.lt.s32.totalorder (!%p170_p3), %s454_s20, 7 }
   0xc   : > { %v234_v0 = vld [vmem:[%s635_s1 + $0x28] sm:$0xff]  ;;  %v233_v1 = vld [vmem:[%s635_s1 + $0x20] sm:$0xff]  ;;  %v232_v2 = vld [vmem:[%s635_s1 + $0x18] sm:$0xff]  ;;  %s643_s20 = smov (!%p204_p4, %s454_s20), 7  ;;  %vm242_vm0 = vcmask 392192   ;;  %vm340_vm1 = vcmask 261120  }
   0xd   : > { %475 = vmatprep.subr.mxu0 %v234_v0  ;;  %493 = vmatprep.subr.mxu1 %v234_v0  ;;  %v231_v3 = vld [vmem:[%s635_s1 + $0x10] sm:$0xff]  ;;  %s455_s25 = sshll.u32 %s643_s20, 3  ;;  %v230_v4 = vld [vmem:[%s635_s1 + $0x8] sm:$0xff]  ;;  %v229_v5 = vld [vmem:[%s635_s1] sm:$0xff] }
   0xe   : > { %476 = vmatpush3.msra.mxu0 %v234_v0  ;;  %499 = vmatpush3.msra.mxu1 %v234_v0  ;;  %s207_s30 = scalar_lea.vmem %s634_s0, %s455_s25  ;;  %v458_v12 = vld [vmem:[%s636_s2] ss:$0 sm:$0xff]  ;;  %s223_s10 = scalar_lea.vmem %s637_s3, %s455_s25 }
   0xf   : > { %477 = vmatprep.subr.mxu0 %v233_v1  ;;  %494 = vmatprep.subr.mxu1 %v233_v1  ;;  %v225_v6 = vld [vmem:[%s207_s30] sm:$0xff]  ;;  %v227_v7 = vld [vmem:[%s207_s30 + $0x10] sm:$0xff]  ;;  %v226_v8 = vld [vmem:[%s207_s30 + $0x8] sm:$0xff] }
  0x10   : > { %478 = vmatpush3.msra.mxu0 %v233_v1  ;;  %500 = vmatpush3.msra.mxu1 %v233_v1  ;;  %v228_v9 = vld [vmem:[%s207_s30 + $0x18] sm:$0xff] }
  0x11   : > { %479 = vmatprep.subr.mxu0 %v232_v2  ;;  %495 = vmatprep.subr.mxu1 %v232_v2 }
  0x12   : > { %480 = vmatpush3.msra.mxu0 %v232_v2  ;;  %501 = vmatpush3.msra.mxu1 %v232_v2 }
  0x13   : > { %481 = vmatprep.subr.mxu0 %v231_v3  ;;  %496 = vmatprep.subr.mxu1 %v231_v3 }
  0x14   : > { %482 = vmatpush3.msra.mxu0 %v231_v3  ;;  %502 = vmatpush3.msra.mxu1 %v231_v3 }
  0x15   : > { %483 = vmatprep.subr.mxu0 %v230_v4  ;;  %497 = vmatprep.subr.mxu1 %v230_v4 }
  0x16   : > { %484 = vmatpush3.msra.mxu0 %v230_v4  ;;  %503 = vmatpush3.msra.mxu1 %v230_v4 }
  0x17   : > { %485 = vmatprep.subr.mxu0 %v229_v5  ;;  %498 = vmatprep.subr.mxu1 %v229_v5 }
  0x18   : > { %486 = vmatpush3.msra.mxu0 %v229_v5  ;;  %504 = vmatpush3.msra.mxu1 %v229_v5 }
  0x19   : > { %487 = vmatprep.mubr.msk.f32.mxu0 %vm242_vm0, %v225_v6  ;;  %490 = vmatprep.mubr.msk.f32.mxu1 %vm242_vm0, %v227_v7 }
  0x1a   : > { %488 = vmatmul.mubr.msk.f32.vlgmr.msra.gmra.mxu0 %vm242_vm0, %v226_v8  ;;  %491 = vmatmul.mubr.msk.f32.vlgmr.msra.gmra.mxu1 %vm242_vm0, %v228_v9 }
  0xda   : > { %v489_v10 = vpop.f32.mrf.mxu0  ;;  %v492_v11 = vpop.f32.mrf.mxu1 }
  0xdb   : > { %v327_v16 = vadd.f32 %v489_v10, %v458_v12  ;;  %v337_v18 = vadd.f32 %v492_v11, %v458_v12 }
  0xdc   : > { %v321_v13 = vpop.f32.mrf.mxu0  ;;  %v331_v14 = vpop.f32.mrf.mxu1 }
  0xdd   : > { %v322_v15 = vadd.f32 %v458_v12, %v321_v13  ;;  %v332_v17 = vadd.f32 %v458_v12, %v331_v14  ;;  %342 = vst.msk [vmem:[%s223_s10 + $0x8] sm:$0xff] %vm340_vm1, %v327_v16  ;;  %344 = vst.msk [vmem:[%s223_s10 + $0x18] sm:$0xff] %vm340_vm1, %v337_v18 }
  0xdf   : > { %341 = vst.msk [vmem:[%s223_s10] sm:$0xff] %vm340_vm1, %v322_v15  ;;  %343 = vst.msk [vmem:[%s223_s10 + $0x10] sm:$0xff] %vm340_vm1, %v332_v17 }
  0xe0 PF: > { %s13_s14 = sadd.s32 1, %s551_s14   ;;  %s638_s12 = smov %s547_s13 }
  0xe1   : > { %p10_p5 = scmp.ge.s32.totalorder %s13_s14, 4   ;;  %s639_s13 = smov %s641_s15 }
  0xe3   :  { %12 = sbr.rel (!%p10_p5) target bundleno = 2 (0x2), region = 68 }

// kernel: distilled_vit_forward.23
= control target key start
LH: loop header
LB: loop body
LE: loop exit
PB: predicated region body
PF: predicated region fallthrough
CT: control target
= control target key end

     0   :  { %s710_s18 = smov 0   ;;  %s712_s19 = smov 0   ;;  %s788_s0 = inlined_call_operand.vmem [shape: f32[64,32], index: 0, kind: input, shape index: {}]   ;;  %s789_s1 = inlined_call_operand.vmem [shape: f32[1,32], index: 1, kind: input, shape index: {}]   ;;  %s790_s2 = inlined_call_operand.vmem [shape: f32[1,32], index: 2, kind: input, shape index: {}]   ;;  %s791_s3 = inlined_call_operand.vmem [shape: f32[32,96], index: 3, kind: input, shape index: {}]   ;;  %s792_s4 = inlined_call_operand.vmem [shape: f32[1,96], index: 4, kind: input, shape index: {}]   ;;  %s793_s5 = inlined_call_operand.vmem [shape: f32[64,96], index: 5, kind: output, shape index: {}]  }
   0x1   :  { %s714_s20 = smov 0  }
   0x2 LB: > { %s27_s21 = sadd.s32 1, %s674_s19  ;;  %p580_p0 = scmp.ge.s32.totalorder %s678_s20, 1  ;;  %s678_s20 = sphi %s714_s20, %s15_s20   ;;  %s674_s19 = sphi %s712_s19, %s795_s19   ;;  %s670_s18 = sphi %s710_s18, %s794_s18  }
   0x3   : > { %p29_p1 = scmp.ge.s32.totalorder %s27_s21, 2  ;;  %p219_p2 = scmp.lt.s32.totalorder %s678_s20, 3 }
   0x5   : > { %s797_s21 = smov (%p29_p1, %s27_s21), 0  ;;  %p220_p3 = pnand %p580_p0, %p219_p2 }
   0x6   : > { %s581_s22 = sshll.u32 (!%p220_p3), %s670_s18, 2 }
   0x7   : > { %223 = sbr.rel (%p220_p3) target bundleno = 530 (0x212), region = 40  ;;  %p258_p4 = scmp.lt.s32.totalorder (!%p220_p3), %s581_s22, 7 }
   0xc   : > { %s799_s22 = smov (!%p258_p4, %s581_s22), 7  ;;  %vm283_vm0 = vcmask 261120   ;;  %v362_v28 = vld [vmem:[%s791_s3 + $0x18] sm:$0xff]  ;;  %v361_v29 = vld [vmem:[%s791_s3 + $0x10] sm:$0xff]  ;;  %v360_v30 = vld [vmem:[%s791_s3 + $0x8] sm:$0xff]  ;;  %vm467_vm1 = vcmask 785408  }
   0xd   : > { %s582_s23 = sshll.u32 %s799_s22, 3  ;;  %602 = vmatprep.subr.mxu0 %v362_v28  ;;  %616 = vmatprep.subr.mxu1 %v362_v28  ;;  %v359_v31 = vld [vmem:[%s791_s3] sm:$0xff] }
   0xe   : > { %s261_s26 = scalar_lea.vmem %s788_s0, %s582_s23  ;;  %603 = vmatpush3.msra.mxu0 %v362_v28  ;;  %620 = vmatpush3.msra.mxu1 %v362_v28  ;;  %v585_v45 = vld [vmem:[%s789_s1] ss:$0 sm:$0xff]  ;;  %s277_s18 = scalar_lea.vmem %s793_s5, %s582_s23 }
   0xf   : > { %v279_v0 = vld [vmem:[%s261_s26] sm:$0xff]  ;;  %v281_v1 = vld [vmem:[%s261_s26 + $0x10] sm:$0xff]  ;;  %v280_v2 = vld [vmem:[%s261_s26 + $0x8] sm:$0xff]  ;;  %604 = vmatprep.subr.mxu0 %v361_v29  ;;  %617 = vmatprep.subr.mxu1 %v361_v29 }
  0x10   : > { %v284_v3 = vsel %vm283_vm0, %v279_v0, 0.0  ;;  %v290_v4 = vsel %vm283_vm0, %v281_v1, 0.0  ;;  %v282_v5 = vld [vmem:[%s261_s26 + $0x18] sm:$0xff]  ;;  %v287_v6 = vsel %vm283_vm0, %v280_v2, 0.0  ;;  %605 = vmatpush3.msra.mxu0 %v361_v29  ;;  %621 = vmatpush3.msra.mxu1 %v361_v29  ;;  %v586_v47 = vld [vmem:[%s790_s2] ss:$0 sm:$0xff] }
  0x11   : > { %285 = vadd.xlane.f32.xlu0 %v284_v3  ;;  %291 = vadd.xlane.f32.xlu1 %v290_v4  ;;  %v293_v7 = vsel %vm283_vm0, %v282_v5, 0.0  ;;  %v587_v63 = vld [vmem:[%s792_s4] ss:$0 sm:$0xff] }
  0x12   : > { %606 = vmatprep.subr.mxu0 %v360_v30  ;;  %618 = vmatprep.subr.mxu1 %v360_v30 }
  0x13   : > { %607 = vmatpush3.msra.mxu0 %v360_v30  ;;  %622 = vmatpush3.msra.mxu1 %v360_v30 }
  0x14   : > { %608 = vmatprep.subr.mxu0 %v359_v31  ;;  %619 = vmatprep.subr.mxu1 %v359_v31 }
  0x15   : > { %288 = vadd.xlane.f32.xlu0 %v287_v6  ;;  %294 = vadd.xlane.f32.xlu1 %v293_v7 }
  0x16   : > { %609 = vmatpush3.msra.mxu0 %v359_v31  ;;  %623 = vmatpush3.msra.mxu1 %v359_v31 }
  0x9a   : > { %v286_v8 = vpop.xlane.xlu0 %285  ;;  %v292_v9 = vpop.xlane.xlu1 %291 }
  0x9b   : > { %v297_v10 = vmul.f32 0.03125, %v286_v8  ;;  %v299_v11 = vmul.f32 0.03125, %v292_v9 }
  0x9d   : > { %v301_v12 = vsub.f32 %v279_v0, %v297_v10  ;;  %v740_v13 = vsub.f32 %v281_v1, %v299_v11 }
  0x9e   : > { %v289_v14 = vpop.xlane.xlu0 %288  ;;  %v295_v15 = vpop.xlane.xlu1 %294 }
  0x9f   : > { %v298_v16 = vmul.f32 0.03125, %v289_v14  ;;  %v300_v17 = vmul.f32 0.03125, %v295_v15  ;;  %v305_v18 = vmul.f32 %v301_v12, %v301_v12  ;;  %v307_v19 = vmul.f32 %v740_v13, %v740_v13 }
  0xa1   : > { %v302_v20 = vsub.f32 %v280_v2, %v298_v16  ;;  %v304_v21 = vsub.f32 %v282_v5, %v300_v17  ;;  %v309_v22 = vsel %vm283_vm0, %v305_v18, 0.0  ;;  %v315_v23 = vsel %vm283_vm0, %v307_v19, 0.0 }
  0xa2   : > { %310 = vadd.xlane.f32.xlu0 %v309_v22 }
  0xa3   : > { %v306_v24 = vmul.f32 %v302_v20, %v302_v20  ;;  %v308_v25 = vmul.f32 %v304_v21, %v304_v21 }
  0xa5   : > { %v312_v26 = vsel %vm283_vm0, %v306_v24, 0.0  ;;  %v318_v27 = vsel %vm283_vm0, %v308_v25, 0.0 }
  0xa6   : > { %316 = vadd.xlane.f32.xlu0 %v315_v23  ;;  %313 = vadd.xlane.f32.xlu1 %v312_v26 }
  0xaa   : > { %319 = vadd.xlane.f32.xlu1 %v318_v27 }
 0x12b   : > { %v311_v32 = vpop.xlane.xlu0 %310 }
 0x12c   : > { %v321_v33 = vmul.f32 0.03125, %v311_v32 }
 0x12e   : > { %v325_v34 = vadd.f32 1e-06, %v321_v33 }
 0x12f   : > { %v314_v35 = vpop.xlane.xlu1 %313  ;;  %v317_v36 = vpop.xlane.xlu0 %316 }
 0x130   : > { %648 = vrsqrt.f32 %v325_v34  ;;  %v322_v37 = vmul.f32 0.03125, %v314_v35  ;;  %v323_v38 = vmul.f32 0.03125, %v317_v36 }
 0x132   : > { %v326_v39 = vadd.f32 1e-06, %v322_v37  ;;  %v327_v40 = vadd.f32 1e-06, %v323_v38 }
 0x133   : > { %v320_v41 = vpop.xlane.xlu1 %319 }
 0x134   : > { %650 = vrsqrt.f32 %v326_v39  ;;  %v324_v42 = vmul.f32 0.03125, %v320_v41 }
 0x135   : > { %652 = vrsqrt.f32 %v327_v40 }
 0x136   : > { %v328_v43 = vadd.f32 1e-06, %v324_v42 }
 0x138   : > { %654 = vrsqrt.f32 %v328_v43 }
 0x13d   : > { %v649_v44 = vpop.eup %648 }
 0x13e   : > { %v333_v46 = vmul.f32 %v649_v44, %v301_v12 }
 0x140   : > { %v344_v48 = vmul.f32 %v585_v45, %v333_v46 }
 0x141   : > { %v651_v49 = vpop.eup %650 }
 0x142   : > { %v653_v50 = vpop.eup %652  ;;  %v355_v51 = vadd.f32 %v586_v47, %v344_v48  ;;  %v334_v52 = vmul.f32 %v651_v49, %v302_v20 }
 0x143   : > { %v335_v53 = vmul.f32 %v653_v50, %v740_v13 }
 0x144   : > { %610 = vmatprep.mubr.msk.f32.mxu0 %vm283_vm0, %v355_v51  ;;  %v345_v54 = vmul.f32 %v585_v45, %v334_v52 }
 0x145   : > { %v655_v55 = vpop.eup %654  ;;  %v346_v56 = vmul.f32 %v585_v45, %v335_v53 }
 0x146   : > { %v356_v57 = vadd.f32 %v586_v47, %v345_v54  ;;  %v336_v58 = vmul.f32 %v655_v55, %v304_v21 }
 0x147   : > { %v357_v59 = vadd.f32 %v586_v47, %v346_v56 }
 0x148   : > { %611 = vmatmul.mubr.msk.f32.vlgmr.msra.gmra.mxu0 %vm283_vm0, %v356_v57  ;;  %v347_v60 = vmul.f32 %v585_v45, %v336_v58 }
 0x149   : > { %613 = vmatprep.mubr.msk.f32.mxu1 %vm283_vm0, %v357_v59 }
 0x14a   : > { %v358_v61 = vadd.f32 %v586_v47, %v347_v60 }
 0x14c   : > { %614 = vmatmul.mubr.msk.f32.vlgmr.msra.gmra.mxu1 %vm283_vm0, %v358_v61 }
 0x208   : > { %v612_v62 = vpop.f32.mrf.mxu0 }
 0x209   : > { %v454_v2 = vadd.f32 %v612_v62, %v587_v63 }
 0x20a   : > { %v448_v0 = vpop.f32.mrf.mxu0 }
 0x20b   : > { %v449_v1 = vadd.f32 %v587_v63, %v448_v0  ;;  %469 = vst.msk [vmem:[%s277_s18 + $0x8] sm:$0xff] %vm467_vm1, %v454_v2 }
 0x20c   : > { %v615_v3 = vpop.f32.mrf.mxu1 }
 0x20d   : > { %468 = vst.msk [vmem:[%s277_s18] sm:$0xff] %vm467_vm1, %v449_v1  ;;  %v464_v6 = vadd.f32 %v615_v3, %v587_v63 }
 0x20e   : > { %v458_v4 = vpop.f32.mrf.mxu1 }
 0x20f   : > { %v459_v5 = vadd.f32 %v587_v63, %v458_v4  ;;  %471 = vst.msk [vmem:[%s277_s18 + $0x18] sm:$0xff] %vm467_vm1, %v464_v6 }
 0x211   : > { %470 = vst.msk [vmem:[%s277_s18 + $0x10] sm:$0xff] %vm467_vm1, %v459_v5 }
 0x212 PF: > { %s15_s20 = sadd.s32 1, %s678_s20   ;;  %s794_s18 = smov %s674_s19 }
 0x213   : > { %p12_p5 = scmp.ge.s32.totalorder %s15_s20, 4   ;;  %s795_s19 = smov %s797_s21 }
 0x215   :  { %14 = sbr.rel (!%p12_p5) target bundleno = 2 (0x2), region = 76 }

// kernel: distilled_vit_forward.25
= control target key start
LH: loop header
LB: loop body
LE: loop exit
PB: predicated region body
PF: predicated region fallthrough
CT: control target
= control target key end

     0   :  { %s650_s15 = smov 0   ;;  %s652_s16 = smov 0   ;;  %s709_s0 = inlined_call_operand.vmem [shape: f32[64,32], index: 0, kind: input, shape index: {}]   ;;  %s710_s1 = inlined_call_operand.vmem [shape: f32[32,32], index: 1, kind: input, shape index: {}]   ;;  %s711_s2 = inlined_call_operand.vmem [shape: f32[1,32], index: 2, kind: input, shape index: {}]   ;;  %s712_s3 = inlined_call_operand.vmem [shape: f32[64,32], index: 3, kind: input, shape index: {}]   ;;  %s713_s4 = inlined_call_operand.vmem [shape: f32[64,32], index: 4, kind: output, shape index: {}]  }
   0x1   :  { %s654_s17 = smov 0  }
   0x2 LB: > { %s26_s18 = sadd.s32 1, %s619_s16  ;;  %p533_p0 = scmp.ge.s32.totalorder %s623_s17, 1  ;;  %s623_s17 = sphi %s654_s17, %s14_s17   ;;  %s619_s16 = sphi %s652_s16, %s715_s16   ;;  %s615_s15 = sphi %s650_s15, %s714_s15  }
   0x3   : > { %p28_p1 = scmp.ge.s32.totalorder %s26_s18, 2  ;;  %p210_p2 = scmp.lt.s32.totalorder %s623_s17, 3 }
   0x5   : > { %s717_s18 = smov (%p28_p1, %s26_s18), 0  ;;  %p211_p3 = pnand %p533_p0, %p210_p2 }
   0x6   : > { %s534_s23 = sshll.u32 (!%p211_p3), %s615_s15, 2 }
   0x7   : > { %214 = sbr.rel (%p211_p3) target bundleno = 222 (0xde), region = 36  ;;  %p255_p4 = scmp.lt.s32.totalorder (!%p211_p3), %s534_s23, 7 }
   0xc   : > { %v292_v0 = vld [vmem:[%s710_s1 + $0x18] sm:$0xff]  ;;  %v291_v1 = vld [vmem:[%s710_s1 + $0x10] sm:$0xff]  ;;  %v290_v2 = vld [vmem:[%s710_s1 + $0x8] sm:$0xff]  ;;  %s719_s23 = smov (!%p255_p4, %s534_s23), 7  ;;  %vm300_vm0 = vcmask 261120  }
   0xd   : > { %555 = vmatprep.subr.mxu0 %v292_v0  ;;  %569 = vmatprep.subr.mxu1 %v292_v0  ;;  %v289_v3 = vld [vmem:[%s710_s1] sm:$0xff]  ;;  %s535_s28 = sshll.u32 %s719_s23, 3 }
   0xe   : > { %556 = vmatpush3.msra.mxu0 %v292_v0  ;;  %573 = vmatpush3.msra.mxu1 %v292_v0  ;;  %s258_s5 = scalar_lea.vmem %s709_s0, %s535_s28  ;;  %v540_v8 = vld [vmem:[%s711_s2] ss:$0 sm:$0xff]  ;;  %s274_s10 = scalar_lea.vmem %s712_s3, %s535_s28 }
   0xf   : > { %557 = vmatprep.subr.mxu0 %v291_v1  ;;  %570 = vmatprep.subr.mxu1 %v291_v1  ;;  %v285_v4 = vld [vmem:[%s258_s5] sm:$0xff]  ;;  %v287_v5 = vld [vmem:[%s258_s5 + $0x10] sm:$0xff]  ;;  %v286_v6 = vld [vmem:[%s258_s5 + $0x8] sm:$0xff]  ;;  %s283_s13 = scalar_lea.vmem %s713_s4, %s535_s28 }
  0x10   : > { %558 = vmatpush3.msra.mxu0 %v291_v1  ;;  %574 = vmatpush3.msra.mxu1 %v291_v1  ;;  %v288_v7 = vld [vmem:[%s258_s5 + $0x18] sm:$0xff]  ;;  %v398_v13 = vld [vmem:[%s274_s10] sm:$0xff]  ;;  %v399_v15 = vld [vmem:[%s274_s10 + $0x8] sm:$0xff] }
  0x11   : > { %559 = vmatprep.subr.mxu0 %v290_v2  ;;  %571 = vmatprep.subr.mxu1 %v290_v2  ;;  %v400_v19 = vld [vmem:[%s274_s10 + $0x10] sm:$0xff]  ;;  %v401_v20 = vld [vmem:[%s274_s10 + $0x18] sm:$0xff] }
  0x12   : > { %560 = vmatpush3.msra.mxu0 %v290_v2  ;;  %575 = vmatpush3.msra.mxu1 %v290_v2 }
  0x13   : > { %561 = vmatprep.subr.mxu0 %v289_v3  ;;  %572 = vmatprep.subr.mxu1 %v289_v3 }
  0x14   : > { %562 = vmatpush3.msra.mxu0 %v289_v3  ;;  %576 = vmatpush3.msra.mxu1 %v289_v3 }
  0x15   : > { %563 = vmatprep.mubr.msk.f32.mxu0 %vm300_vm0, %v285_v4  ;;  %566 = vmatprep.mubr.msk.f32.mxu1 %vm300_vm0, %v287_v5 }
  0x16   : > { %564 = vmatmul.mubr.msk.f32.vlgmr.msra.gmra.mxu0 %vm300_vm0, %v286_v6  ;;  %567 = vmatmul.mubr.msk.f32.vlgmr.msra.gmra.mxu1 %vm300_vm0, %v288_v7 }
  0xd6   : > { %v565_v9 = vpop.f32.mrf.mxu0  ;;  %v568_v10 = vpop.f32.mrf.mxu1 }
  0xd7   : > { %v385_v11 = vadd.f32 %v565_v9, %v540_v8  ;;  %v395_v18 = vadd.f32 %v568_v10, %v540_v8 }
  0xd8   : > { %v379_v12 = vpop.f32.mrf.mxu0  ;;  %v389_v14 = vpop.f32.mrf.mxu1 }
  0xd9   : > { %v380_v16 = vadd.f32 %v540_v8, %v379_v12  ;;  %v390_v17 = vadd.f32 %v540_v8, %v389_v14  ;;  %v403_v22 = vadd.f32 %v399_v15, %v385_v11  ;;  %v405_v24 = vadd.f32 %v401_v20, %v395_v18 }
  0xdb   : > { %v402_v21 = vadd.f32 %v398_v13, %v380_v16  ;;  %v404_v23 = vadd.f32 %v400_v19, %v390_v17  ;;  %407 = vst.msk [vmem:[%s283_s13 + $0x8] sm:$0xff] %vm300_vm0, %v403_v22  ;;  %409 = vst.msk [vmem:[%s283_s13 + $0x18] sm:$0xff] %vm300_vm0, %v405_v24 }
  0xdd   : > { %406 = vst.msk [vmem:[%s283_s13] sm:$0xff] %vm300_vm0, %v402_v21  ;;  %408 = vst.msk [vmem:[%s283_s13 + $0x10] sm:$0xff] %vm300_vm0, %v404_v23 }
  0xde PF: > { %s14_s17 = sadd.s32 1, %s623_s17   ;;  %s714_s15 = smov %s619_s16 }
  0xdf   : > { %p11_p5 = scmp.ge.s32.totalorder %s14_s17, 4   ;;  %s715_s16 = smov %s717_s18 }
  0xe1   :  { %13 = sbr.rel (!%p11_p5) target bundleno = 2 (0x2), region = 75 }

// kernel: distilled_vit_forward.24
= control target key start
LH: loop header
LB: loop body
LE: loop exit
PB: predicated region body
PF: predicated region fallthrough
CT: control target
= control target key end

     0   :  { %s2216_s6 = smov 0   ;;  %s2460_s0 = inlined_call_operand.vmem [shape: f32[4,16,96], index: 0, kind: input, shape index: {}]   ;;  %s2461_s1 = inlined_call_operand.vmem [shape: f32[4,16,32], index: 1, kind: output, shape index: {}]  }
   0x1 LB: > { %s1859_s7 = sadd.s32 4294967295, %s2190_s6   ;;  %p1863_p0 = scmp.ge.s32.totalorder %s2190_s6, 1  ;;  %s2190_s6 = sphi %s2216_s6, %s11_s6  }
   0x2   : > { %p89_p1 = scmp.lt.s32.totalorder %s2190_s6, 3 }
   0x4   : > { %p90_p2 = pnand %p1863_p0, %p89_p1 }
   0x5   : > { %s1864_s8 = sshll.u32 (!%p90_p2), %s1859_s7, 1  ;;  %s2192_s13 = smov (!%p90_p2), 96  }
   0x6   : > { %93 = sbr.rel (%p90_p2) target bundleno = 2522 (0x9da), region = 24  ;;  %p112_p3 = scmp.lt.s32.totalorder (!%p90_p2), %s1864_s8, 3 }
   0x7   : > { %s2193_s14 = smov (!%p90_p2), 64   ;;  %s2194_s15 = smov (!%p90_p2), 88  }
   0x8   : > { %s2195_s16 = smov (!%p90_p2), 120   ;;  %s2196_s17 = smov (!%p90_p2), 56  }
   0x9   : > { %s2197_s18 = smov (!%p90_p2), 80   ;;  %s2198_s19 = smov (!%p90_p2), 112  }
   0xa   : > { %s2199_s20 = smov (!%p90_p2), 48   ;;  %s2200_s21 = smov (!%p90_p2), 72  }
   0xb   : > { %s2463_s8 = smov (!%p112_p3, %s1864_s8), 3  ;;  %vm139_vm0 = vcmask 64512   ;;  %vm316_vm1 = vcmask 130048   ;;  %s2201_s22 = smov 104   ;;  %vm1791_vm2 = vcmask 195584   ;;  %vm1796_vm3 = vcmask 261120  }
   0xc   : > { %s1920_s9 = sshll.u32 %s2463_s8, 4  ;;  %s2202_s23 = smov 40  }
   0xd   : > { %s116_s12 = scalar_lea.vmem %s2460_s0, %s1920_s9  ;;  %s2203_s24 = smov 8  }
   0xe   : > { %v2232_v0 = vld [vmem:[%s116_s12 + $0x8] sm:$0xff]  ;;  %v2234_v1 = vld [vmem:[%s116_s12] sm:$0xff]  ;;  %v2238_v2 = vld [vmem:[%s116_s12 + $0x10] sm:$0xff]  ;;  %s2204_s25 = smov 16   ;;  %s2205_s26 = smov 24  }
   0xf   : > { %137 = vrot.lane.b32.xlu0 %v2232_v0, %s2192_s13  ;;  %135 = vrot.lane.b32.xlu1 %v2234_v1, %s2192_s13  ;;  %v2241_v3 = vmul.f32 0.35355338, %v2234_v1  ;;  %v2243_v4 = vld [vmem:[%s116_s12 + $0x18] sm:$0xff]  ;;  %v2246_v5 = vmul.f32 0.35355338, %v2238_v2  ;;  %s123_s29 = scalar_lea.vmem %s2461_s1, %s1920_s9 }
  0x10   : > { %v2259_v10 = vmul.f32 0.35355338, %v2232_v0  ;;  %v2267_v11 = vmul.f32 0.35355338, %v2243_v4 }
  0x11   : > { %1990 = vmatprep.mubr.msk.f32.mxu0 %vm139_vm0, %v2241_v3  ;;  %1997 = vmatprep.mubr.msk.f32.mxu1 %vm139_vm0, %v2246_v5 }
  0x13   : > { %229 = vrot.lane.b32.xlu0 %v2243_v4, %s2192_s13  ;;  %227 = vrot.lane.b32.xlu1 %v2238_v2, %s2192_s13 }
  0x81   : > { %v138_v6 = vpop.permute.xlu0 %137  ;;  %v136_v7 = vpop.permute.xlu1 %135 }
  0x82   : > { %1986 = vmatprep.subr.msk.mxu0 %vm139_vm0, %v138_v6 }
  0x83   : > { %1987 = vmatpush3.xpose.msk.msra.mxu0 %vm139_vm0, %v138_v6 }
  0x84   : > { %1988 = vmatprep.subr.msk.mxu0 %vm139_vm0, %v136_v7 }
  0x85   : > { %v230_v8 = vpop.permute.xlu0 %229  ;;  %v228_v9 = vpop.permute.xlu1 %227 }
  0x86   : > { %1993 = vmatprep.subr.msk.mxu1 %vm139_vm0, %v230_v8 }
  0x87   : > { %1989 = vmatpush3.xpose.msk.msra.mxu0 %vm139_vm0, %v136_v7  ;;  %1994 = vmatpush3.xpose.msk.msra.mxu1 %vm139_vm0, %v230_v8 }
  0x88   : > { %1995 = vmatprep.subr.msk.mxu1 %vm139_vm0, %v228_v9 }
  0x8a   : > { %1991 = vmatmul.mubr.msk.f32.vlgmr.msra.gmra.mxu0 %vm139_vm0, %v2259_v10 }
  0x8b   : > { %1996 = vmatpush3.xpose.msk.msra.mxu1 %vm139_vm0, %v228_v9 }
  0x8e   : > { %1998 = vmatmul.mubr.msk.f32.vlgmr.msra.gmra.mxu1 %vm139_vm0, %v2267_v11 }
 0x14a   : > { %v1992_v12 = vpop.f32.mrf.mxu0 }
 0x14b   : > { %v320_v13 = vsel %vm316_vm1, %v1992_v12, -inf }
 0x14c   : > { %321 = vmax.xlane.f32.xlu1 %v320_v13  ;;  %v216_v14 = vpop.f32.mrf.mxu0 }
 0x14d   : > { %v317_v15 = vsel %vm316_vm1, %v216_v14, -inf }
 0x14e   : > { %v1999_v16 = vpop.f32.mrf.mxu1  ;;  %318 = vmax.xlane.f32.xlu0 %v317_v15 }
 0x14f   : > { %v326_v19 = vsel %vm316_vm1, %v1999_v16, -inf }
 0x150   : > { %v307_v17 = vpop.f32.mrf.mxu1 }
 0x151   : > { %v323_v18 = vsel %vm316_vm1, %v307_v17, -inf }
 0x152   : > { %324 = vmax.xlane.f32.xlu0 %v323_v18 }
 0x156   : > { %327 = vmax.xlane.f32.xlu0 %v326_v19 }
 0x15d   : > { %363 = vrot.lane.b32.xlu1 %v2232_v0, %s2193_s14 }
 0x161   : > { %361 = vrot.lane.b32.xlu1 %v2234_v1, %s2193_s14 }
 0x165   : > { %448 = vrot.lane.b32.xlu1 %v2238_v2, %s2193_s14 }
 0x169   : > { %632 = vrot.lane.b32.xlu1 %v2243_v4, %s2194_s15 }
 0x16c   : > { %450 = vrot.lane.b32.xlu0 %v2243_v4, %s2193_s14 }
 0x16d   : > { %630 = vrot.lane.b32.xlu1 %v2238_v2, %s2194_s15 }
 0x170   : > { %541 = vrot.lane.b32.xlu0 %v2232_v0, %s2194_s15 }
 0x171   : > { %537 = vrot.lane.b32.xlu1 %v2259_v10, %s2195_s16 }
 0x174   : > { %539 = vrot.lane.b32.xlu0 %v2234_v1, %s2194_s15 }
 0x1d5   : > { %v322_v20 = vpop.xlane.xlu1 %321 }
 0x1d6   : > { %v330_v21 = vsub.f32 %v1992_v12, %v322_v20 }
 0x1d7   : > { %v319_v22 = vpop.xlane.xlu0 %318 }
 0x1d8   : > { %v335_v23 = vmul.f32 1.442695, %v330_v21  ;;  %v329_v24 = vsub.f32 %v216_v14, %v319_v22 }
 0x1d9   : > { %v364_v25 = vpop.permute.xlu1 %363 }
 0x1da   : > { %2120 = vpow2.f32 %v335_v23  ;;  %v333_v26 = vmul.f32 1.442695, %v329_v24  ;;  %2000 = vmatprep.subr.mxu0 %v364_v25 }
 0x1db   : > { %v325_v27 = vpop.xlane.xlu0 %324  ;;  %2001 = vmatpush3.msra.mxu0 %v364_v25 }
 0x1dc   : > { %2122 = vpow2.f32 %v333_v26  ;;  %v331_v28 = vsub.f32 %v307_v17, %v325_v27 }
 0x1dd   : > { %v362_v29 = vpop.permute.xlu1 %361 }
 0x1de   : > { %v337_v30 = vmul.f32 1.442695, %v331_v28  ;;  %2002 = vmatprep.subr.mxu0 %v362_v29 }
 0x1df   : > { %v328_v31 = vpop.xlane.xlu0 %327  ;;  %2003 = vmatpush3.msra.mxu0 %v362_v29 }
 0x1e0   : > { %2124 = vpow2.f32 %v337_v30  ;;  %v332_v32 = vsub.f32 %v1999_v16, %v328_v31 }
 0x1e1   : > { %v449_v33 = vpop.permute.xlu1 %448 }
 0x1e2   : > { %v339_v34 = vmul.f32 1.442695, %v332_v32 }
 0x1e3   : > { %v451_v35 = vpop.permute.xlu0 %450 }
 0x1e4   : > { %2126 = vpow2.f32 %v339_v34  ;;  %2007 = vmatprep.subr.mxu1 %v451_v35 }
 0x1e5   : > { %2008 = vmatpush3.msra.mxu1 %v451_v35  ;;  %v633_v36 = vpop.permute.xlu1 %632 }
 0x1e6   : > { %2009 = vmatprep.subr.mxu1 %v449_v33 }
 0x1e7   : > { %v2121_v37 = vpop.eup %2120  ;;  %2010 = vmatpush3.msra.mxu1 %v449_v33  ;;  %v542_v38 = vpop.permute.xlu0 %541 }
 0x1e8   : > { %v344_v39 = vsel %vm316_vm1, %v2121_v37, 0.0  ;;  %2021 = vmatprep.subr.msk.mxu1 %vm139_vm0, %v633_v36  ;;  %2014 = vmatprep.subr.msk.mxu0 %vm139_vm0, %v542_v38 }
 0x1e9   : > { %v2123_v40 = vpop.eup %2122  ;;  %345 = vadd.xlane.f32.xlu0 %v344_v39  ;;  %v631_v46 = vpop.permute.xlu1 %630 }
 0x1ea   : > { %v341_v41 = vsel %vm316_vm1, %v2123_v40, 0.0 }
 0x1eb   : > { %342 = vadd.xlane.f32.xlu1 %v341_v41  ;;  %v540_v47 = vpop.permute.xlu0 %539 }
 0x1ed   : > { %v2125_v42 = vpop.eup %2124  ;;  %v538_v48 = vpop.permute.xlu1 %537 }
 0x1ee   : > { %v347_v43 = vsel %vm316_vm1, %v2125_v42, 0.0 }
 0x1ef   : > { %348 = vadd.xlane.f32.xlu1 %v347_v43 }
 0x1f1   : > { %v2127_v44 = vpop.eup %2126 }
 0x1f2   : > { %v350_v45 = vsel %vm316_vm1, %v2127_v44, 0.0 }
 0x1f3   : > { %351 = vadd.xlane.f32.xlu0 %v350_v45 }
 0x200   : > { %628 = vrot.lane.b32.xlu1 %v2267_v11, %s2195_s16 }
 0x209   : > { %535 = vrot.lane.b32.xlu0 %v2241_v3, %s2195_s16 }
 0x20d   : > { %626 = vrot.lane.b32.xlu0 %v2246_v5, %s2195_s16 }
 0x272   : > { %v346_v49 = vpop.xlane.xlu0 %345 }
 0x273   : > { %2128 = vrcp.f32 %v346_v49 }
 0x274   : > { %v343_v50 = vpop.xlane.xlu1 %342 }
 0x275   : > { %2130 = vrcp.f32 %v343_v50 }
 0x278   : > { %v349_v51 = vpop.xlane.xlu1 %348 }
 0x279   : > { %2132 = vrcp.f32 %v349_v51 }
 0x27c   : > { %v352_v52 = vpop.xlane.xlu0 %351  ;;  %v629_v63 = vpop.permute.xlu1 %628 }
 0x27d   : > { %2134 = vrcp.f32 %v352_v52 }
 0x280   : > { %v2129_v53 = vpop.eup %2128  ;;  %v536_v57 = vpop.permute.xlu0 %535 }
 0x281   : > { %v358_v56 = vmul.f32 %v2129_v53, %v2121_v37 }
 0x282   : > { %v2131_v54 = vpop.eup %2130 }
 0x283   : > { %v357_v55 = vmul.f32 %v2131_v54, %v2123_v40 }
 0x284   : > { %v627_v62 = vpop.permute.xlu0 %626 }
 0x285   : > { %2004 = vmatprep.mubr.msk.f32.mxu0 %vm316_vm1, %v357_v55 }
 0x286   : > { %v2133_v58 = vpop.eup %2132  ;;  %2005 = vmatmul.mubr.msk.f32.vlgmr.msra.gmra.mxu0 %vm316_vm1, %v358_v56 }
 0x287   : > { %2015 = vmatpush3.xpose.msk.msra.mxu0 %vm139_vm0, %v542_v38  ;;  %v359_v59 = vmul.f32 %v2133_v58, %v2125_v42  ;;  %2018 = vmatprep.mubr.msk.f32.mxu0 %vm139_vm0, %v536_v57 }
 0x288   : > { %2016 = vmatprep.subr.msk.mxu0 %vm139_vm0, %v540_v47 }
 0x289   : > { %2011 = vmatprep.mubr.msk.f32.mxu1 %vm316_vm1, %v359_v59 }
 0x28a   : > { %v2135_v60 = vpop.eup %2134 }
 0x28b   : > { %2017 = vmatpush3.xpose.msk.msra.mxu0 %vm139_vm0, %v540_v47  ;;  %v360_v61 = vmul.f32 %v2135_v60, %v2127_v44 }
 0x28d   : > { %2012 = vmatmul.mubr.msk.f32.vlgmr.msra.gmra.mxu1 %vm316_vm1, %v360_v61 }
 0x28e   : > { %2019 = vmatmul.mubr.msk.f32.vlgmr.msra.gmra.mxu0 %vm139_vm0, %v538_v48  ;;  %2022 = vmatpush3.xpose.msk.msra.mxu1 %vm139_vm0, %v633_v36 }
 0x28f   : > { %2023 = vmatprep.subr.msk.mxu1 %vm139_vm0, %v631_v46  ;;  %2025 = vmatprep.mubr.msk.f32.mxu1 %vm139_vm0, %v627_v62 }
 0x292   : > { %2024 = vmatpush3.xpose.msk.msra.mxu1 %vm139_vm0, %v631_v46 }
 0x295   : > { %2026 = vmatmul.mubr.msk.f32.vlgmr.msra.gmra.mxu1 %vm139_vm0, %v629_v63 }
 0x346   : > { %v2312_v6 = vpop.f32.mrf.mxu0 }
 0x348   : > { %v2314_v7 = vpop.f32.mrf.mxu0 }
 0x34d   : > { %v2316_v9 = vpop.f32.mrf.mxu1 }
 0x34e   : > { %v2020_v8 = vpop.f32.mrf.mxu0 }
 0x34f   : > { %v720_v12 = vsel %vm316_vm1, %v2020_v8, -inf  ;;  %v2320_v15 = vpop.f32.mrf.mxu1 }
 0x350   : > { %721 = vmax.xlane.f32.xlu1 %v720_v12  ;;  %v617_v13 = vpop.f32.mrf.mxu0 }
 0x351   : > { %v717_v14 = vsel %vm316_vm1, %v617_v13, -inf }
 0x352   : > { %718 = vmax.xlane.f32.xlu0 %v717_v14 }
 0x355   : > { %v2027_v16 = vpop.f32.mrf.mxu1 }
 0x356   : > { %v726_v19 = vsel %vm316_vm1, %v2027_v16, -inf }
 0x357   : > { %v708_v17 = vpop.f32.mrf.mxu1 }
 0x358   : > { %v723_v18 = vsel %vm316_vm1, %v708_v17, -inf }
 0x359   : > { %724 = vmax.xlane.f32.xlu0 %v723_v18 }
 0x35d   : > { %727 = vmax.xlane.f32.xlu0 %v726_v19 }
 0x361   : > { %763 = vrot.lane.b32.xlu1 %v2232_v0, %s2196_s17 }
 0x365   : > { %761 = vrot.lane.b32.xlu1 %v2234_v1, %s2196_s17 }
 0x369   : > { %848 = vrot.lane.b32.xlu1 %v2238_v2, %s2196_s17 }
 0x36d   : > { %1032 = vrot.lane.b32.xlu1 %v2243_v4, %s2197_s18 }
 0x371   : > { %1030 = vrot.lane.b32.xlu1 %v2238_v2, %s2197_s18 }
 0x373   : > { %850 = vrot.lane.b32.xlu0 %v2243_v4, %s2196_s17 }
 0x375   : > { %937 = vrot.lane.b32.xlu1 %v2259_v10, %s2198_s19 }
 0x377   : > { %941 = vrot.lane.b32.xlu0 %v2232_v0, %s2197_s18 }
 0x37b   : > { %939 = vrot.lane.b32.xlu0 %v2234_v1, %s2197_s18 }
 0x3d9   : > { %v722_v20 = vpop.xlane.xlu1 %721 }
 0x3da   : > { %v730_v21 = vsub.f32 %v2020_v8, %v722_v20 }
 0x3db   : > { %v719_v22 = vpop.xlane.xlu0 %718 }
 0x3dc   : > { %v735_v23 = vmul.f32 1.442695, %v730_v21  ;;  %v729_v24 = vsub.f32 %v617_v13, %v719_v22 }
 0x3dd   : > { %v764_v25 = vpop.permute.xlu1 %763 }
 0x3de   : > { %2136 = vpow2.f32 %v735_v23  ;;  %v733_v26 = vmul.f32 1.442695, %v729_v24  ;;  %2028 = vmatprep.subr.mxu0 %v764_v25 }
 0x3df   : > { %2029 = vmatpush3.msra.mxu0 %v764_v25 }
 0x3e0   : > { %2138 = vpow2.f32 %v733_v26 }
 0x3e1   : > { %v762_v27 = vpop.permute.xlu1 %761 }
 0x3e2   : > { %v725_v28 = vpop.xlane.xlu0 %724  ;;  %2030 = vmatprep.subr.mxu0 %v762_v27 }
 0x3e3   : > { %v731_v29 = vsub.f32 %v708_v17, %v725_v28  ;;  %2031 = vmatpush3.msra.mxu0 %v762_v27 }
 0x3e5   : > { %v737_v30 = vmul.f32 1.442695, %v731_v29  ;;  %v849_v32 = vpop.permute.xlu1 %848 }
 0x3e6   : > { %v728_v31 = vpop.xlane.xlu0 %727 }
 0x3e7   : > { %2140 = vpow2.f32 %v737_v30  ;;  %v732_v33 = vsub.f32 %v2027_v16, %v728_v31 }
 0x3e9   : > { %v739_v34 = vmul.f32 1.442695, %v732_v33  ;;  %v1033_v38 = vpop.permute.xlu1 %1032 }
 0x3ea   : > { %v851_v35 = vpop.permute.xlu0 %850 }
 0x3eb   : > { %v2137_v36 = vpop.eup %2136  ;;  %2142 = vpow2.f32 %v739_v34  ;;  %2035 = vmatprep.subr.mxu1 %v851_v35 }
 0x3ec   : > { %v744_v37 = vsel %vm316_vm1, %v2137_v36, 0.0  ;;  %2036 = vmatpush3.msra.mxu1 %v851_v35 }
 0x3ed   : > { %v2139_v39 = vpop.eup %2138  ;;  %745 = vadd.xlane.f32.xlu0 %v744_v37  ;;  %2037 = vmatprep.subr.mxu1 %v849_v32  ;;  %v1031_v46 = vpop.permute.xlu1 %1030 }
 0x3ee   : > { %v741_v40 = vsel %vm316_vm1, %v2139_v39, 0.0  ;;  %2038 = vmatpush3.msra.mxu1 %v849_v32  ;;  %v942_v41 = vpop.permute.xlu0 %941 }
 0x3ef   : > { %742 = vadd.xlane.f32.xlu1 %v741_v40  ;;  %2049 = vmatprep.subr.msk.mxu1 %vm139_vm0, %v1033_v38 }
 0x3f0   : > { %2042 = vmatprep.subr.msk.mxu0 %vm139_vm0, %v942_v41 }
 0x3f1   : > { %v938_v48 = vpop.permute.xlu1 %937 }
 0x3f2   : > { %v940_v47 = vpop.permute.xlu0 %939 }
 0x3f4   : > { %v2141_v42 = vpop.eup %2140 }
 0x3f5   : > { %v747_v43 = vsel %vm316_vm1, %v2141_v42, 0.0 }
 0x3f6   : > { %748 = vadd.xlane.f32.xlu1 %v747_v43 }
 0x3f8   : > { %v2143_v44 = vpop.eup %2142 }
 0x3f9   : > { %v750_v45 = vsel %vm316_vm1, %v2143_v44, 0.0 }
 0x3fa   : > { %751 = vadd.xlane.f32.xlu0 %v750_v45 }
 0x407   : > { %1028 = vrot.lane.b32.xlu1 %v2267_v11, %s2198_s19 }
 0x410   : > { %935 = vrot.lane.b32.xlu0 %v2241_v3, %s2198_s19 }
 0x414   : > { %1026 = vrot.lane.b32.xlu0 %v2246_v5, %s2198_s19 }
 0x476   : > { %v746_v49 = vpop.xlane.xlu0 %745 }
 0x477   : > { %2144 = vrcp.f32 %v746_v49 }
 0x478   : > { %v743_v50 = vpop.xlane.xlu1 %742 }
 0x479   : > { %2146 = vrcp.f32 %v743_v50 }
 0x47f   : > { %v749_v51 = vpop.xlane.xlu1 %748 }
 0x480   : > { %2148 = vrcp.f32 %v749_v51 }
 0x483   : > { %v752_v52 = vpop.xlane.xlu0 %751  ;;  %v1029_v63 = vpop.permute.xlu1 %1028 }
 0x484   : > { %2150 = vrcp.f32 %v752_v52  ;;  %v2145_v53 = vpop.eup %2144 }
 0x485   : > { %v758_v56 = vmul.f32 %v2145_v53, %v2137_v36 }
 0x486   : > { %v2147_v54 = vpop.eup %2146 }
 0x487   : > { %v757_v55 = vmul.f32 %v2147_v54, %v2139_v39  ;;  %v936_v57 = vpop.permute.xlu0 %935 }
 0x489   : > { %2032 = vmatprep.mubr.msk.f32.mxu0 %vm316_vm1, %v757_v55 }
 0x48a   : > { %2033 = vmatmul.mubr.msk.f32.vlgmr.msra.gmra.mxu0 %vm316_vm1, %v758_v56 }
 0x48b   : > { %2043 = vmatpush3.xpose.msk.msra.mxu0 %vm139_vm0, %v942_v41  ;;  %2046 = vmatprep.mubr.msk.f32.mxu0 %vm139_vm0, %v936_v57  ;;  %v1027_v62 = vpop.permute.xlu0 %1026 }
 0x48c   : > { %2044 = vmatprep.subr.msk.mxu0 %vm139_vm0, %v940_v47 }
 0x48d   : > { %v2149_v58 = vpop.eup %2148 }
 0x48e   : > { %v759_v59 = vmul.f32 %v2149_v58, %v2141_v42 }
 0x48f   : > { %2045 = vmatpush3.xpose.msk.msra.mxu0 %vm139_vm0, %v940_v47 }
 0x490   : > { %2039 = vmatprep.mubr.msk.f32.mxu1 %vm316_vm1, %v759_v59 }
 0x491   : > { %v2151_v60 = vpop.eup %2150 }
 0x492   : > { %2047 = vmatmul.mubr.msk.f32.vlgmr.msra.gmra.mxu0 %vm139_vm0, %v938_v48  ;;  %v760_v61 = vmul.f32 %v2151_v60, %v2143_v44 }
 0x494   : > { %2040 = vmatmul.mubr.msk.f32.vlgmr.msra.gmra.mxu1 %vm316_vm1, %v760_v61 }
 0x495   : > { %2050 = vmatpush3.xpose.msk.msra.mxu1 %vm139_vm0, %v1033_v38  ;;  %2053 = vmatprep.mubr.msk.f32.mxu1 %vm139_vm0, %v1027_v62 }
 0x496   : > { %2051 = vmatprep.subr.msk.mxu1 %vm139_vm0, %v1031_v46 }
 0x499   : > { %2052 = vmatpush3.xpose.msk.msra.mxu1 %vm139_vm0, %v1031_v46 }
 0x49c   : > { %2054 = vmatmul.mubr.msk.f32.vlgmr.msra.gmra.mxu1 %vm139_vm0, %v1029_v63 }
 0x54a   : > { %v2360_v8 = vpop.f32.mrf.mxu0 }
 0x54c   : > { %v2362_v12 = vpop.f32.mrf.mxu0 }
 0x552   : > { %v2048_v13 = vpop.f32.mrf.mxu0 }
 0x553   : > { %v1120_v14 = vsel %vm316_vm1, %v2048_v13, -inf }
 0x554   : > { %1121 = vmax.xlane.f32.xlu1 %v1120_v14  ;;  %v1017_v16 = vpop.f32.mrf.mxu0  ;;  %v2366_v18 = vpop.f32.mrf.mxu1 }
 0x555   : > { %v1117_v17 = vsel %vm316_vm1, %v1017_v16, -inf }
 0x556   : > { %1118 = vmax.xlane.f32.xlu0 %v1117_v17  ;;  %v2368_v19 = vpop.f32.mrf.mxu1 }
 0x55c   : > { %v2055_v20 = vpop.f32.mrf.mxu1 }
 0x55d   : > { %v1126_v23 = vsel %vm316_vm1, %v2055_v20, -inf }
 0x55e   : > { %v1108_v21 = vpop.f32.mrf.mxu1 }
 0x55f   : > { %v1123_v22 = vsel %vm316_vm1, %v1108_v21, -inf }
 0x560   : > { %1124 = vmax.xlane.f32.xlu0 %v1123_v22 }
 0x564   : > { %1127 = vmax.xlane.f32.xlu0 %v1126_v23 }
 0x565   : > { %1163 = vrot.lane.b32.xlu1 %v2232_v0, %s2199_s20 }
 0x569   : > { %1161 = vrot.lane.b32.xlu1 %v2234_v1, %s2199_s20 }
 0x56d   : > { %1248 = vrot.lane.b32.xlu1 %v2238_v2, %s2199_s20 }
 0x571   : > { %1432 = vrot.lane.b32.xlu1 %v2243_v4, %s2200_s21 }
 0x575   : > { %1430 = vrot.lane.b32.xlu1 %v2238_v2, %s2200_s21 }
 0x579   : > { %1337 = vrot.lane.b32.xlu1 %v2259_v10, %s2201_s22 }
 0x57a   : > { %1250 = vrot.lane.b32.xlu0 %v2243_v4, %s2199_s20 }
 0x57e   : > { %1341 = vrot.lane.b32.xlu0 %v2232_v0, %s2200_s21 }
 0x582   : > { %1339 = vrot.lane.b32.xlu0 %v2234_v1, %s2200_s21 }
 0x5dd   : > { %v1122_v24 = vpop.xlane.xlu1 %1121 }
 0x5de   : > { %v1130_v25 = vsub.f32 %v2048_v13, %v1122_v24 }
 0x5df   : > { %v1119_v26 = vpop.xlane.xlu0 %1118 }
 0x5e0   : > { %v1135_v27 = vmul.f32 1.442695, %v1130_v25  ;;  %v1129_v28 = vsub.f32 %v1017_v16, %v1119_v26 }
 0x5e1   : > { %v1164_v29 = vpop.permute.xlu1 %1163 }
 0x5e2   : > { %2152 = vpow2.f32 %v1135_v27  ;;  %v1133_v30 = vmul.f32 1.442695, %v1129_v28  ;;  %2056 = vmatprep.subr.mxu0 %v1164_v29 }
 0x5e3   : > { %2057 = vmatpush3.msra.mxu0 %v1164_v29 }
 0x5e4   : > { %2154 = vpow2.f32 %v1133_v30 }
 0x5e5   : > { %v1162_v31 = vpop.permute.xlu1 %1161 }
 0x5e6   : > { %2058 = vmatprep.subr.mxu0 %v1162_v31 }
 0x5e7   : > { %2059 = vmatpush3.msra.mxu0 %v1162_v31 }
 0x5e9   : > { %v1125_v10 = vpop.xlane.xlu0 %1124  ;;  %v1249_v35 = vpop.permute.xlu1 %1248 }
 0x5ea   : > { %v1131_v32 = vsub.f32 %v1108_v21, %v1125_v10 }
 0x5ec   : > { %v1137_v33 = vmul.f32 1.442695, %v1131_v32 }
 0x5ed   : > { %v1128_v34 = vpop.xlane.xlu0 %1127  ;;  %v1433_v43 = vpop.permute.xlu1 %1432 }
 0x5ee   : > { %2156 = vpow2.f32 %v1137_v33  ;;  %v1132_v36 = vsub.f32 %v2055_v20, %v1128_v34 }
 0x5ef   : > { %v2153_v37 = vpop.eup %2152 }
 0x5f0   : > { %v1139_v38 = vmul.f32 1.442695, %v1132_v36  ;;  %v1144_v39 = vsel %vm316_vm1, %v2153_v37, 0.0 }
 0x5f1   : > { %v2155_v40 = vpop.eup %2154  ;;  %1145 = vadd.xlane.f32.xlu0 %v1144_v39  ;;  %v1251_v41 = vpop.permute.xlu0 %1250 }
 0x5f2   : > { %2158 = vpow2.f32 %v1139_v38  ;;  %v1141_v42 = vsel %vm316_vm1, %v2155_v40, 0.0  ;;  %2063 = vmatprep.subr.mxu1 %v1251_v41  ;;  %v1431_v49 = vpop.permute.xlu1 %1430 }
 0x5f3   : > { %1142 = vadd.xlane.f32.xlu1 %v1141_v42  ;;  %2064 = vmatpush3.msra.mxu1 %v1251_v41 }
 0x5f4   : > { %2065 = vmatprep.subr.mxu1 %v1249_v35 }
 0x5f5   : > { %2066 = vmatpush3.msra.mxu1 %v1249_v35  ;;  %v1342_v44 = vpop.permute.xlu0 %1341 }
 0x5f6   : > { %2077 = vmatprep.subr.msk.mxu1 %vm139_vm0, %v1433_v43  ;;  %2070 = vmatprep.subr.msk.mxu0 %vm139_vm0, %v1342_v44  ;;  %v1338_v51 = vpop.permute.xlu1 %1337 }
 0x5f9   : > { %v1340_v50 = vpop.permute.xlu0 %1339 }
 0x5fb   : > { %v2157_v45 = vpop.eup %2156 }
 0x5fc   : > { %v1147_v46 = vsel %vm316_vm1, %v2157_v45, 0.0 }
 0x5fd   : > { %1148 = vadd.xlane.f32.xlu1 %v1147_v46 }
 0x5ff   : > { %v2159_v47 = vpop.eup %2158 }
 0x600   : > { %v1150_v48 = vsel %vm316_vm1, %v2159_v47, 0.0 }
 0x601   : > { %1151 = vadd.xlane.f32.xlu0 %v1150_v48 }
 0x60e   : > { %1428 = vrot.lane.b32.xlu1 %v2267_v11, %s2201_s22 }
 0x617   : > { %1335 = vrot.lane.b32.xlu0 %v2241_v3, %s2201_s22 }
 0x61b   : > { %1426 = vrot.lane.b32.xlu0 %v2246_v5, %s2201_s22 }
 0x67a   : > { %v1146_v52 = vpop.xlane.xlu0 %1145 }
 0x67b   : > { %2160 = vrcp.f32 %v1146_v52 }
 0x67c   : > { %v1143_v53 = vpop.xlane.xlu1 %1142 }
 0x67d   : > { %2162 = vrcp.f32 %v1143_v53 }
 0x686   : > { %v1149_v54 = vpop.xlane.xlu1 %1148 }
 0x687   : > { %2164 = vrcp.f32 %v1149_v54 }
 0x688   : > { %v2161_v55 = vpop.eup %2160 }
 0x689   : > { %v1158_v58 = vmul.f32 %v2161_v55, %v2153_v37 }
 0x68a   : > { %v2163_v56 = vpop.eup %2162  ;;  %v1152_v57 = vpop.xlane.xlu0 %1151 }
 0x68b   : > { %2166 = vrcp.f32 %v1152_v57  ;;  %v1157_v11 = vmul.f32 %v2163_v56, %v2155_v40  ;;  %v1429_v63 = vpop.permute.xlu1 %1428 }
 0x68d   : > { %2060 = vmatprep.mubr.msk.f32.mxu0 %vm316_vm1, %v1157_v11 }
 0x68e   : > { %2061 = vmatmul.mubr.msk.f32.vlgmr.msra.gmra.mxu0 %vm316_vm1, %v1158_v58  ;;  %v1336_v3 = vpop.permute.xlu0 %1335 }
 0x68f   : > { %2071 = vmatpush3.xpose.msk.msra.mxu0 %vm139_vm0, %v1342_v44  ;;  %2074 = vmatprep.mubr.msk.f32.mxu0 %vm139_vm0, %v1336_v3 }
 0x690   : > { %2072 = vmatprep.subr.msk.mxu0 %vm139_vm0, %v1340_v50 }
 0x692   : > { %v1427_v62 = vpop.permute.xlu0 %1426 }
 0x693   : > { %2073 = vmatpush3.xpose.msk.msra.mxu0 %vm139_vm0, %v1340_v50 }
 0x694   : > { %v2165_v5 = vpop.eup %2164 }
 0x695   : > { %v1159_v59 = vmul.f32 %v2165_v5, %v2157_v45 }
 0x696   : > { %2075 = vmatmul.mubr.msk.f32.vlgmr.msra.gmra.mxu0 %vm139_vm0, %v1338_v51 }
 0x697   : > { %2067 = vmatprep.mubr.msk.f32.mxu1 %vm316_vm1, %v1159_v59 }
 0x698   : > { %v2167_v60 = vpop.eup %2166 }
 0x699   : > { %v1160_v61 = vmul.f32 %v2167_v60, %v2159_v47 }
 0x69b   : > { %2068 = vmatmul.mubr.msk.f32.vlgmr.msra.gmra.mxu1 %vm316_vm1, %v1160_v61 }
 0x69c   : > { %2078 = vmatpush3.xpose.msk.msra.mxu1 %vm139_vm0, %v1433_v43  ;;  %2081 = vmatprep.mubr.msk.f32.mxu1 %vm139_vm0, %v1427_v62 }
 0x69d   : > { %2079 = vmatprep.subr.msk.mxu1 %vm139_vm0, %v1431_v49 }
 0x6a0   : > { %2080 = vmatpush3.xpose.msk.msra.mxu1 %vm139_vm0, %v1431_v49 }
 0x6a3   : > { %2082 = vmatmul.mubr.msk.f32.vlgmr.msra.gmra.mxu1 %vm139_vm0, %v1429_v63 }
 0x74e   : > { %v2062_v13 = vpop.f32.mrf.mxu0 }
 0x750   : > { %v1239_v14 = vpop.f32.mrf.mxu0 }
 0x756   : > { %v2076_v16 = vpop.f32.mrf.mxu0 }
 0x757   : > { %v1520_v17 = vsel %vm316_vm1, %v2076_v16, -inf }
 0x758   : > { %1521 = vmax.xlane.f32.xlu1 %v1520_v17  ;;  %v1417_v20 = vpop.f32.mrf.mxu0 }
 0x759   : > { %v1517_v21 = vsel %vm316_vm1, %v1417_v20, -inf }
 0x75a   : > { %1518 = vmax.xlane.f32.xlu0 %v1517_v21 }
 0x75b   : > { %v2069_v22 = vpop.f32.mrf.mxu1 }
 0x75d   : > { %v1326_v23 = vpop.f32.mrf.mxu1 }
 0x763   : > { %v2083_v24 = vpop.f32.mrf.mxu1 }
 0x764   : > { %v1526_v27 = vsel %vm316_vm1, %v2083_v24, -inf }
 0x765   : > { %v1508_v25 = vpop.f32.mrf.mxu1 }
 0x766   : > { %v1523_v26 = vsel %vm316_vm1, %v1508_v25, -inf }
 0x767   : > { %1524 = vmax.xlane.f32.xlu0 %v1523_v26 }
 0x769   : > { %1563 = vrot.lane.b32.xlu1 %v2232_v0, %s2202_s23 }
 0x76b   : > { %1527 = vmax.xlane.f32.xlu0 %v1526_v27 }
 0x76d   : > { %1561 = vrot.lane.b32.xlu1 %v2234_v1, %s2202_s23 }
 0x7e1   : > { %v1522_v28 = vpop.xlane.xlu1 %1521 }
 0x7e2   : > { %v1530_v29 = vsub.f32 %v2076_v16, %v1522_v28 }
 0x7e3   : > { %v1519_v30 = vpop.xlane.xlu0 %1518 }
 0x7e4   : > { %v1535_v31 = vmul.f32 1.442695, %v1530_v29  ;;  %v1529_v10 = vsub.f32 %v1417_v20, %v1519_v30 }
 0x7e5   : > { %v1564_v32 = vpop.permute.xlu1 %1563 }
 0x7e6   : > { %2168 = vpow2.f32 %v1535_v31  ;;  %v1533_v33 = vmul.f32 1.442695, %v1529_v10  ;;  %2084 = vmatprep.subr.mxu0 %v1564_v32 }
 0x7e7   : > { %2085 = vmatpush3.msra.mxu0 %v1564_v32 }
 0x7e8   : > { %2170 = vpow2.f32 %v1533_v33 }
 0x7e9   : > { %v1562_v34 = vpop.permute.xlu1 %1561 }
 0x7ea   : > { %2086 = vmatprep.subr.mxu0 %v1562_v34 }
 0x7eb   : > { %2087 = vmatpush3.msra.mxu0 %v1562_v34 }
 0x7f0   : > { %v1525_v0 = vpop.xlane.xlu0 %1524 }
 0x7f1   : > { %v1531_v35 = vsub.f32 %v1508_v25, %v1525_v0 }
 0x7f3   : > { %v2169_v36 = vpop.eup %2168  ;;  %v1537_v37 = vmul.f32 1.442695, %v1531_v35 }
 0x7f4   : > { %v1528_v38 = vpop.xlane.xlu0 %1527  ;;  %v1544_v1 = vsel %vm316_vm1, %v2169_v36, 0.0 }
 0x7f5   : > { %v2171_v39 = vpop.eup %2170  ;;  %2172 = vpow2.f32 %v1537_v37  ;;  %v1532_v40 = vsub.f32 %v2083_v24, %v1528_v38  ;;  %1545 = vadd.xlane.f32.xlu0 %v1544_v1 }
 0x7f6   : > { %v1541_v41 = vsel %vm316_vm1, %v2171_v39, 0.0 }
 0x7f7   : > { %v1539_v42 = vmul.f32 1.442695, %v1532_v40  ;;  %1542 = vadd.xlane.f32.xlu1 %v1541_v41 }
 0x7f9   : > { %2174 = vpow2.f32 %v1539_v42 }
 0x802   : > { %v2173_v43 = vpop.eup %2172 }
 0x803   : > { %v1547_v44 = vsel %vm316_vm1, %v2173_v43, 0.0 }
 0x804   : > { %1548 = vadd.xlane.f32.xlu1 %v1547_v44 }
 0x806   : > { %v2175_v45 = vpop.eup %2174 }
 0x807   : > { %v1550_v46 = vsel %vm316_vm1, %v2175_v45, 0.0 }
 0x808   : > { %1551 = vadd.xlane.f32.xlu0 %v1550_v46 }
 0x815   : > { %1648 = vrot.lane.b32.xlu1 %v2238_v2, %s2202_s23 }
 0x819   : > { %1741 = vrot.lane.b32.xlu1 %v2360_v8, %s2203_s24 }
 0x81d   : > { %1745 = vrot.lane.b32.xlu1 %v2366_v18, %s2203_s24 }
 0x81e   : > { %1650 = vrot.lane.b32.xlu0 %v2243_v4, %s2202_s23 }
 0x821   : > { %1757 = vrot.lane.b32.xlu1 %v2062_v13, %s2204_s25 }
 0x822   : > { %1739 = vrot.lane.b32.xlu0 %v2362_v12, %s2203_s24 }
 0x825   : > { %1761 = vrot.lane.b32.xlu1 %v2069_v22, %s2204_s25 }
 0x826   : > { %1743 = vrot.lane.b32.xlu0 %v2368_v19, %s2203_s24 }
 0x82a   : > { %1755 = vrot.lane.b32.xlu0 %v1239_v14, %s2204_s25 }
 0x82e   : > { %1759 = vrot.lane.b32.xlu0 %v1326_v23, %s2204_s25 }
 0x87e   : > { %v1546_v47 = vpop.xlane.xlu0 %1545 }
 0x87f   : > { %2176 = vrcp.f32 %v1546_v47 }
 0x880   : > { %v1543_v2 = vpop.xlane.xlu1 %1542 }
 0x881   : > { %2178 = vrcp.f32 %v1543_v2 }
 0x88c   : > { %v2177_v48 = vpop.eup %2176 }
 0x88d   : > { %v1549_v8 = vpop.xlane.xlu1 %1548  ;;  %v1558_v50 = vmul.f32 %v2177_v48, %v2169_v36 }
 0x88e   : > { %v2179_v49 = vpop.eup %2178  ;;  %2180 = vrcp.f32 %v1549_v8 }
 0x88f   : > { %v1557_v18 = vmul.f32 %v2179_v49, %v2171_v39 }
 0x891   : > { %2088 = vmatprep.mubr.msk.f32.mxu0 %vm316_vm1, %v1557_v18  ;;  %v1552_v4 = vpop.xlane.xlu0 %1551  ;;  %v1649_v19 = vpop.permute.xlu1 %1648 }
 0x892   : > { %2182 = vrcp.f32 %v1552_v4  ;;  %2089 = vmatmul.mubr.msk.f32.vlgmr.msra.gmra.mxu0 %vm316_vm1, %v1558_v50 }
 0x895   : > { %v1651_v12 = vpop.permute.xlu0 %1650  ;;  %v1742_v58 = vpop.permute.xlu1 %1741 }
 0x896   : > { %2091 = vmatprep.subr.mxu1 %v1651_v12  ;;  %v1784_v13 = vsel %vm139_vm0, %v2312_v6, %v1742_v58 }
 0x897   : > { %2092 = vmatpush3.msra.mxu1 %v1651_v12 }
 0x898   : > { %2093 = vmatprep.subr.mxu1 %v1649_v19 }
 0x899   : > { %2094 = vmatpush3.msra.mxu1 %v1649_v19  ;;  %v1740_v3 = vpop.permute.xlu0 %1739  ;;  %v1746_v5 = vpop.permute.xlu1 %1745 }
 0x89a   : > { %v1783_v17 = vsel %vm139_vm0, %v2314_v7, %v1740_v3  ;;  %v1786_v23 = vsel %vm139_vm0, %v2316_v9, %v1746_v5 }
 0x89b   : > { %v2181_v51 = vpop.eup %2180 }
 0x89c   : > { %v1559_v52 = vmul.f32 %v2181_v51, %v2173_v43 }
 0x89d   : > { %v1744_v59 = vpop.permute.xlu0 %1743  ;;  %v1758_v60 = vpop.permute.xlu1 %1757 }
 0x89e   : > { %2095 = vmatprep.mubr.msk.f32.mxu1 %vm316_vm1, %v1559_v52  ;;  %v1788_v14 = vsel %vm316_vm1, %v1784_v13, %v1758_v60  ;;  %v1785_v7 = vsel %vm139_vm0, %v2320_v15, %v1744_v59 }
 0x89f   : > { %v2183_v53 = vpop.eup %2182 }
 0x8a0   : > { %v1560_v54 = vmul.f32 %v2183_v53, %v2175_v45 }
 0x8a1   : > { %v1756_v61 = vpop.permute.xlu0 %1755  ;;  %v1762_v62 = vpop.permute.xlu1 %1761 }
 0x8a2   : > { %2096 = vmatmul.mubr.msk.f32.vlgmr.msra.gmra.mxu1 %vm316_vm1, %v1560_v54  ;;  %v1787_v21 = vsel %vm316_vm1, %v1783_v17, %v1756_v61  ;;  %v1790_v24 = vsel %vm316_vm1, %v1786_v23, %v1762_v62 }
 0x8a5   : > { %v1760_v63 = vpop.permute.xlu0 %1759 }
 0x8a6   : > { %v1789_v27 = vsel %vm316_vm1, %v1785_v7, %v1760_v63 }
 0x952   : > { %v2090_v55 = vpop.f32.mrf.mxu0 }
 0x953   : > { %1773 = vrot.lane.b32.xlu1 %v2090_v55, %s2205_s26 }
 0x954   : > { %v1639_v56 = vpop.f32.mrf.mxu0 }
 0x955   : > { %1771 = vrot.lane.b32.xlu0 %v1639_v56, %s2205_s26 }
 0x962   : > { %v2097_v57 = vpop.f32.mrf.mxu1 }
 0x963   : > { %1777 = vrot.lane.b32.xlu1 %v2097_v57, %s2205_s26 }
 0x964   : > { %v1726_v11 = vpop.f32.mrf.mxu1 }
 0x965   : > { %1775 = vrot.lane.b32.xlu0 %v1726_v11, %s2205_s26 }
 0x9c5   : > { %v1774_v16 = vpop.permute.xlu1 %1773 }
 0x9c6   : > { %v1793_v20 = vsel %vm1791_vm2, %v1788_v14, %v1774_v16 }
 0x9c7   : > { %1798 = vst.msk [vmem:[%s123_s29 + $0x8] sm:$0xff] %vm1796_vm3, %v1793_v20  ;;  %v1772_v22 = vpop.permute.xlu0 %1771 }
 0x9c8   : > { %v1792_v6 = vsel %vm1791_vm2, %v1787_v21, %v1772_v22 }
 0x9c9   : > { %1797 = vst.msk [vmem:[%s123_s29] sm:$0xff] %vm1796_vm3, %v1792_v6 }
 0x9d5   : > { %v1778_v25 = vpop.permute.xlu1 %1777 }
 0x9d6   : > { %v1795_v26 = vsel %vm1791_vm2, %v1790_v24, %v1778_v25 }
 0x9d7   : > { %1800 = vst.msk [vmem:[%s123_s29 + $0x18] sm:$0xff] %vm1796_vm3, %v1795_v26  ;;  %v1776_v28 = vpop.permute.xlu0 %1775 }
 0x9d8   : > { %v1794_v29 = vsel %vm1791_vm2, %v1789_v27, %v1776_v28 }
 0x9d9   : > { %1799 = vst.msk [vmem:[%s123_s29 + $0x10] sm:$0xff] %vm1796_vm3, %v1794_v29 }
 0x9da PF: > { %s11_s6 = sadd.s32 1, %s2190_s6  }
 0x9db   : > { %p8_p4 = scmp.ge.s32.totalorder %s11_s6, 4  }
 0x9dd   :  { %10 = sbr.rel (!%p8_p4) target bundleno = 1 (0x1), region = 54 }

// kernel: distilled_vit_forward.27
= control target key start
LH: loop header
LB: loop body
LE: loop exit
PB: predicated region body
PF: predicated region fallthrough
CT: control target
= control target key end

     0   :  { %s706_s15 = smov 0   ;;  %s708_s16 = smov 0   ;;  %s801_s0 = inlined_call_operand.vmem [shape: f32[64,128], index: 0, kind: input, shape index: {}]   ;;  %s802_s1 = inlined_call_operand.vmem [shape: f32[128,32], index: 1, kind: input, shape index: {}]   ;;  %s803_s2 = inlined_call_operand.vmem [shape: f32[1,32], index: 2, kind: input, shape index: {}]   ;;  %s804_s3 = inlined_call_operand.vmem [shape: f32[64,32], index: 3, kind: input, shape index: {}]   ;;  %s805_s4 = inlined_call_operand.vmem [shape: f32[64,32], index: 4, kind: output, shape index: {}]  }
   0x1   :  { %s710_s17 = smov 0  }
   0x2 LB: > { %s26_s18 = sadd.s32 1, %s675_s16  ;;  %p533_p0 = scmp.ge.s32.totalorder %s679_s17, 1  ;;  %s679_s17 = sphi %s710_s17, %s14_s17   ;;  %s675_s16 = sphi %s708_s16, %s807_s16   ;;  %s671_s15 = sphi %s706_s15, %s806_s15  }
   0x3   : > { %p28_p1 = scmp.ge.s32.totalorder %s26_s18, 2  ;;  %p210_p2 = scmp.lt.s32.totalorder %s679_s17, 3 }
   0x5   : > { %s809_s18 = smov (%p28_p1, %s26_s18), 0  ;;  %p211_p3 = pnand %p533_p0, %p210_p2 }
   0x6   : > { %s534_s9 = sshll.u32 (!%p211_p3), %s671_s15, 2 }
   0x7   : > { %214 = sbr.rel (%p211_p3) target bundleno = 246 (0xf6), region = 36  ;;  %p255_p4 = scmp.lt.s32.totalorder (!%p211_p3), %s534_s9, 7 }
   0xc   : > { %v304_v0 = vld [vmem:[%s802_s1 + $0x78] sm:$0xff]  ;;  %v303_v1 = vld [vmem:[%s802_s1 + $0x70] sm:$0xff]  ;;  %v302_v2 = vld [vmem:[%s802_s1 + $0x68] sm:$0xff]  ;;  %s811_s9 = smov (!%p255_p4, %s534_s9), 7  ;;  %vm405_vm0 = vcmask 261120  }
   0xd   : > { %563 = vmatprep.subr.mxu0 %v304_v0  ;;  %601 = vmatprep.subr.mxu1 %v304_v0  ;;  %v301_v3 = vld [vmem:[%s802_s1 + $0x60] sm:$0xff]  ;;  %v300_v4 = vld [vmem:[%s802_s1 + $0x58] sm:$0xff]  ;;  %v299_v5 = vld [vmem:[%s802_s1 + $0x50] sm:$0xff]  ;;  %s769_s25 = sshll.u32 %s811_s9, 3 }
   0xe   : > { %564 = vmatpush3.msra.mxu0 %v304_v0  ;;  %617 = vmatpush3.msra.mxu1 %v304_v0  ;;  %v298_v6 = vld [vmem:[%s802_s1 + $0x48] sm:$0xff]  ;;  %v297_v7 = vld [vmem:[%s802_s1 + $0x40] sm:$0xff]  ;;  %v296_v8 = vld [vmem:[%s802_s1 + $0x38] sm:$0xff]  ;;  %s258_s30 = scalar_lea.vmem %s801_s0, %s769_s25  ;;  %s274_s11 = scalar_lea.vmem %s804_s3, %s769_s25 }
   0xf   : > { %565 = vmatprep.subr.mxu0 %v303_v1  ;;  %602 = vmatprep.subr.mxu1 %v303_v1  ;;  %v295_v9 = vld [vmem:[%s802_s1 + $0x30] sm:$0xff]  ;;  %v294_v10 = vld [vmem:[%s802_s1 + $0x28] sm:$0xff]  ;;  %v293_v11 = vld [vmem:[%s802_s1 + $0x20] sm:$0xff]  ;;  %s283_s14 = scalar_lea.vmem %s805_s4, %s769_s25 }
  0x10   : > { %566 = vmatpush3.msra.mxu0 %v303_v1  ;;  %618 = vmatpush3.msra.mxu1 %v303_v1  ;;  %v292_v12 = vld [vmem:[%s802_s1 + $0x18] sm:$0xff]  ;;  %v291_v13 = vld [vmem:[%s802_s1 + $0x10] sm:$0xff]  ;;  %v290_v14 = vld [vmem:[%s802_s1 + $0x8] sm:$0xff] }
  0x11   : > { %567 = vmatprep.subr.mxu0 %v302_v2  ;;  %603 = vmatprep.subr.mxu1 %v302_v2  ;;  %v289_v15 = vld [vmem:[%s802_s1] sm:$0xff]  ;;  %v287_v17 = vld [vmem:[%s258_s30 + $0x10] sm:$0xff]  ;;  %v286_v18 = vld [vmem:[%s258_s30 + $0x8] sm:$0xff] }
  0x12   : > { %568 = vmatpush3.msra.mxu0 %v302_v2  ;;  %619 = vmatpush3.msra.mxu1 %v302_v2  ;;  %v285_v16 = vld [vmem:[%s258_s30] sm:$0xff]  ;;  %v288_v19 = vld [vmem:[%s258_s30 + $0x18] sm:$0xff]  ;;  %v398_v27 = vld [vmem:[%s274_s11 + $0x8] sm:$0xff] }
  0x13   : > { %569 = vmatprep.subr.mxu0 %v301_v3  ;;  %604 = vmatprep.subr.mxu1 %v301_v3  ;;  %v540_v20 = vld [vmem:[%s803_s2] ss:$0 sm:$0xff]  ;;  %v399_v31 = vld [vmem:[%s274_s11 + $0x10] sm:$0xff]  ;;  %v400_v32 = vld [vmem:[%s274_s11 + $0x18] sm:$0xff] }
  0x14   : > { %570 = vmatpush3.msra.mxu0 %v301_v3  ;;  %620 = vmatpush3.msra.mxu1 %v301_v3  ;;  %v397_v25 = vld [vmem:[%s274_s11] sm:$0xff] }
  0x15   : > { %571 = vmatprep.subr.mxu0 %v300_v4  ;;  %605 = vmatprep.subr.mxu1 %v300_v4 }
  0x16   : > { %572 = vmatpush3.msra.mxu0 %v300_v4  ;;  %621 = vmatpush3.msra.mxu1 %v300_v4 }
  0x17   : > { %573 = vmatprep.subr.mxu0 %v299_v5  ;;  %606 = vmatprep.subr.mxu1 %v299_v5 }
  0x18   : > { %574 = vmatpush3.msra.mxu0 %v299_v5  ;;  %622 = vmatpush3.msra.mxu1 %v299_v5 }
  0x19   : > { %575 = vmatprep.subr.mxu0 %v298_v6  ;;  %607 = vmatprep.subr.mxu1 %v298_v6 }
  0x1a   : > { %576 = vmatpush3.msra.mxu0 %v298_v6  ;;  %623 = vmatpush3.msra.mxu1 %v298_v6 }
  0x1b   : > { %577 = vmatprep.subr.mxu0 %v297_v7  ;;  %608 = vmatprep.subr.mxu1 %v297_v7 }
  0x1c   : > { %578 = vmatpush3.msra.mxu0 %v297_v7  ;;  %624 = vmatpush3.msra.mxu1 %v297_v7 }
  0x1d   : > { %579 = vmatprep.subr.mxu0 %v296_v8  ;;  %609 = vmatprep.subr.mxu1 %v296_v8 }
  0x1e   : > { %580 = vmatpush3.msra.mxu0 %v296_v8  ;;  %625 = vmatpush3.msra.mxu1 %v296_v8 }
  0x1f   : > { %581 = vmatprep.subr.mxu0 %v295_v9  ;;  %610 = vmatprep.subr.mxu1 %v295_v9 }
  0x20   : > { %582 = vmatpush3.msra.mxu0 %v295_v9  ;;  %626 = vmatpush3.msra.mxu1 %v295_v9 }
  0x21   : > { %583 = vmatprep.subr.mxu0 %v294_v10  ;;  %611 = vmatprep.subr.mxu1 %v294_v10 }
  0x22   : > { %584 = vmatpush3.msra.mxu0 %v294_v10  ;;  %627 = vmatpush3.msra.mxu1 %v294_v10 }
  0x23   : > { %585 = vmatprep.subr.mxu0 %v293_v11  ;;  %612 = vmatprep.subr.mxu1 %v293_v11 }
  0x24   : > { %586 = vmatpush3.msra.mxu0 %v293_v11  ;;  %628 = vmatpush3.msra.mxu1 %v293_v11 }
  0x25   : > { %587 = vmatprep.subr.mxu0 %v292_v12  ;;  %613 = vmatprep.subr.mxu1 %v292_v12 }
  0x26   : > { %588 = vmatpush3.msra.mxu0 %v292_v12  ;;  %629 = vmatpush3.msra.mxu1 %v292_v12 }
  0x27   : > { %589 = vmatprep.subr.mxu0 %v291_v13  ;;  %614 = vmatprep.subr.mxu1 %v291_v13 }
  0x28   : > { %590 = vmatpush3.msra.mxu0 %v291_v13  ;;  %630 = vmatpush3.msra.mxu1 %v291_v13 }
  0x29   : > { %591 = vmatprep.subr.mxu0 %v290_v14  ;;  %615 = vmatprep.subr.mxu1 %v290_v14 }
  0x2a   : > { %592 = vmatpush3.msra.mxu0 %v290_v14  ;;  %631 = vmatpush3.msra.mxu1 %v290_v14 }
  0x2b   : > { %593 = vmatprep.subr.mxu0 %v289_v15  ;;  %616 = vmatprep.subr.mxu1 %v289_v15 }
  0x2c   : > { %594 = vmatpush3.msra.mxu0 %v289_v15  ;;  %632 = vmatpush3.msra.mxu1 %v289_v15 }
  0x2d   : > { %595 = vmatprep.mubr.f32.mxu0 %v285_v16  ;;  %598 = vmatprep.mubr.f32.mxu1 %v287_v17 }
  0x2e   : > { %596 = vmatmul.mubr.f32.vlgmr.msra.gmra.mxu0 %v286_v18  ;;  %599 = vmatmul.mubr.f32.vlgmr.msra.gmra.mxu1 %v288_v19 }
  0xee   : > { %v597_v21 = vpop.f32.mrf.mxu0  ;;  %v600_v22 = vpop.f32.mrf.mxu1 }
  0xef   : > { %v384_v23 = vadd.f32 %v597_v21, %v540_v20  ;;  %v394_v30 = vadd.f32 %v600_v22, %v540_v20 }
  0xf0   : > { %v378_v24 = vpop.f32.mrf.mxu0  ;;  %v388_v26 = vpop.f32.mrf.mxu1 }
  0xf1   : > { %v379_v28 = vadd.f32 %v540_v20, %v378_v24  ;;  %v389_v29 = vadd.f32 %v540_v20, %v388_v26  ;;  %v402_v34 = vadd.f32 %v398_v27, %v384_v23  ;;  %v404_v36 = vadd.f32 %v400_v32, %v394_v30 }
  0xf3   : > { %v401_v33 = vadd.f32 %v397_v25, %v379_v28  ;;  %v403_v35 = vadd.f32 %v399_v31, %v389_v29  ;;  %407 = vst.msk [vmem:[%s283_s14 + $0x8] sm:$0xff] %vm405_vm0, %v402_v34  ;;  %409 = vst.msk [vmem:[%s283_s14 + $0x18] sm:$0xff] %vm405_vm0, %v404_v36 }
  0xf5   : > { %406 = vst.msk [vmem:[%s283_s14] sm:$0xff] %vm405_vm0, %v401_v33  ;;  %408 = vst.msk [vmem:[%s283_s14 + $0x10] sm:$0xff] %vm405_vm0, %v403_v35 }
  0xf6 PF: > { %s14_s17 = sadd.s32 1, %s679_s17   ;;  %s806_s15 = smov %s675_s16 }
  0xf7   : > { %p11_p5 = scmp.ge.s32.totalorder %s14_s17, 4   ;;  %s807_s16 = smov %s809_s18 }
  0xf9   :  { %13 = sbr.rel (!%p11_p5) target bundleno = 2 (0x2), region = 75 }

// kernel: distilled_vit_forward.26
= control target key start
LH: loop header
LB: loop body
LE: loop exit
PB: predicated region body
PF: predicated region fallthrough
CT: control target
= control target key end

     0   :  { %s841_s18 = smov 0   ;;  %s843_s19 = smov 0   ;;  %s951_s0 = inlined_call_operand.vmem [shape: f32[64,32], index: 0, kind: input, shape index: {}]   ;;  %s952_s1 = inlined_call_operand.vmem [shape: f32[1,32], index: 1, kind: input, shape index: {}]   ;;  %s953_s2 = inlined_call_operand.vmem [shape: f32[1,32], index: 2, kind: input, shape index: {}]   ;;  %s954_s3 = inlined_call_operand.vmem [shape: f32[32,128], index: 3, kind: input, shape index: {}]   ;;  %s955_s4 = inlined_call_operand.vmem [shape: f32[1,128], index: 4, kind: input, shape index: {}]   ;;  %s956_s5 = inlined_call_operand.vmem [shape: f32[64,128], index: 5, kind: output, shape index: {}]  }
   0x1   :  { %s845_s20 = smov 0  }
   0x2 LB: > { %s27_s21 = sadd.s32 1, %s805_s19  ;;  %p687_p0 = scmp.ge.s32.totalorder %s809_s20, 1  ;;  %s809_s20 = sphi %s845_s20, %s15_s20   ;;  %s805_s19 = sphi %s843_s19, %s958_s19   ;;  %s801_s18 = sphi %s841_s18, %s957_s18  }
   0x3   : > { %p29_p1 = scmp.ge.s32.totalorder %s27_s21, 2  ;;  %p219_p2 = scmp.lt.s32.totalorder %s809_s20, 3 }
   0x5   : > { %s960_s21 = smov (%p29_p1, %s27_s21), 0  ;;  %p220_p3 = pnand %p687_p0, %p219_p2 }
   0x6   : > { %s688_s22 = sshll.u32 (!%p220_p3), %s801_s18, 2 }
   0x7   : > { %223 = sbr.rel (%p220_p3) target bundleno = 582 (0x246), region = 40  ;;  %p258_p4 = scmp.lt.s32.totalorder (!%p220_p3), %s688_s22, 7 }
   0xc   : > { %s962_s22 = smov (!%p258_p4, %s688_s22), 7  ;;  %vm283_vm0 = vcmask 261120   ;;  %v362_v28 = vld [vmem:[%s954_s3 + $0x18] sm:$0xff]  ;;  %v361_v29 = vld [vmem:[%s954_s3 + $0x10] sm:$0xff]  ;;  %v360_v30 = vld [vmem:[%s954_s3 + $0x8] sm:$0xff] }
   0xd   : > { %s689_s23 = sshll.u32 %s962_s22, 3  ;;  %717 = vmatprep.subr.mxu0 %v362_v28  ;;  %731 = vmatprep.subr.mxu1 %v362_v28  ;;  %v359_v31 = vld [vmem:[%s954_s3] sm:$0xff] }
   0xe   : > { %s261_s26 = scalar_lea.vmem %s951_s0, %s689_s23  ;;  %718 = vmatpush3.msra.mxu0 %v362_v28  ;;  %735 = vmatpush3.msra.mxu1 %v362_v28  ;;  %v692_v45 = vld [vmem:[%s952_s1] ss:$0 sm:$0xff]  ;;  %s277_s18 = scalar_lea.vmem %s956_s5, %s689_s23 }
   0xf   : > { %v279_v0 = vld [vmem:[%s261_s26] sm:$0xff]  ;;  %v281_v1 = vld [vmem:[%s261_s26 + $0x10] sm:$0xff]  ;;  %v280_v2 = vld [vmem:[%s261_s26 + $0x8] sm:$0xff]  ;;  %719 = vmatprep.subr.mxu0 %v361_v29  ;;  %732 = vmatprep.subr.mxu1 %v361_v29 }
  0x10   : > { %v284_v3 = vsel %vm283_vm0, %v279_v0, 0.0  ;;  %v290_v4 = vsel %vm283_vm0, %v281_v1, 0.0  ;;  %v282_v5 = vld [vmem:[%s261_s26 + $0x18] sm:$0xff]  ;;  %v287_v6 = vsel %vm283_vm0, %v280_v2, 0.0  ;;  %720 = vmatpush3.msra.mxu0 %v361_v29  ;;  %736 = vmatpush3.msra.mxu1 %v361_v29  ;;  %v693_v47 = vld [vmem:[%s953_s2] ss:$0 sm:$0xff] }
  0x11   : > { %285 = vadd.xlane.f32.xlu0 %v284_v3  ;;  %291 = vadd.xlane.f32.xlu1 %v290_v4  ;;  %v293_v7 = vsel %vm283_vm0, %v282_v5, 0.0  ;;  %v694_v62 = vld [vmem:[%s955_s4] ss:$0 sm:$0xff] }
  0x12   : > { %721 = vmatprep.subr.mxu0 %v360_v30  ;;  %733 = vmatprep.subr.mxu1 %v360_v30 }
  0x13   : > { %722 = vmatpush3.msra.mxu0 %v360_v30  ;;  %737 = vmatpush3.msra.mxu1 %v360_v30 }
  0x14   : > { %723 = vmatprep.subr.mxu0 %v359_v31  ;;  %734 = vmatprep.subr.mxu1 %v359_v31 }
  0x15   : > { %288 = vadd.xlane.f32.xlu0 %v287_v6  ;;  %294 = vadd.xlane.f32.xlu1 %v293_v7 }
  0x16   : > { %724 = vmatpush3.msra.mxu0 %v359_v31  ;;  %738 = vmatpush3.msra.mxu1 %v359_v31 }
  0x9a   : > { %v286_v8 = vpop.xlane.xlu0 %285  ;;  %v292_v9 = vpop.xlane.xlu1 %291 }
  0x9b   : > { %v297_v10 = vmul.f32 0.03125, %v286_v8  ;;  %v299_v11 = vmul.f32 0.03125, %v292_v9 }
  0x9d   : > { %v301_v12 = vsub.f32 %v279_v0, %v297_v10  ;;  %v871_v13 = vsub.f32 %v281_v1, %v299_v11 }
  0x9e   : > { %v289_v14 = vpop.xlane.xlu0 %288  ;;  %v295_v15 = vpop.xlane.xlu1 %294 }
  0x9f   : > { %v298_v16 = vmul.f32 0.03125, %v289_v14  ;;  %v300_v17 = vmul.f32 0.03125, %v295_v15  ;;  %v305_v18 = vmul.f32 %v301_v12, %v301_v12  ;;  %v307_v19 = vmul.f32 %v871_v13, %v871_v13 }
  0xa1   : > { %v302_v20 = vsub.f32 %v280_v2, %v298_v16  ;;  %v304_v21 = vsub.f32 %v282_v5, %v300_v17  ;;  %v309_v22 = vsel %vm283_vm0, %v305_v18, 0.0  ;;  %v315_v23 = vsel %vm283_vm0, %v307_v19, 0.0 }
  0xa2   : > { %310 = vadd.xlane.f32.xlu0 %v309_v22 }
  0xa3   : > { %v306_v24 = vmul.f32 %v302_v20, %v302_v20  ;;  %v308_v25 = vmul.f32 %v304_v21, %v304_v21 }
  0xa5   : > { %v312_v26 = vsel %vm283_vm0, %v306_v24, 0.0  ;;  %v318_v27 = vsel %vm283_vm0, %v308_v25, 0.0 }
  0xa6   : > { %316 = vadd.xlane.f32.xlu0 %v315_v23  ;;  %313 = vadd.xlane.f32.xlu1 %v312_v26 }
  0xaa   : > { %319 = vadd.xlane.f32.xlu1 %v318_v27 }
 0x12b   : > { %v311_v32 = vpop.xlane.xlu0 %310 }
 0x12c   : > { %v321_v33 = vmul.f32 0.03125, %v311_v32 }
 0x12e   : > { %v325_v34 = vadd.f32 1e-06, %v321_v33 }
 0x12f   : > { %v314_v35 = vpop.xlane.xlu1 %313  ;;  %v317_v36 = vpop.xlane.xlu0 %316 }
 0x130   : > { %763 = vrsqrt.f32 %v325_v34  ;;  %v322_v37 = vmul.f32 0.03125, %v314_v35  ;;  %v323_v38 = vmul.f32 0.03125, %v317_v36 }
 0x132   : > { %v326_v39 = vadd.f32 1e-06, %v322_v37  ;;  %v327_v40 = vadd.f32 1e-06, %v323_v38 }
 0x133   : > { %v320_v41 = vpop.xlane.xlu1 %319 }
 0x134   : > { %765 = vrsqrt.f32 %v326_v39  ;;  %v324_v42 = vmul.f32 0.03125, %v320_v41 }
 0x135   : > { %767 = vrsqrt.f32 %v327_v40 }
 0x136   : > { %v328_v43 = vadd.f32 1e-06, %v324_v42 }
 0x138   : > { %769 = vrsqrt.f32 %v328_v43 }
 0x13d   : > { %v764_v44 = vpop.eup %763 }
 0x13e   : > { %v333_v46 = vmul.f32 %v764_v44, %v301_v12 }
 0x140   : > { %v344_v48 = vmul.f32 %v692_v45, %v333_v46 }
 0x141   : > { %v766_v49 = vpop.eup %765 }
 0x142   : > { %v768_v50 = vpop.eup %767  ;;  %v355_v51 = vadd.f32 %v693_v47, %v344_v48  ;;  %v334_v52 = vmul.f32 %v766_v49, %v302_v20 }
 0x143   : > { %v335_v53 = vmul.f32 %v768_v50, %v871_v13 }
 0x144   : > { %725 = vmatprep.mubr.msk.f32.mxu0 %vm283_vm0, %v355_v51  ;;  %v345_v54 = vmul.f32 %v692_v45, %v334_v52 }
 0x145   : > { %v770_v55 = vpop.eup %769  ;;  %v346_v56 = vmul.f32 %v692_v45, %v335_v53 }
 0x146   : > { %v356_v57 = vadd.f32 %v693_v47, %v345_v54  ;;  %v336_v58 = vmul.f32 %v770_v55, %v304_v21 }
 0x147   : > { %v357_v59 = vadd.f32 %v693_v47, %v346_v56 }
 0x148   : > { %726 = vmatmul.mubr.msk.f32.vlgmr.msra.gmra.mxu0 %vm283_vm0, %v356_v57  ;;  %v347_v60 = vmul.f32 %v692_v45, %v336_v58 }
 0x149   : > { %728 = vmatprep.mubr.msk.f32.mxu1 %vm283_vm0, %v357_v59 }
 0x14a   : > { %v358_v61 = vadd.f32 %v693_v47, %v347_v60 }
 0x14c   : > { %729 = vmatmul.mubr.msk.f32.vlgmr.msra.gmra.mxu1 %vm283_vm0, %v358_v61 }
 0x208   : > { %v727_v63 = vpop.f32.mrf.mxu0 }
 0x209   : > { %v905_v0 = vadd.f32 %v727_v63, %v694_v62 }
 0x20a   : > { %v448_v1 = vpop.f32.mrf.mxu0 }
 0x20b   : > { %v908_v2 = vmul.f32 0.70710677, %v905_v0  ;;  %v910_v3 = vadd.f32 %v694_v62, %v448_v1 }
 0x20c   : > { %v730_v4 = vpop.f32.mrf.mxu1 }
 0x20d   : > { %v472_v5 = vand.u32 2147483647, %v908_v2  ;;  %v914_v6 = vmul.f32 0.70710677, %v910_v3  ;;  %v916_v7 = vadd.f32 %v730_v4, %v694_v62  ;;  %vm552_vm1 = vcmp.ge.f32.partialorder %v908_v2, 0.0 }
 0x20e   : > { %v458_v8 = vpop.f32.mrf.mxu1 }
 0x20f   : > { %v476_v9 = vmul.f32 0.3275911, %v472_v5  ;;  %v471_v10 = vand.u32 2147483647, %v914_v6  ;;  %v920_v11 = vmul.f32 0.70710677, %v916_v7  ;;  %v922_v12 = vadd.f32 %v694_v62, %v458_v8 }
 0x210   : > { %v528_v23 = vsub.f32 0.0, %v472_v5  ;;  %vm551_vm2 = vcmp.ge.f32.partialorder %v914_v6, 0.0 }
 0x211   : > { %v480_v13 = vadd.f32 1.0, %v476_v9  ;;  %v475_v14 = vmul.f32 0.3275911, %v471_v10  ;;  %v474_v15 = vand.u32 2147483647, %v920_v11  ;;  %v527_v24 = vsub.f32 0.0, %v471_v10 }
 0x212   : > { %v926_v16 = vmul.f32 0.70710677, %v922_v12  ;;  %v532_v25 = vmul.f32 %v528_v23, %v472_v5  ;;  %vm554_vm3 = vcmp.ge.f32.partialorder %v920_v11, 0.0  ;;  %v565_v11 = vmul.f32 0.5, %v922_v12 }
 0x213   : > { %771 = vrcp.f32 %v480_v13  ;;  %v479_v17 = vadd.f32 1.0, %v475_v14  ;;  %v478_v18 = vmul.f32 0.3275911, %v474_v15  ;;  %v530_v26 = vsub.f32 0.0, %v474_v15 }
 0x214   : > { %v473_v19 = vand.u32 2147483647, %v926_v16  ;;  %v531_v28 = vmul.f32 %v527_v24, %v471_v10  ;;  %v537_v30 = vmul.f32 1.442695, %v532_v25  ;;  %vm553_vm4 = vcmp.ge.f32.partialorder %v926_v16, 0.0 }
 0x215   : > { %773 = vrcp.f32 %v479_v17  ;;  %v482_v20 = vadd.f32 1.0, %v478_v18  ;;  %v534_v32 = vmul.f32 %v530_v26, %v474_v15 }
 0x216   : > { %v477_v21 = vmul.f32 0.3275911, %v473_v19  ;;  %v529_v31 = vsub.f32 0.0, %v473_v19  ;;  %v535_v36 = vmul.f32 1.442695, %v531_v28 }
 0x217   : > { %775 = vrcp.f32 %v482_v20  ;;  %v541_v42 = vmul.f32 1.442695, %v534_v32 }
 0x218   : > { %v481_v22 = vadd.f32 1.0, %v477_v21  ;;  %v533_v39 = vmul.f32 %v529_v31, %v473_v19 }
 0x21a   : > { %777 = vrcp.f32 %v481_v22  ;;  %v539_v49 = vmul.f32 1.442695, %v533_v39 }
 0x21b   : > { %779 = vpow2.f32 %v537_v30 }
 0x21c   : > { %781 = vpow2.f32 %v535_v36  ;;  %v563_v36 = vmul.f32 0.5, %v910_v3 }
 0x21d   : > { %783 = vpow2.f32 %v541_v42 }
 0x21e   : > { %785 = vpow2.f32 %v539_v49 }
 0x220   : > { %v772_v27 = vpop.eup %771 }
 0x221   : > { %v492_v29 = vmul.f32 1.0614054, %v772_v27 }
 0x222   : > { %v774_v33 = vpop.eup %773 }
 0x223   : > { %v700_v34 = vadd.f32 -1.4531521, %v492_v29  ;;  %v491_v35 = vmul.f32 1.0614054, %v774_v33 }
 0x224   : > { %v776_v37 = vpop.eup %775 }
 0x225   : > { %v500_v38 = vmul.f32 %v772_v27, %v700_v34  ;;  %v699_v40 = vadd.f32 -1.4531521, %v491_v35  ;;  %v494_v41 = vmul.f32 1.0614054, %v776_v37 }
 0x227   : > { %v504_v43 = vadd.f32 1.4214138, %v500_v38  ;;  %v778_v44 = vpop.eup %777  ;;  %v499_v45 = vmul.f32 %v774_v33, %v699_v40  ;;  %v702_v46 = vadd.f32 -1.4531521, %v494_v41  ;;  %v564_v38 = vmul.f32 0.5, %v905_v0 }
 0x228   : > { %v493_v48 = vmul.f32 1.0614054, %v778_v44  ;;  %v780_v5 = vpop.eup %779 }
 0x229   : > { %v508_v47 = vmul.f32 %v772_v27, %v504_v43  ;;  %v503_v50 = vadd.f32 1.4214138, %v499_v45  ;;  %v502_v51 = vmul.f32 %v776_v37, %v702_v46  ;;  %v782_v17 = vpop.eup %781 }
 0x22a   : > { %v701_v53 = vadd.f32 -1.4531521, %v493_v48  ;;  %v784_v22 = vpop.eup %783 }
 0x22b   : > { %v704_v52 = vadd.f32 -0.28449672, %v508_v47  ;;  %v507_v54 = vmul.f32 %v774_v33, %v503_v50  ;;  %v506_v55 = vadd.f32 1.4214138, %v502_v51  ;;  %v786_v29 = vpop.eup %785 }
 0x22c   : > { %v501_v57 = vmul.f32 %v778_v44, %v701_v53 }
 0x22d   : > { %v516_v56 = vmul.f32 %v772_v27, %v704_v52  ;;  %v703_v58 = vadd.f32 -0.28449672, %v507_v54  ;;  %v510_v59 = vmul.f32 %v776_v37, %v506_v55 }
 0x22e   : > { %v505_v61 = vadd.f32 1.4214138, %v501_v57 }
 0x22f   : > { %v520_v60 = vadd.f32 0.2548296, %v516_v56  ;;  %v515_v62 = vmul.f32 %v774_v33, %v703_v58  ;;  %v706_v63 = vadd.f32 -0.28449672, %v510_v59 }
 0x230   : > { %v509_v4 = vmul.f32 %v778_v44, %v505_v61 }
 0x231   : > { %v524_v1 = vmul.f32 %v772_v27, %v520_v60  ;;  %v519_v8 = vadd.f32 0.2548296, %v515_v62  ;;  %v518_v9 = vmul.f32 %v776_v37, %v706_v63 }
 0x232   : > { %v705_v13 = vadd.f32 -0.28449672, %v509_v4 }
 0x233   : > { %v544_v10 = vmul.f32 %v780_v5, %v524_v1  ;;  %v523_v14 = vmul.f32 %v774_v33, %v519_v8  ;;  %v522_v15 = vadd.f32 0.2548296, %v518_v9 }
 0x234   : > { %v517_v19 = vmul.f32 %v778_v44, %v705_v13 }
 0x235   : > { %v548_v18 = vsub.f32 1.0, %v544_v10  ;;  %v543_v20 = vmul.f32 %v782_v17, %v523_v14  ;;  %v526_v21 = vmul.f32 %v776_v37, %v522_v15 }
 0x236   : > { %v521_v24 = vadd.f32 0.2548296, %v517_v19 }
 0x237   : > { %v556_v23 = vsub.f32 0.0, %v548_v18  ;;  %v547_v25 = vsub.f32 1.0, %v543_v20  ;;  %v546_v26 = vmul.f32 %v784_v22, %v526_v21 }
 0x238   : > { %v525_v28 = vmul.f32 %v778_v44, %v521_v24  ;;  %v566_v44 = vmul.f32 0.5, %v916_v7 }
 0x239   : > { %v560_v27 = vsel %vm552_vm1, %v548_v18, %v556_v23  ;;  %v555_v30 = vsub.f32 0.0, %v547_v25  ;;  %v550_v31 = vsub.f32 1.0, %v546_v26 }
 0x23a   : > { %v545_v32 = vmul.f32 %v786_v29, %v525_v28  ;;  %v568_v33 = vadd.f32 1.0, %v560_v27 }
 0x23b   : > { %v559_v34 = vsel %vm551_vm2, %v547_v25, %v555_v30  ;;  %v558_v35 = vsub.f32 0.0, %v550_v31 }
 0x23c   : > { %v567_v37 = vadd.f32 1.0, %v559_v34  ;;  %v549_v2 = vsub.f32 1.0, %v545_v32  ;;  %v572_v41 = vmul.f32 %v568_v33, %v564_v38 }
 0x23d   : > { %v562_v39 = vsel %vm554_vm3, %v550_v31, %v558_v35 }
 0x23e   : > { %v571_v40 = vmul.f32 %v567_v37, %v563_v36  ;;  %v557_v6 = vsub.f32 0.0, %v549_v2  ;;  %v570_v42 = vadd.f32 1.0, %v562_v39  ;;  %576 = vst [vmem:[%s277_s18 + $0x8] sm:$0xff] %v572_v41 }
 0x240   : > { %575 = vst [vmem:[%s277_s18] sm:$0xff] %v571_v40  ;;  %v561_v3 = vsel %vm553_vm4, %v549_v2, %v557_v6  ;;  %v574_v46 = vmul.f32 %v570_v42, %v566_v44 }
 0x241   : > { %v569_v43 = vadd.f32 1.0, %v561_v3 }
 0x242   : > { %578 = vst [vmem:[%s277_s18 + $0x18] sm:$0xff] %v574_v46 }
 0x243   : > { %v573_v45 = vmul.f32 %v569_v43, %v565_v11 }
 0x245   : > { %577 = vst [vmem:[%s277_s18 + $0x10] sm:$0xff] %v573_v45 }
 0x246 PF: > { %s15_s20 = sadd.s32 1, %s809_s20   ;;  %s957_s18 = smov %s805_s19 }
 0x247   : > { %p12_p5 = scmp.ge.s32.totalorder %s15_s20, 4   ;;  %s958_s19 = smov %s960_s21 }
 0x249   :  { %14 = sbr.rel (!%p12_p5) target bundleno = 2 (0x2), region = 76 }

// kernel: distilled_vit_forward.43
= control target key start
LH: loop header
LB: loop body
LE: loop exit
PB: predicated region body
PF: predicated region fallthrough
CT: control target
= control target key end

     0   :  { %8 = vsyncpa [#allocation3], 0  ;;  %s600_s0 = inlined_call_operand.vmem [shape: f32[64,32], index: 0, kind: input, shape index: {}]   ;;  %s601_s1 = inlined_call_operand.vmem [shape: f32[1,32], index: 1, kind: input, shape index: {}]   ;;  %s602_s2 = inlined_call_operand.vmem [shape: f32[1,32], index: 2, kind: input, shape index: {}]   ;;  %s603_s3 = inlined_call_operand.hbm [shape: f32[64,32], index: 3, kind: output, shape index: {}]  }
   0x1   :  { %10 = vsyncpa [#allocation3 + $0x1], 0  ;;  %s481_s12 = smov 0   ;;  %s483_s13 = smov 0  }
   0x2   :  { %s485_s14 = smov 0   ;;  %s487_s15 = smov 0  }
   0x3 LB: > { %s502_s16 = sadd.s32 4294967295, %s456_s15   ;;  %s332_s17 = sadd.s32 4294967294, %s456_s15   ;;  %s456_s15 = sphi %s487_s15, %s609_s15   ;;  %s452_s14 = sphi %s485_s14, %s608_s14   ;;  %s448_s13 = sphi %s483_s13, %s607_s13   ;;  %s444_s12 = sphi %s481_s12, %s606_s12  }
   0x4   : > { %s506_s18 = sadd.s32 1, %s456_s15   ;;  %s91_s19 = sadd.s32 1, %s452_s14 }
   0x5   : > { %s88_s20 = ssub.s32 %s456_s15, %s506_s18  ;;  %p101_p0 = scmp.ne.s32.totalorder %s452_s14, %s448_s13 }
   0x6   : > { %p89_p1 = scmp.eq.s32.totalorder %s88_s20, 0  ;;  %p102_p2 = scmp.eq.s32.totalorder %s502_s16, 1 }
   0x7   : > { %p107_p3 = scmp.ne.s32.totalorder %s448_s13, %s444_s12  ;;  %p108_p4 = scmp.eq.s32.totalorder %s332_s17, 1 }
   0x8   : > { %s517_s21 = scalar_select %p89_p1, %s452_s14, %s91_s19  }
   0x9   : > { %p519_p5 = por %p102_p2, %p101_p0  ;;  %p523_p6 = por %p108_p4, %p107_p3 }
   0xa   : > { %p335_p7 = scmp.ge.s32.totalorder %s456_s15, 1  ;;  %p141_p8 = scmp.lt.s32.totalorder %s456_s15, 3 }
   0xc   : > { %p142_p9 = pnand %p335_p7, %p141_p8 }
   0xd   : > { %s337_s24 = sshll.u32 (!%p142_p9), %s502_s16, 2  ;;  %s162_s29 = sand.u32 (!%p142_p9), 1, %s448_s13  }
   0xe   : > { %145 = sbr.rel (%p142_p9) target bundleno = 353 (0x161), region = 32  ;;  %p166_p10 = scmp.lt.s32.totalorder (!%p142_p9), %s337_s24, 7 }
   0xf   : > { %s336_s5 = sshll.u32 (!%p142_p9), %s162_s29, 5  ;;  %s346_s9 = sshll.u32 (!%p142_p9), %s502_s16, 9 }
  0x10   : > { %s164_s8 = scalar_lea.vmem (!%p142_p9), [#allocation2], %s336_s5  ;;  %s555_s19 = scalar_lea.hbm (!%p142_p9), %s603_s3, %s346_s9 }
  0x11   : > { %s270_s10 = sshll.u32 (!%p142_p9), %s164_s8, 4  ;;  %s560_s16 = scalar_lea.sflag (!%p142_p9), [#allocation3], %s162_s29  ;;  %s557_s10 = int_to_ptr.vmem [resolvable:$true] %s270_s10 }
  0x12   : > { %s396_s20 = scalar_lea.vmem (!%p142_p9), %s557_s10, 512 }
  0x13   : > { %s611_s24 = smov (!%p166_p10, %s337_s24), 7  ;;  %vm176_vm0 = vcmask 261120   ;;  %v339_v41 = vld [vmem:[%s601_s1] ss:$0 sm:$0xff]  ;;  %p397_p11 = scmp.ne.s32.totalorder %s557_s10, %s396_s20 }
  0x14   : > { %s338_s25 = sshll.u32 %s611_s24, 3  ;;  %v340_v43 = vld [vmem:[%s602_s2] ss:$0 sm:$0xff]  ;;  %s458_s24 = smov [#allocation2]  }
  0x15   : > { %s169_s28 = scalar_lea.vmem %s600_s0, %s338_s25  ;;  %p398_p12 = pnand %p397_p11, %p519_p5 }
  0x16   : > { %v172_v0 = vld [vmem:[%s169_s28] sm:$0xff]  ;;  %v174_v1 = vld [vmem:[%s169_s28 + $0x10] sm:$0xff]  ;;  %v173_v2 = vld [vmem:[%s169_s28 + $0x8] sm:$0xff]  ;;  %s400_s25 = sshll.u32 %s458_s24, 4  ;;  %s401_s25 = int_to_ptr.vmem [resolvable:$false] %s400_s25 }
  0x17   : > { %v177_v3 = vsel %vm176_vm0, %v172_v0, 0.0  ;;  %v183_v4 = vsel %vm176_vm0, %v174_v1, 0.0  ;;  %v175_v5 = vld [vmem:[%s169_s28 + $0x18] sm:$0xff]  ;;  %v180_v6 = vsel %vm176_vm0, %v173_v2, 0.0  ;;  %p399_p13 = pneg %p398_p12  ;;  %s402_s26 = scalar_lea.vmem %s401_s25, 1024 }
  0x18   : > { %178 = vadd.xlane.f32.xlu0 %v177_v3  ;;  %184 = vadd.xlane.f32.xlu1 %v183_v4  ;;  %v186_v7 = vsel %vm176_vm0, %v175_v5, 0.0  ;;  %p403_p0 = scmp.lt.s32.totalorder %s557_s10, %s401_s25  ;;  %p404_p1 = scmp.lt.s32.totalorder %s402_s26, %s396_s20 }
  0x1a   : > { %p405_p2 = por %p404_p1, %p403_p0 }
  0x1c   : > { %181 = vadd.xlane.f32.xlu0 %v180_v6  ;;  %187 = vadd.xlane.f32.xlu1 %v186_v7  ;;  %p406_p3 = pnand %p405_p2, %p399_p13 }
  0xa1   : > { %v179_v8 = vpop.xlane.xlu0 %178  ;;  %v185_v9 = vpop.xlane.xlu1 %184 }
  0xa2   : > { %v190_v10 = vmul.f32 0.03125, %v179_v8  ;;  %v192_v11 = vmul.f32 0.03125, %v185_v9 }
  0xa4   : > { %v194_v12 = vsub.f32 %v172_v0, %v190_v10  ;;  %v196_v13 = vsub.f32 %v174_v1, %v192_v11 }
  0xa5   : > { %v182_v14 = vpop.xlane.xlu0 %181  ;;  %v188_v15 = vpop.xlane.xlu1 %187 }
  0xa6   : > { %v191_v16 = vmul.f32 0.03125, %v182_v14  ;;  %v193_v17 = vmul.f32 0.03125, %v188_v15  ;;  %v198_v18 = vmul.f32 %v194_v12, %v194_v12  ;;  %v200_v19 = vmul.f32 %v196_v13, %v196_v13 }
  0xa8   : > { %v195_v20 = vsub.f32 %v173_v2, %v191_v16  ;;  %v197_v21 = vsub.f32 %v175_v5, %v193_v17  ;;  %v202_v22 = vsel %vm176_vm0, %v198_v18, 0.0  ;;  %v208_v23 = vsel %vm176_vm0, %v200_v19, 0.0 }
  0xa9   : > { %203 = vadd.xlane.f32.xlu0 %v202_v22 }
  0xaa   : > { %v199_v24 = vmul.f32 %v195_v20, %v195_v20  ;;  %v201_v25 = vmul.f32 %v197_v21, %v197_v21 }
  0xac   : > { %v205_v26 = vsel %vm176_vm0, %v199_v24, 0.0  ;;  %v211_v27 = vsel %vm176_vm0, %v201_v25, 0.0 }
  0xad   : > { %209 = vadd.xlane.f32.xlu0 %v208_v23  ;;  %206 = vadd.xlane.f32.xlu1 %v205_v26 }
  0xb1   : > { %212 = vadd.xlane.f32.xlu1 %v211_v27 }
 0x132   : > { %v204_v28 = vpop.xlane.xlu0 %203 }
 0x133   : > { %v214_v29 = vmul.f32 0.03125, %v204_v28 }
 0x135   : > { %v218_v30 = vadd.f32 1e-06, %v214_v29 }
 0x136   : > { %v207_v31 = vpop.xlane.xlu1 %206  ;;  %v210_v32 = vpop.xlane.xlu0 %209 }
 0x137   : > { %388 = vrsqrt.f32 %v218_v30  ;;  %v215_v33 = vmul.f32 0.03125, %v207_v31  ;;  %v216_v34 = vmul.f32 0.03125, %v210_v32 }
 0x139   : > { %v219_v35 = vadd.f32 1e-06, %v215_v33  ;;  %v220_v36 = vadd.f32 1e-06, %v216_v34 }
 0x13a   : > { %v213_v37 = vpop.xlane.xlu1 %212 }
 0x13b   : > { %390 = vrsqrt.f32 %v219_v35  ;;  %v217_v38 = vmul.f32 0.03125, %v213_v37 }
 0x13c   : > { %392 = vrsqrt.f32 %v220_v36 }
 0x13d   : > { %v221_v39 = vadd.f32 1e-06, %v217_v38 }
 0x13f   : > { %394 = vrsqrt.f32 %v221_v39 }
 0x144   : > { %v389_v40 = vpop.eup %388 }
 0x145   : > { %v226_v42 = vmul.f32 %v389_v40, %v194_v12 }
 0x147   : > { %v237_v44 = vmul.f32 %v339_v41, %v226_v42 }
 0x148   : > { %v391_v45 = vpop.eup %390 }
 0x149   : > { %v393_v46 = vpop.eup %392  ;;  %v248_v47 = vadd.f32 %v340_v43, %v237_v44  ;;  %v227_v48 = vmul.f32 %v391_v45, %v195_v20 }
 0x14a   : > { %v228_v49 = vmul.f32 %v393_v46, %v196_v13 }
 0x14b   : > { %v238_v50 = vmul.f32 %v339_v41, %v227_v48  ;;  %252 = vst.msk [vmem:[%s164_s8] sm:$0xff] %vm176_vm0, %v248_v47 }
 0x14c   : > { %v395_v51 = vpop.eup %394  ;;  %v239_v52 = vmul.f32 %v339_v41, %v228_v49 }
 0x14d   : > { %v249_v53 = vadd.f32 %v340_v43, %v238_v50  ;;  %v229_v54 = vmul.f32 %v395_v51, %v197_v21 }
 0x14e   : > { %v250_v55 = vadd.f32 %v340_v43, %v239_v52 }
 0x14f   : > { %v240_v56 = vmul.f32 %v339_v41, %v229_v54  ;;  %253 = vst.msk [vmem:[%s164_s8 + $0x8] sm:$0xff] %vm176_vm0, %v249_v53 }
 0x150   : > { %254 = vst.msk [vmem:[%s164_s8 + $0x10] sm:$0xff] %vm176_vm0, %v250_v55 }
 0x151   : > { %v251_v57 = vadd.f32 %v340_v43, %v240_v56 }
 0x153   : > { %255 = vst.msk [vmem:[%s164_s8 + $0x18] sm:$0xff] %vm176_vm0, %v251_v57 }
 0x154   : > { %409 = shalt.err (!%p406_p3)
}
 0x155   : > { %s410_s27 = scalar_lea.hbm %s555_s19, 512  ;;  %s414_s30 = scalar_lea.hbm %s603_s3, 1024 }
 0x156   : > { %p411_p4 = scmp.ne.s32.totalorder %s555_s19, %s410_s27  ;;  %p415_p9 = scmp.lt.s32.totalorder %s555_s19, %s603_s3 }
 0x157   : > { %p416_p10 = scmp.lt.s32.totalorder %s414_s30, %s410_s27 }
 0x158   : > { %p412_p7 = pnand %p411_p4, %p519_p5 }
 0x159   : > { %p417_p11 = por %p416_p10, %p415_p9 }
 0x15a   : > { %p413_p8 = pneg %p412_p7 }
 0x15c   : > { %p418_p12 = pnand %p417_p11, %p413_p8 }
 0x15e   : > { %421 = shalt.err (!%p418_p12)
}
 0x15f   : > { %s459_s6 = smov 128   ;;  %s460_s7 = smov 8  }
 0x160   : > { %347 = dma.vmem_to_hbm [thread:$0]  (%p519_p5), %s557_s10, 512, %s555_s19, %s560_s16, %s459_s6, %s459_s6, %s460_s7  }
 0x161 PF: > { %p353_p13 = scmp.ge.s32.totalorder %s456_s15, 2  ;;  %s285_s8 = sand.u32 1, %s444_s12  }
 0x162   : > { %s286_s9 = scalar_lea.sflag [#allocation3], %s285_s8 }
 0x163   : > { %p350_p0 = pnand %p353_p13, %p523_p6 }
 0x165   : > { %p351_p1 = pneg %p350_p0 }
 0x167   : > { %439 = dma.done.wait (%p351_p1), %s286_s9, 512  }
 0x168   : > { %441 = vsyncadd (%p351_p1), %s286_s9, 4294966784  ;;  %p13_p2 = scmp.ge.s32.totalorder %s506_s18, 4   ;;  %s606_s12 = smov %s448_s13 }
 0x169   : > { %s607_s13 = smov %s452_s14  ;;  %s608_s14 = smov %s517_s21 }
 0x16a   : > { %s609_s15 = smov %s506_s18  ;;  %15 = sbr.rel (!%p13_p2) target bundleno = 3 (0x3), region = 67 }
 0x16f   :  { %291 = vsyncpa [#allocation3], 1 }
 0x170   :  { %293 = vsyncpa [#allocation3 + $0x1], 1 }

// kernel: distilled_vit_forward.29
= control target key start
LH: loop header
LB: loop body
LE: loop exit
PB: predicated region body
PF: predicated region fallthrough
CT: control target
= control target key end

     0   :  { %s3297_s6 = smov 0   ;;  %s3639_s0 = inlined_call_operand.vmem [shape: f32[8,8,96], index: 0, kind: input, shape index: {}]   ;;  %s3640_s1 = inlined_call_operand.vmem [shape: f32[8,8,32], index: 1, kind: output, shape index: {}]  }
   0x1 LB: > { %s2892_s7 = sadd.s32 4294967295, %s3269_s6   ;;  %p2896_p0 = scmp.ge.s32.totalorder %s3269_s6, 1  ;;  %s3269_s6 = sphi %s3297_s6, %s11_s6  }
   0x2   : > { %p88_p1 = scmp.lt.s32.totalorder %s3269_s6, 3 }
   0x4   : > { %p89_p2 = pnand %p2896_p0, %p88_p1 }
   0x5   : > { %s2897_s8 = sshll.u32 (!%p89_p2), %s2892_s7, 2  ;;  %s3273_s13 = smov (!%p89_p2), 96  }
   0x6   : > { %92 = sbr.rel (%p89_p2) target bundleno = 2497 (0x9c1), region = 24  ;;  %p109_p3 = scmp.lt.s32.totalorder (!%p89_p2), %s2897_s8, 7 }
   0x7   : > { %s3274_s14 = smov (!%p89_p2), 64   ;;  %s3275_s15 = smov (!%p89_p2), 88  }
   0x8   : > { %s3276_s16 = smov (!%p89_p2), 120   ;;  %s3277_s17 = smov (!%p89_p2), 56  }
   0x9   : > { %s3278_s18 = smov (!%p89_p2), 80   ;;  %s3279_s19 = smov (!%p89_p2), 112  }
   0xa   : > { %s3280_s20 = smov (!%p89_p2), 48   ;;  %s3281_s21 = smov (!%p89_p2), 72  }
   0xb   : > { %v3271_v0 = vmov 0.0   ;;  %vm3272_vm0 = vmmov 0   ;;  %s3642_s8 = smov (!%p109_p3, %s2897_s8), 7  ;;  %vm131_vm1 = vcmask 64512   ;;  %s3282_s22 = smov 104   ;;  %vm2821_vm2 = vcmask 130048  }
   0xc   : > { %3015 = vmatprep.subr.mxu0 %v3271_v0  ;;  %3017 = vmatprep.mubr.msk.f32.mxu0 %vm3272_vm0, %v3271_v0  ;;  %s2898_s9 = sshll.u32 %s3642_s8, 3  ;;  %s3283_s23 = smov 40   ;;  %vm2826_vm3 = vcmask 195584   ;;  %vm2831_vm4 = vcmask 261120  }
   0xd   : > { %3020 = vmatprep.subr.mxu1 %v3271_v0  ;;  %3022 = vmatprep.mubr.msk.f32.mxu1 %vm3272_vm0, %v3271_v0  ;;  %s112_s12 = scalar_lea.vmem %s3639_s0, %s2898_s9  ;;  %s3284_s24 = smov 8  }
   0xe   : > { %v3319_v1 = vld [vmem:[%s112_s12] sm:$0xff]  ;;  %v3321_v2 = vld [vmem:[%s112_s12 + $0x10] sm:$0xff]  ;;  %v3325_v3 = vld [vmem:[%s112_s12 + $0x8] sm:$0xff]  ;;  %s3285_s25 = smov 16   ;;  %s3286_s26 = smov 24  }
   0xf   : > { %129 = vrot.lane.b32.xlu0 %v3319_v1, %s3273_s13  ;;  %286 = vrot.lane.b32.xlu1 %v3321_v2, %s3273_s13  ;;  %v3327_v4 = vld [vmem:[%s112_s12 + $0x18] sm:$0xff]  ;;  %v3332_v7 = vmul.f32 0.35355338, %v3319_v1  ;;  %v3339_v9 = vmul.f32 0.35355338, %v3325_v3  ;;  %s118_s29 = scalar_lea.vmem %s3640_s1, %s2898_s9 }
  0x10   : > { %v3342_v10 = vmul.f32 0.35355338, %v3321_v2  ;;  %v3355_v12 = vmul.f32 0.35355338, %v3327_v4 }
  0x13   : > { %208 = vrot.lane.b32.xlu0 %v3325_v3, %s3273_s13  ;;  %364 = vrot.lane.b32.xlu1 %v3327_v4, %s3273_s13 }
  0x81   : > { %v130_v5 = vpop.permute.xlu0 %129  ;;  %v287_v6 = vpop.permute.xlu1 %286 }
  0x82   : > { %3016 = vmatpush3.xpose.msk.msra.mxu0 %vm131_vm1, %v130_v5 }
  0x83   : > { %3025 = vmatprep.subr.mxu0 %v3271_v0 }
  0x85   : > { %v209_v8 = vpop.permute.xlu0 %208  ;;  %3018 = vmatmul.mubr.msk.f32.vlgmr.msra.gmra.mxu0 %vm131_vm1, %v3332_v7  ;;  %v365_v11 = vpop.permute.xlu1 %364 }
  0x86   : > { %3021 = vmatpush3.xpose.msk.msra.mxu1 %vm131_vm1, %v209_v8  ;;  %3026 = vmatpush3.xpose.msk.msra.mxu0 %vm131_vm1, %v287_v6 }
  0x87   : > { %3027 = vmatprep.mubr.msk.f32.mxu0 %vm3272_vm0, %v3271_v0  ;;  %3030 = vmatprep.subr.mxu1 %v3271_v0 }
  0x88   : > { %3035 = vmatprep.subr.mxu0 %v3271_v0 }
  0x89   : > { %3023 = vmatmul.mubr.msk.f32.vlgmr.msra.gmra.mxu1 %vm131_vm1, %v3339_v9  ;;  %3028 = vmatmul.mubr.msk.f32.vlgmr.msra.gmra.mxu0 %vm131_vm1, %v3342_v10 }
  0x8a   : > { %3031 = vmatpush3.xpose.msk.msra.mxu1 %vm131_vm1, %v365_v11  ;;  %3032 = vmatprep.mubr.msk.f32.mxu1 %vm3272_vm0, %v3271_v0 }
  0x8b   : > { %3040 = vmatprep.subr.mxu1 %v3271_v0  ;;  %3037 = vmatprep.mubr.msk.f32.mxu0 %vm3272_vm0, %v3271_v0 }
  0x8d   : > { %3033 = vmatmul.mubr.msk.f32.vlgmr.msra.gmra.mxu1 %vm131_vm1, %v3355_v12 }
  0x8e   : > { %3042 = vmatprep.mubr.msk.f32.mxu1 %vm3272_vm0, %v3271_v0 }
 0x145   : > { %v203_v13 = vpop.f32.mrf.mxu0 }
 0x146   : > { %v441_v14 = vsel %vm131_vm1, %v203_v13, -inf }
 0x147   : > { %442 = vmax.xlane.f32.xlu0 %v441_v14  ;;  %v3019_v15 = vpop.f32.mrf.mxu0 }
 0x149   : > { %v281_v16 = vpop.f32.mrf.mxu1  ;;  %v359_v17 = vpop.f32.mrf.mxu0 }
 0x14a   : > { %v444_v18 = vsel %vm131_vm1, %v281_v16, -inf  ;;  %v447_v19 = vsel %vm131_vm1, %v359_v17, -inf }
 0x14b   : > { %445 = vmax.xlane.f32.xlu1 %v444_v18  ;;  %v3024_v20 = vpop.f32.mrf.mxu1  ;;  %448 = vmax.xlane.f32.xlu0 %v447_v19  ;;  %v3029_v21 = vpop.f32.mrf.mxu0 }
 0x14d   : > { %v437_v22 = vpop.f32.mrf.mxu1 }
 0x14e   : > { %v450_v23 = vsel %vm131_vm1, %v437_v22, -inf }
 0x14f   : > { %v3034_v24 = vpop.f32.mrf.mxu1  ;;  %451 = vmax.xlane.f32.xlu0 %v450_v23 }
 0x15c   : > { %485 = vrot.lane.b32.xlu1 %v3319_v1, %s3274_s14 }
 0x160   : > { %637 = vrot.lane.b32.xlu1 %v3321_v2, %s3274_s14 }
 0x164   : > { %713 = vrot.lane.b32.xlu1 %v3327_v4, %s3274_s14 }
 0x165   : > { %561 = vrot.lane.b32.xlu0 %v3325_v3, %s3274_s14 }
 0x168   : > { %869 = vrot.lane.b32.xlu1 %v3325_v3, %s3275_s15 }
 0x169   : > { %791 = vrot.lane.b32.xlu0 %v3319_v1, %s3275_s15 }
 0x16c   : > { %867 = vrot.lane.b32.xlu1 %v3339_v9, %s3276_s16 }
 0x16d   : > { %789 = vrot.lane.b32.xlu0 %v3332_v7, %s3276_s16 }
 0x1d0   : > { %v443_v25 = vpop.xlane.xlu0 %442 }
 0x1d1   : > { %v453_v26 = vsub.f32 %v203_v13, %v443_v25 }
 0x1d3   : > { %v457_v27 = vmul.f32 1.442695, %v453_v26 }
 0x1d4   : > { %v446_v28 = vpop.xlane.xlu1 %445  ;;  %v449_v29 = vpop.xlane.xlu0 %448 }
 0x1d5   : > { %3199 = vpow2.f32 %v457_v27  ;;  %v454_v30 = vsub.f32 %v281_v16, %v446_v28  ;;  %v455_v31 = vsub.f32 %v359_v17, %v449_v29 }
 0x1d7   : > { %v459_v32 = vmul.f32 1.442695, %v454_v30  ;;  %v461_v33 = vmul.f32 1.442695, %v455_v31 }
 0x1d8   : > { %v452_v34 = vpop.xlane.xlu0 %451  ;;  %v486_v35 = vpop.permute.xlu1 %485 }
 0x1d9   : > { %3201 = vpow2.f32 %v459_v32  ;;  %v456_v36 = vsub.f32 %v437_v22, %v452_v34  ;;  %3036 = vmatpush3.msra.mxu0 %v486_v35 }
 0x1da   : > { %3203 = vpow2.f32 %v461_v33  ;;  %3045 = vmatprep.subr.mxu0 %v3271_v0 }
 0x1db   : > { %v463_v37 = vmul.f32 1.442695, %v456_v36 }
 0x1dc   : > { %v562_v38 = vpop.permute.xlu0 %561  ;;  %v638_v47 = vpop.permute.xlu1 %637 }
 0x1dd   : > { %3205 = vpow2.f32 %v463_v37  ;;  %3041 = vmatpush3.msra.mxu1 %v562_v38 }
 0x1de   : > { %3050 = vmatprep.subr.mxu1 %v3271_v0 }
 0x1e0   : > { %v714_v48 = vpop.permute.xlu1 %713  ;;  %v792_v50 = vpop.permute.xlu0 %791 }
 0x1e2   : > { %v3200_v39 = vpop.eup %3199 }
 0x1e3   : > { %v465_v40 = vsel %vm131_vm1, %v3200_v39, 0.0 }
 0x1e4   : > { %466 = vadd.xlane.f32.xlu1 %v465_v40  ;;  %v870_v49 = vpop.permute.xlu1 %869  ;;  %v790_v52 = vpop.permute.xlu0 %789 }
 0x1e6   : > { %v3202_v41 = vpop.eup %3201 }
 0x1e7   : > { %v3204_v42 = vpop.eup %3203  ;;  %v468_v43 = vsel %vm131_vm1, %v3202_v41, 0.0 }
 0x1e8   : > { %469 = vadd.xlane.f32.xlu0 %v468_v43  ;;  %v471_v44 = vsel %vm131_vm1, %v3204_v42, 0.0  ;;  %v868_v51 = vpop.permute.xlu1 %867 }
 0x1e9   : > { %472 = vadd.xlane.f32.xlu1 %v471_v44 }
 0x1ea   : > { %v3206_v45 = vpop.eup %3205 }
 0x1eb   : > { %v474_v46 = vsel %vm131_vm1, %v3206_v45, 0.0 }
 0x1ec   : > { %475 = vadd.xlane.f32.xlu0 %v474_v46 }
 0x1fa   : > { %1025 = vrot.lane.b32.xlu1 %v3327_v4, %s3275_s15 }
 0x1fe   : > { %1023 = vrot.lane.b32.xlu1 %v3355_v12, %s3276_s16 }
 0x202   : > { %947 = vrot.lane.b32.xlu0 %v3321_v2, %s3275_s15 }
 0x206   : > { %945 = vrot.lane.b32.xlu0 %v3342_v10, %s3276_s16 }
 0x26d   : > { %v467_v53 = vpop.xlane.xlu1 %466 }
 0x26e   : > { %3207 = vrcp.f32 %v467_v53 }
 0x271   : > { %v470_v54 = vpop.xlane.xlu0 %469 }
 0x272   : > { %v473_v55 = vpop.xlane.xlu1 %472  ;;  %3209 = vrcp.f32 %v470_v54 }
 0x273   : > { %3211 = vrcp.f32 %v473_v55 }
 0x275   : > { %v476_v56 = vpop.xlane.xlu0 %475 }
 0x276   : > { %3213 = vrcp.f32 %v476_v56  ;;  %v1026_v8 = vpop.permute.xlu1 %1025 }
 0x279   : > { %v948_v63 = vpop.permute.xlu0 %947 }
 0x27a   : > { %v1024_v13 = vpop.permute.xlu1 %1023 }
 0x27b   : > { %v3208_v57 = vpop.eup %3207 }
 0x27c   : > { %v481_v58 = vmul.f32 %v3208_v57, %v3200_v39 }
 0x27d   : > { %v946_v11 = vpop.permute.xlu0 %945 }
 0x27e   : > { %3038 = vmatmul.mubr.msk.f32.vlgmr.msra.gmra.mxu0 %vm131_vm1, %v481_v58 }
 0x27f   : > { %v3210_v59 = vpop.eup %3209  ;;  %3046 = vmatpush3.msra.mxu0 %v638_v47  ;;  %3047 = vmatprep.mubr.msk.f32.mxu0 %vm3272_vm0, %v3271_v0 }
 0x280   : > { %v3212_v60 = vpop.eup %3211  ;;  %3055 = vmatprep.subr.mxu0 %v3271_v0  ;;  %v482_v61 = vmul.f32 %v3210_v59, %v3202_v41 }
 0x281   : > { %v483_v62 = vmul.f32 %v3212_v60, %v3204_v42 }
 0x282   : > { %3043 = vmatmul.mubr.msk.f32.vlgmr.msra.gmra.mxu1 %vm131_vm1, %v482_v61 }
 0x283   : > { %v3214_v5 = vpop.eup %3213  ;;  %3048 = vmatmul.mubr.msk.f32.vlgmr.msra.gmra.mxu0 %vm131_vm1, %v483_v62  ;;  %3051 = vmatpush3.msra.mxu1 %v714_v48 }
 0x284   : > { %3056 = vmatpush3.xpose.msk.msra.mxu0 %vm131_vm1, %v792_v50  ;;  %3052 = vmatprep.mubr.msk.f32.mxu1 %vm3272_vm0, %v3271_v0  ;;  %v484_v6 = vmul.f32 %v3214_v5, %v3206_v45 }
 0x285   : > { %3057 = vmatprep.mubr.msk.f32.mxu0 %vm3272_vm0, %v3271_v0  ;;  %3060 = vmatprep.subr.mxu1 %v3271_v0 }
 0x286   : > { %3053 = vmatmul.mubr.msk.f32.vlgmr.msra.gmra.mxu1 %vm131_vm1, %v484_v6  ;;  %3065 = vmatprep.subr.mxu0 %v3271_v0 }
 0x287   : > { %3058 = vmatmul.mubr.msk.f32.vlgmr.msra.gmra.mxu0 %vm131_vm1, %v790_v52  ;;  %3061 = vmatpush3.xpose.msk.msra.mxu1 %vm131_vm1, %v870_v49 }
 0x288   : > { %3066 = vmatpush3.xpose.msk.msra.mxu0 %vm131_vm1, %v948_v63  ;;  %3062 = vmatprep.mubr.msk.f32.mxu1 %vm3272_vm0, %v3271_v0 }
 0x289   : > { %3067 = vmatprep.mubr.msk.f32.mxu0 %vm3272_vm0, %v3271_v0  ;;  %3070 = vmatprep.subr.mxu1 %v3271_v0 }
 0x28a   : > { %3063 = vmatmul.mubr.msk.f32.vlgmr.msra.gmra.mxu1 %vm131_vm1, %v868_v51  ;;  %3075 = vmatprep.subr.mxu0 %v3271_v0 }
 0x28b   : > { %3068 = vmatmul.mubr.msk.f32.vlgmr.msra.gmra.mxu0 %vm131_vm1, %v946_v11  ;;  %3071 = vmatpush3.xpose.msk.msra.mxu1 %vm131_vm1, %v1026_v8 }
 0x28c   : > { %3072 = vmatprep.mubr.msk.f32.mxu1 %vm3272_vm0, %v3271_v0  ;;  %3080 = vmatprep.subr.mxu1 %v3271_v0 }
 0x28d   : > { %3077 = vmatprep.mubr.msk.f32.mxu0 %vm3272_vm0, %v3271_v0 }
 0x28e   : > { %3073 = vmatmul.mubr.msk.f32.vlgmr.msra.gmra.mxu1 %vm131_vm1, %v1024_v13 }
 0x28f   : > { %3082 = vmatprep.mubr.msk.f32.mxu1 %vm3272_vm0, %v3271_v0 }
 0x33e   : > { %v3431_v14 = vpop.f32.mrf.mxu0 }
 0x340   : > { %v3039_v15 = vpop.f32.mrf.mxu0 }
 0x342   : > { %v3433_v16 = vpop.f32.mrf.mxu1 }
 0x343   : > { %v3435_v17 = vpop.f32.mrf.mxu0 }
 0x344   : > { %v3044_v18 = vpop.f32.mrf.mxu1 }
 0x345   : > { %v3049_v19 = vpop.f32.mrf.mxu0 }
 0x346   : > { %v3437_v20 = vpop.f32.mrf.mxu1 }
 0x347   : > { %v863_v21 = vpop.f32.mrf.mxu0 }
 0x348   : > { %v3054_v22 = vpop.f32.mrf.mxu1  ;;  %v1101_v23 = vsel %vm131_vm1, %v863_v21, -inf }
 0x349   : > { %1102 = vmax.xlane.f32.xlu0 %v1101_v23  ;;  %v3059_v24 = vpop.f32.mrf.mxu0 }
 0x34a   : > { %v941_v25 = vpop.f32.mrf.mxu1 }
 0x34b   : > { %v1019_v26 = vpop.f32.mrf.mxu0  ;;  %v1104_v27 = vsel %vm131_vm1, %v941_v25, -inf }
 0x34c   : > { %1105 = vmax.xlane.f32.xlu1 %v1104_v27  ;;  %v3064_v28 = vpop.f32.mrf.mxu1  ;;  %v1107_v29 = vsel %vm131_vm1, %v1019_v26, -inf }
 0x34d   : > { %1108 = vmax.xlane.f32.xlu0 %v1107_v29  ;;  %v3069_v30 = vpop.f32.mrf.mxu0 }
 0x34e   : > { %v1097_v31 = vpop.f32.mrf.mxu1 }
 0x34f   : > { %v1110_v32 = vsel %vm131_vm1, %v1097_v31, -inf }
 0x350   : > { %v3074_v33 = vpop.f32.mrf.mxu1 }
 0x351   : > { %1111 = vmax.xlane.f32.xlu0 %v1110_v32 }
 0x35d   : > { %1145 = vrot.lane.b32.xlu1 %v3319_v1, %s3277_s17 }
 0x361   : > { %1297 = vrot.lane.b32.xlu1 %v3321_v2, %s3277_s17 }
 0x365   : > { %1373 = vrot.lane.b32.xlu1 %v3327_v4, %s3277_s17 }
 0x367   : > { %1221 = vrot.lane.b32.xlu0 %v3325_v3, %s3277_s17 }
 0x369   : > { %1529 = vrot.lane.b32.xlu1 %v3325_v3, %s3278_s18 }
 0x36b   : > { %1451 = vrot.lane.b32.xlu0 %v3319_v1, %s3278_s18 }
 0x36d   : > { %1527 = vrot.lane.b32.xlu1 %v3339_v9, %s3279_s19 }
 0x36f   : > { %1449 = vrot.lane.b32.xlu0 %v3332_v7, %s3279_s19 }
 0x3d2   : > { %v1103_v34 = vpop.xlane.xlu0 %1102 }
 0x3d3   : > { %v1113_v35 = vsub.f32 %v863_v21, %v1103_v34 }
 0x3d5   : > { %v1117_v36 = vmul.f32 1.442695, %v1113_v35  ;;  %v1106_v37 = vpop.xlane.xlu1 %1105 }
 0x3d6   : > { %v1114_v38 = vsub.f32 %v941_v25, %v1106_v37  ;;  %v1109_v39 = vpop.xlane.xlu0 %1108 }
 0x3d7   : > { %3215 = vpow2.f32 %v1117_v36  ;;  %v1115_v40 = vsub.f32 %v1019_v26, %v1109_v39 }
 0x3d8   : > { %v1119_v41 = vmul.f32 1.442695, %v1114_v38 }
 0x3d9   : > { %v1121_v42 = vmul.f32 1.442695, %v1115_v40  ;;  %v1146_v43 = vpop.permute.xlu1 %1145 }
 0x3da   : > { %3217 = vpow2.f32 %v1119_v41  ;;  %v1112_v44 = vpop.xlane.xlu0 %1111  ;;  %3076 = vmatpush3.msra.mxu0 %v1146_v43 }
 0x3db   : > { %3219 = vpow2.f32 %v1121_v42  ;;  %v1116_v45 = vsub.f32 %v1097_v31, %v1112_v44  ;;  %3085 = vmatprep.subr.mxu0 %v3271_v0 }
 0x3dd   : > { %v1123_v46 = vmul.f32 1.442695, %v1116_v45  ;;  %v1298_v56 = vpop.permute.xlu1 %1297 }
 0x3de   : > { %v1222_v47 = vpop.permute.xlu0 %1221 }
 0x3df   : > { %3221 = vpow2.f32 %v1123_v46  ;;  %3081 = vmatpush3.msra.mxu1 %v1222_v47 }
 0x3e0   : > { %3090 = vmatprep.subr.mxu1 %v3271_v0 }
 0x3e1   : > { %v1374_v57 = vpop.permute.xlu1 %1373 }
 0x3e2   : > { %v1452_v59 = vpop.permute.xlu0 %1451 }
 0x3e4   : > { %v3216_v48 = vpop.eup %3215 }
 0x3e5   : > { %v1125_v49 = vsel %vm131_vm1, %v3216_v48, 0.0  ;;  %v1530_v58 = vpop.permute.xlu1 %1529 }
 0x3e6   : > { %1126 = vadd.xlane.f32.xlu1 %v1125_v49  ;;  %v1450_v61 = vpop.permute.xlu0 %1449 }
 0x3e7   : > { %v3218_v50 = vpop.eup %3217 }
 0x3e8   : > { %v3220_v51 = vpop.eup %3219  ;;  %v1128_v52 = vsel %vm131_vm1, %v3218_v50, 0.0 }
 0x3e9   : > { %1129 = vadd.xlane.f32.xlu0 %v1128_v52  ;;  %v1131_v53 = vsel %vm131_vm1, %v3220_v51, 0.0  ;;  %v1528_v60 = vpop.permute.xlu1 %1527 }
 0x3ea   : > { %1132 = vadd.xlane.f32.xlu1 %v1131_v53 }
 0x3ec   : > { %v3222_v54 = vpop.eup %3221 }
 0x3ed   : > { %v1134_v55 = vsel %vm131_vm1, %v3222_v54, 0.0 }
 0x3ee   : > { %1135 = vadd.xlane.f32.xlu0 %v1134_v55 }
 0x3fb   : > { %1685 = vrot.lane.b32.xlu1 %v3327_v4, %s3278_s18 }
 0x3ff   : > { %1683 = vrot.lane.b32.xlu1 %v3355_v12, %s3279_s19 }
 0x404   : > { %1607 = vrot.lane.b32.xlu0 %v3321_v2, %s3278_s18 }
 0x408   : > { %1605 = vrot.lane.b32.xlu0 %v3342_v10, %s3279_s19 }
 0x46f   : > { %v1127_v62 = vpop.xlane.xlu1 %1126 }
 0x470   : > { %3223 = vrcp.f32 %v1127_v62 }
 0x472   : > { %v1130_v63 = vpop.xlane.xlu0 %1129 }
 0x473   : > { %v1133_v5 = vpop.xlane.xlu1 %1132  ;;  %3225 = vrcp.f32 %v1130_v63 }
 0x474   : > { %3227 = vrcp.f32 %v1133_v5 }
 0x477   : > { %v1136_v6 = vpop.xlane.xlu0 %1135  ;;  %v1686_v24 = vpop.permute.xlu1 %1685 }
 0x478   : > { %3229 = vrcp.f32 %v1136_v6 }
 0x47b   : > { %v1608_v21 = vpop.permute.xlu0 %1607  ;;  %v1684_v26 = vpop.permute.xlu1 %1683 }
 0x47d   : > { %v3224_v8 = vpop.eup %3223 }
 0x47e   : > { %v1141_v11 = vmul.f32 %v3224_v8, %v3216_v48 }
 0x47f   : > { %v1606_v25 = vpop.permute.xlu0 %1605 }
 0x480   : > { %v3226_v13 = vpop.eup %3225  ;;  %3078 = vmatmul.mubr.msk.f32.vlgmr.msra.gmra.mxu0 %vm131_vm1, %v1141_v11 }
 0x481   : > { %v3228_v15 = vpop.eup %3227  ;;  %3086 = vmatpush3.msra.mxu0 %v1298_v56  ;;  %3087 = vmatprep.mubr.msk.f32.mxu0 %vm3272_vm0, %v3271_v0  ;;  %v1142_v18 = vmul.f32 %v3226_v13, %v3218_v50 }
 0x482   : > { %3095 = vmatprep.subr.mxu0 %v3271_v0  ;;  %v1143_v19 = vmul.f32 %v3228_v15, %v3220_v51 }
 0x483   : > { %3083 = vmatmul.mubr.msk.f32.vlgmr.msra.gmra.mxu1 %vm131_vm1, %v1142_v18 }
 0x484   : > { %3088 = vmatmul.mubr.msk.f32.vlgmr.msra.gmra.mxu0 %vm131_vm1, %v1143_v19  ;;  %3091 = vmatpush3.msra.mxu1 %v1374_v57 }
 0x485   : > { %v3230_v22 = vpop.eup %3229  ;;  %3096 = vmatpush3.xpose.msk.msra.mxu0 %vm131_vm1, %v1452_v59  ;;  %3092 = vmatprep.mubr.msk.f32.mxu1 %vm3272_vm0, %v3271_v0 }
 0x486   : > { %3097 = vmatprep.mubr.msk.f32.mxu0 %vm3272_vm0, %v3271_v0  ;;  %3100 = vmatprep.subr.mxu1 %v3271_v0  ;;  %v1144_v23 = vmul.f32 %v3230_v22, %v3222_v54 }
 0x487   : > { %3105 = vmatprep.subr.mxu0 %v3271_v0 }
 0x488   : > { %3093 = vmatmul.mubr.msk.f32.vlgmr.msra.gmra.mxu1 %vm131_vm1, %v1144_v23  ;;  %3098 = vmatmul.mubr.msk.f32.vlgmr.msra.gmra.mxu0 %vm131_vm1, %v1450_v61 }
 0x489   : > { %3101 = vmatpush3.xpose.msk.msra.mxu1 %vm131_vm1, %v1530_v58  ;;  %3106 = vmatpush3.xpose.msk.msra.mxu0 %vm131_vm1, %v1608_v21 }
 0x48a   : > { %3102 = vmatprep.mubr.msk.f32.mxu1 %vm3272_vm0, %v3271_v0  ;;  %3107 = vmatprep.mubr.msk.f32.mxu0 %vm3272_vm0, %v3271_v0 }
 0x48b   : > { %3110 = vmatprep.subr.mxu1 %v3271_v0  ;;  %3115 = vmatprep.subr.mxu0 %v3271_v0 }
 0x48c   : > { %3103 = vmatmul.mubr.msk.f32.vlgmr.msra.gmra.mxu1 %vm131_vm1, %v1528_v60  ;;  %3108 = vmatmul.mubr.msk.f32.vlgmr.msra.gmra.mxu0 %vm131_vm1, %v1606_v25 }
 0x48d   : > { %3111 = vmatpush3.xpose.msk.msra.mxu1 %vm131_vm1, %v1686_v24  ;;  %3112 = vmatprep.mubr.msk.f32.mxu1 %vm3272_vm0, %v3271_v0 }
 0x48e   : > { %3120 = vmatprep.subr.mxu1 %v3271_v0  ;;  %3117 = vmatprep.mubr.msk.f32.mxu0 %vm3272_vm0, %v3271_v0 }
 0x490   : > { %3113 = vmatmul.mubr.msk.f32.vlgmr.msra.gmra.mxu1 %vm131_vm1, %v1684_v26 }
 0x491   : > { %3122 = vmatprep.mubr.msk.f32.mxu1 %vm3272_vm0, %v3271_v0 }
 0x540   : > { %v3503_v27 = vpop.f32.mrf.mxu0 }
 0x542   : > { %v3079_v28 = vpop.f32.mrf.mxu0 }
 0x543   : > { %v3505_v29 = vpop.f32.mrf.mxu1 }
 0x544   : > { %v3507_v30 = vpop.f32.mrf.mxu0 }
 0x545   : > { %v3084_v31 = vpop.f32.mrf.mxu1 }
 0x546   : > { %v3089_v32 = vpop.f32.mrf.mxu0 }
 0x548   : > { %v3509_v33 = vpop.f32.mrf.mxu1  ;;  %v1523_v34 = vpop.f32.mrf.mxu0 }
 0x549   : > { %v1761_v35 = vsel %vm131_vm1, %v1523_v34, -inf }
 0x54a   : > { %v3094_v36 = vpop.f32.mrf.mxu1  ;;  %1762 = vmax.xlane.f32.xlu0 %v1761_v35  ;;  %v3099_v37 = vpop.f32.mrf.mxu0 }
 0x54c   : > { %v1601_v38 = vpop.f32.mrf.mxu1  ;;  %v1679_v39 = vpop.f32.mrf.mxu0 }
 0x54d   : > { %v1764_v40 = vsel %vm131_vm1, %v1601_v38, -inf  ;;  %v1767_v41 = vsel %vm131_vm1, %v1679_v39, -inf }
 0x54e   : > { %1765 = vmax.xlane.f32.xlu1 %v1764_v40  ;;  %v3104_v42 = vpop.f32.mrf.mxu1  ;;  %1768 = vmax.xlane.f32.xlu0 %v1767_v41  ;;  %v3109_v43 = vpop.f32.mrf.mxu0 }
 0x550   : > { %v1757_v44 = vpop.f32.mrf.mxu1 }
 0x551   : > { %v1770_v45 = vsel %vm131_vm1, %v1757_v44, -inf }
 0x552   : > { %v3114_v46 = vpop.f32.mrf.mxu1  ;;  %1771 = vmax.xlane.f32.xlu0 %v1770_v45 }
 0x55f   : > { %1805 = vrot.lane.b32.xlu1 %v3319_v1, %s3280_s20 }
 0x563   : > { %1957 = vrot.lane.b32.xlu1 %v3321_v2, %s3280_s20 }
 0x567   : > { %2033 = vrot.lane.b32.xlu1 %v3327_v4, %s3280_s20 }
 0x568   : > { %1881 = vrot.lane.b32.xlu0 %v3325_v3, %s3280_s20 }
 0x56b   : > { %2189 = vrot.lane.b32.xlu1 %v3325_v3, %s3281_s21 }
 0x56c   : > { %2111 = vrot.lane.b32.xlu0 %v3319_v1, %s3281_s21 }
 0x56f   : > { %2187 = vrot.lane.b32.xlu1 %v3339_v9, %s3282_s22 }
 0x570   : > { %2109 = vrot.lane.b32.xlu0 %v3332_v7, %s3282_s22 }
 0x5d3   : > { %v1763_v47 = vpop.xlane.xlu0 %1762 }
 0x5d4   : > { %v1773_v48 = vsub.f32 %v1523_v34, %v1763_v47 }
 0x5d6   : > { %v1777_v49 = vmul.f32 1.442695, %v1773_v48 }
 0x5d7   : > { %v1766_v50 = vpop.xlane.xlu1 %1765  ;;  %v1769_v51 = vpop.xlane.xlu0 %1768 }
 0x5d8   : > { %3231 = vpow2.f32 %v1777_v49  ;;  %v1774_v52 = vsub.f32 %v1601_v38, %v1766_v50  ;;  %v1775_v53 = vsub.f32 %v1679_v39, %v1769_v51 }
 0x5da   : > { %v1779_v54 = vmul.f32 1.442695, %v1774_v52  ;;  %v1781_v55 = vmul.f32 1.442695, %v1775_v53 }
 0x5db   : > { %v1772_v56 = vpop.xlane.xlu0 %1771  ;;  %v1806_v57 = vpop.permute.xlu1 %1805 }
 0x5dc   : > { %3233 = vpow2.f32 %v1779_v54  ;;  %v1776_v58 = vsub.f32 %v1757_v44, %v1772_v56  ;;  %3116 = vmatpush3.msra.mxu0 %v1806_v57 }
 0x5dd   : > { %3235 = vpow2.f32 %v1781_v55  ;;  %3125 = vmatprep.subr.mxu0 %v3271_v0 }
 0x5de   : > { %v1783_v9 = vmul.f32 1.442695, %v1776_v58 }
 0x5df   : > { %v1882_v7 = vpop.permute.xlu0 %1881  ;;  %v1958_v11 = vpop.permute.xlu1 %1957 }
 0x5e0   : > { %3237 = vpow2.f32 %v1783_v9  ;;  %3121 = vmatpush3.msra.mxu1 %v1882_v7 }
 0x5e1   : > { %3130 = vmatprep.subr.mxu1 %v3271_v0 }
 0x5e3   : > { %v2034_v13 = vpop.permute.xlu1 %2033  ;;  %v2112_v18 = vpop.permute.xlu0 %2111 }
 0x5e5   : > { %v3232_v59 = vpop.eup %3231 }
 0x5e6   : > { %v1785_v60 = vsel %vm131_vm1, %v3232_v59, 0.0 }
 0x5e7   : > { %1786 = vadd.xlane.f32.xlu1 %v1785_v60  ;;  %v2190_v15 = vpop.permute.xlu1 %2189  ;;  %v2110_v21 = vpop.permute.xlu0 %2109 }
 0x5e9   : > { %v3234_v61 = vpop.eup %3233 }
 0x5ea   : > { %v3236_v62 = vpop.eup %3235  ;;  %v1788_v63 = vsel %vm131_vm1, %v3234_v61, 0.0 }
 0x5eb   : > { %1789 = vadd.xlane.f32.xlu0 %v1788_v63  ;;  %v1791_v5 = vsel %vm131_vm1, %v3236_v62, 0.0  ;;  %v2188_v19 = vpop.permute.xlu1 %2187 }
 0x5ec   : > { %1792 = vadd.xlane.f32.xlu1 %v1791_v5 }
 0x5ed   : > { %v3238_v6 = vpop.eup %3237 }
 0x5ee   : > { %v1794_v8 = vsel %vm131_vm1, %v3238_v6, 0.0 }
 0x5ef   : > { %1795 = vadd.xlane.f32.xlu0 %v1794_v8 }
 0x5fd   : > { %2345 = vrot.lane.b32.xlu1 %v3327_v4, %s3281_s21 }
 0x601   : > { %2343 = vrot.lane.b32.xlu1 %v3355_v12, %s3282_s22 }
 0x605   : > { %2267 = vrot.lane.b32.xlu0 %v3321_v2, %s3281_s21 }
 0x609   : > { %2265 = vrot.lane.b32.xlu0 %v3342_v10, %s3282_s22 }
 0x670   : > { %v1787_v22 = vpop.xlane.xlu1 %1786 }
 0x671   : > { %3239 = vrcp.f32 %v1787_v22 }
 0x674   : > { %v1790_v23 = vpop.xlane.xlu0 %1789 }
 0x675   : > { %v1793_v24 = vpop.xlane.xlu1 %1792  ;;  %3241 = vrcp.f32 %v1790_v23 }
 0x676   : > { %3243 = vrcp.f32 %v1793_v24 }
 0x678   : > { %v1796_v25 = vpop.xlane.xlu0 %1795 }
 0x679   : > { %3245 = vrcp.f32 %v1796_v25  ;;  %v2346_v37 = vpop.permute.xlu1 %2345 }
 0x67c   : > { %v2268_v34 = vpop.permute.xlu0 %2267 }
 0x67d   : > { %v2344_v39 = vpop.permute.xlu1 %2343 }
 0x67e   : > { %v3240_v12 = vpop.eup %3239 }
 0x67f   : > { %v1801_v26 = vmul.f32 %v3240_v12, %v3232_v59 }
 0x680   : > { %v2266_v38 = vpop.permute.xlu0 %2265 }
 0x681   : > { %3118 = vmatmul.mubr.msk.f32.vlgmr.msra.gmra.mxu0 %vm131_vm1, %v1801_v26 }
 0x682   : > { %v3242_v28 = vpop.eup %3241  ;;  %3126 = vmatpush3.msra.mxu0 %v1958_v11  ;;  %3127 = vmatprep.mubr.msk.f32.mxu0 %vm3272_vm0, %v3271_v0 }
 0x683   : > { %v3244_v10 = vpop.eup %3243  ;;  %3135 = vmatprep.subr.mxu0 %v3271_v0  ;;  %v1802_v31 = vmul.f32 %v3242_v28, %v3234_v61 }
 0x684   : > { %v1803_v32 = vmul.f32 %v3244_v10, %v3236_v62 }
 0x685   : > { %3123 = vmatmul.mubr.msk.f32.vlgmr.msra.gmra.mxu1 %vm131_vm1, %v1802_v31 }
 0x686   : > { %v3246_v35 = vpop.eup %3245  ;;  %3128 = vmatmul.mubr.msk.f32.vlgmr.msra.gmra.mxu0 %vm131_vm1, %v1803_v32  ;;  %3131 = vmatpush3.msra.mxu1 %v2034_v13 }
 0x687   : > { %3136 = vmatpush3.xpose.msk.msra.mxu0 %vm131_vm1, %v2112_v18  ;;  %3132 = vmatprep.mubr.msk.f32.mxu1 %vm3272_vm0, %v3271_v0  ;;  %v1804_v36 = vmul.f32 %v3246_v35, %v3238_v6 }
 0x688   : > { %3137 = vmatprep.mubr.msk.f32.mxu0 %vm3272_vm0, %v3271_v0  ;;  %3140 = vmatprep.subr.mxu1 %v3271_v0 }
 0x689   : > { %3133 = vmatmul.mubr.msk.f32.vlgmr.msra.gmra.mxu1 %vm131_vm1, %v1804_v36  ;;  %3145 = vmatprep.subr.mxu0 %v3271_v0 }
 0x68a   : > { %3138 = vmatmul.mubr.msk.f32.vlgmr.msra.gmra.mxu0 %vm131_vm1, %v2110_v21  ;;  %3141 = vmatpush3.xpose.msk.msra.mxu1 %vm131_vm1, %v2190_v15 }
 0x68b   : > { %3146 = vmatpush3.xpose.msk.msra.mxu0 %vm131_vm1, %v2268_v34  ;;  %3142 = vmatprep.mubr.msk.f32.mxu1 %vm3272_vm0, %v3271_v0 }
 0x68c   : > { %3147 = vmatprep.mubr.msk.f32.mxu0 %vm3272_vm0, %v3271_v0  ;;  %3150 = vmatprep.subr.mxu1 %v3271_v0 }
 0x68d   : > { %3143 = vmatmul.mubr.msk.f32.vlgmr.msra.gmra.mxu1 %vm131_vm1, %v2188_v19  ;;  %3155 = vmatprep.subr.mxu0 %v3271_v0 }
 0x68e   : > { %3148 = vmatmul.mubr.msk.f32.vlgmr.msra.gmra.mxu0 %vm131_vm1, %v2266_v38  ;;  %3151 = vmatpush3.xpose.msk.msra.mxu1 %vm131_vm1, %v2346_v37 }
 0x68f   : > { %3152 = vmatprep.mubr.msk.f32.mxu1 %vm3272_vm0, %v3271_v0  ;;  %3157 = vmatprep.mubr.msk.f32.mxu0 %vm3272_vm0, %v3271_v0 }
 0x690   : > { %3160 = vmatprep.subr.mxu1 %v3271_v0 }
 0x691   : > { %3153 = vmatmul.mubr.msk.f32.vlgmr.msra.gmra.mxu1 %vm131_vm1, %v2344_v39 }
 0x692   : > { %3162 = vmatprep.mubr.msk.f32.mxu1 %vm3272_vm0, %v3271_v0 }
 0x741   : > { %v3575_v40 = vpop.f32.mrf.mxu0 }
 0x743   : > { %v3119_v41 = vpop.f32.mrf.mxu0 }
 0x745   : > { %v3577_v42 = vpop.f32.mrf.mxu1 }
 0x746   : > { %v2029_v43 = vpop.f32.mrf.mxu0 }
 0x747   : > { %v3124_v44 = vpop.f32.mrf.mxu1 }
 0x748   : > { %v3129_v45 = vpop.f32.mrf.mxu0 }
 0x749   : > { %v2105_v46 = vpop.f32.mrf.mxu1 }
 0x74a   : > { %v2183_v47 = vpop.f32.mrf.mxu0 }
 0x74b   : > { %v3134_v48 = vpop.f32.mrf.mxu1  ;;  %v2421_v49 = vsel %vm131_vm1, %v2183_v47, -inf }
 0x74c   : > { %2422 = vmax.xlane.f32.xlu0 %v2421_v49  ;;  %v3139_v50 = vpop.f32.mrf.mxu0 }
 0x74d   : > { %v2261_v51 = vpop.f32.mrf.mxu1 }
 0x74e   : > { %v2339_v52 = vpop.f32.mrf.mxu0  ;;  %v2424_v53 = vsel %vm131_vm1, %v2261_v51, -inf }
 0x74f   : > { %2425 = vmax.xlane.f32.xlu1 %v2424_v53  ;;  %v3144_v54 = vpop.f32.mrf.mxu1  ;;  %v2427_v55 = vsel %vm131_vm1, %v2339_v52, -inf }
 0x750   : > { %2428 = vmax.xlane.f32.xlu0 %v2427_v55  ;;  %v3149_v56 = vpop.f32.mrf.mxu0 }
 0x751   : > { %v2417_v57 = vpop.f32.mrf.mxu1 }
 0x752   : > { %v2430_v58 = vsel %vm131_vm1, %v2417_v57, -inf }
 0x753   : > { %v3154_v9 = vpop.f32.mrf.mxu1 }
 0x754   : > { %2431 = vmax.xlane.f32.xlu0 %v2430_v58 }
 0x760   : > { %2465 = vrot.lane.b32.xlu1 %v3319_v1, %s3283_s23 }
 0x7d5   : > { %v2423_v7 = vpop.xlane.xlu0 %2422 }
 0x7d6   : > { %v2433_v59 = vsub.f32 %v2183_v47, %v2423_v7 }
 0x7d8   : > { %v2437_v60 = vmul.f32 1.442695, %v2433_v59  ;;  %v2426_v61 = vpop.xlane.xlu1 %2425 }
 0x7d9   : > { %v2434_v62 = vsub.f32 %v2261_v51, %v2426_v61  ;;  %v2429_v63 = vpop.xlane.xlu0 %2428 }
 0x7da   : > { %3247 = vpow2.f32 %v2437_v60  ;;  %v2435_v5 = vsub.f32 %v2339_v52, %v2429_v63 }
 0x7db   : > { %v2439_v6 = vmul.f32 1.442695, %v2434_v62 }
 0x7dc   : > { %v2441_v8 = vmul.f32 1.442695, %v2435_v5  ;;  %v2466_v11 = vpop.permute.xlu1 %2465 }
 0x7dd   : > { %3249 = vpow2.f32 %v2439_v6  ;;  %v2432_v13 = vpop.xlane.xlu0 %2431  ;;  %3156 = vmatpush3.msra.mxu0 %v2466_v11 }
 0x7de   : > { %3251 = vpow2.f32 %v2441_v8  ;;  %v2436_v15 = vsub.f32 %v2417_v57, %v2432_v13  ;;  %3165 = vmatprep.subr.mxu0 %v3271_v0 }
 0x7e0   : > { %v2443_v18 = vmul.f32 1.442695, %v2436_v15 }
 0x7e2   : > { %3253 = vpow2.f32 %v2443_v18 }
 0x7e7   : > { %v3248_v1 = vpop.eup %3247 }
 0x7e8   : > { %v2445_v19 = vsel %vm131_vm1, %v3248_v1, 0.0 }
 0x7e9   : > { %2446 = vadd.xlane.f32.xlu1 %v2445_v19 }
 0x7ea   : > { %v3250_v21 = vpop.eup %3249 }
 0x7eb   : > { %v3252_v22 = vpop.eup %3251  ;;  %v2448_v23 = vsel %vm131_vm1, %v3250_v21, 0.0 }
 0x7ec   : > { %2449 = vadd.xlane.f32.xlu0 %v2448_v23  ;;  %v2451_v24 = vsel %vm131_vm1, %v3252_v22, 0.0 }
 0x7ed   : > { %2452 = vadd.xlane.f32.xlu1 %v2451_v24 }
 0x7ef   : > { %v3254_v25 = vpop.eup %3253 }
 0x7f0   : > { %v2454_v12 = vsel %vm131_vm1, %v3254_v25, 0.0 }
 0x7f1   : > { %2455 = vadd.xlane.f32.xlu0 %v2454_v12 }
 0x7fe   : > { %2617 = vrot.lane.b32.xlu1 %v3321_v2, %s3283_s23 }
 0x802   : > { %2693 = vrot.lane.b32.xlu1 %v3327_v4, %s3283_s23 }
 0x806   : > { %2775 = vrot.lane.b32.xlu1 %v3505_v29, %s3284_s24 }
 0x807   : > { %2541 = vrot.lane.b32.xlu0 %v3325_v3, %s3283_s23 }
 0x80a   : > { %2777 = vrot.lane.b32.xlu1 %v3507_v30, %s3284_s24 }
 0x80b   : > { %2773 = vrot.lane.b32.xlu0 %v3503_v27, %s3284_s24 }
 0x80e   : > { %2793 = vrot.lane.b32.xlu1 %v2029_v43, %s3285_s25 }
 0x80f   : > { %2789 = vrot.lane.b32.xlu0 %v3575_v40, %s3285_s25 }
 0x812   : > { %2795 = vrot.lane.b32.xlu1 %v2105_v46, %s3285_s25 }
 0x813   : > { %2791 = vrot.lane.b32.xlu0 %v3577_v42, %s3285_s25 }
 0x817   : > { %2779 = vrot.lane.b32.xlu0 %v3509_v33, %s3284_s24 }
 0x872   : > { %v2447_v2 = vpop.xlane.xlu1 %2446 }
 0x873   : > { %3255 = vrcp.f32 %v2447_v2 }
 0x875   : > { %v2450_v4 = vpop.xlane.xlu0 %2449 }
 0x876   : > { %v2453_v29 = vpop.xlane.xlu1 %2452  ;;  %3257 = vrcp.f32 %v2450_v4 }
 0x877   : > { %3259 = vrcp.f32 %v2453_v29 }
 0x87a   : > { %v2456_v3 = vpop.xlane.xlu0 %2455  ;;  %v2618_v26 = vpop.permute.xlu1 %2617 }
 0x87b   : > { %3261 = vrcp.f32 %v2456_v3 }
 0x87e   : > { %v2542_v30 = vpop.permute.xlu0 %2541  ;;  %v2694_v34 = vpop.permute.xlu1 %2693 }
 0x87f   : > { %3161 = vmatpush3.msra.mxu1 %v2542_v30 }
 0x880   : > { %v3256_v27 = vpop.eup %3255  ;;  %3170 = vmatprep.subr.mxu1 %v3271_v0 }
 0x881   : > { %v2461_v28 = vmul.f32 %v3256_v27, %v3248_v1 }
 0x882   : > { %v2776_v45 = vpop.permute.xlu1 %2775  ;;  %v2774_v46 = vpop.permute.xlu0 %2773 }
 0x883   : > { %v3258_v10 = vpop.eup %3257  ;;  %3158 = vmatmul.mubr.msk.f32.vlgmr.msra.gmra.mxu0 %vm131_vm1, %v2461_v28  ;;  %v2817_v51 = vsel %vm131_vm1, %v3431_v14, %v2774_v46  ;;  %v2818_v56 = vsel %vm131_vm1, %v3433_v16, %v2776_v45 }
 0x884   : > { %v3260_v31 = vpop.eup %3259  ;;  %3166 = vmatpush3.msra.mxu0 %v2618_v26  ;;  %3167 = vmatprep.mubr.msk.f32.mxu0 %vm3272_vm0, %v3271_v0  ;;  %v2462_v33 = vmul.f32 %v3258_v10, %v3250_v21 }
 0x885   : > { %v2463_v32 = vmul.f32 %v3260_v31, %v3252_v22 }
 0x886   : > { %3163 = vmatmul.mubr.msk.f32.vlgmr.msra.gmra.mxu1 %vm131_vm1, %v2462_v33  ;;  %v2790_v47 = vpop.permute.xlu0 %2789 }
 0x887   : > { %3168 = vmatmul.mubr.msk.f32.vlgmr.msra.gmra.mxu0 %vm131_vm1, %v2463_v32  ;;  %3171 = vmatpush3.msra.mxu1 %v2694_v34  ;;  %v2822_v53 = vsel %vm2821_vm2, %v2817_v51, %v2790_v47 }
 0x888   : > { %v3262_v35 = vpop.eup %3261  ;;  %3172 = vmatprep.mubr.msk.f32.mxu1 %vm3272_vm0, %v3271_v0  ;;  %v2778_v0 = vpop.permute.xlu1 %2777 }
 0x889   : > { %v2464_v36 = vmul.f32 %v3262_v35, %v3254_v25  ;;  %v2819_v7 = vsel %vm131_vm1, %v3435_v17, %v2778_v0 }
 0x88a   : > { %v2792_v49 = vpop.permute.xlu0 %2791 }
 0x88b   : > { %3173 = vmatmul.mubr.msk.f32.vlgmr.msra.gmra.mxu1 %vm131_vm1, %v2464_v36  ;;  %v2823_v57 = vsel %vm2821_vm2, %v2818_v56, %v2792_v49 }
 0x88c   : > { %v2794_v48 = vpop.permute.xlu1 %2793 }
 0x88d   : > { %v2824_v59 = vsel %vm2821_vm2, %v2819_v7, %v2794_v48 }
 0x88e   : > { %v2780_v52 = vpop.permute.xlu0 %2779 }
 0x88f   : > { %v2820_v9 = vsel %vm131_vm1, %v3437_v20, %v2780_v52 }
 0x890   : > { %v2796_v50 = vpop.permute.xlu1 %2795 }
 0x891   : > { %v2825_v16 = vsel %vm2821_vm2, %v2820_v9, %v2796_v50 }
 0x943   : > { %v2537_v37 = vpop.f32.mrf.mxu0 }
 0x944   : > { %2805 = vrot.lane.b32.xlu1 %v2537_v37, %s3286_s26 }
 0x945   : > { %v3159_v38 = vpop.f32.mrf.mxu0 }
 0x946   : > { %v2613_v39 = vpop.f32.mrf.mxu1 }
 0x947   : > { %v2689_v40 = vpop.f32.mrf.mxu0  ;;  %2807 = vrot.lane.b32.xlu0 %v2613_v39, %s3286_s26 }
 0x948   : > { %v3164_v41 = vpop.f32.mrf.mxu1 }
 0x949   : > { %v3169_v42 = vpop.f32.mrf.mxu0 }
 0x94b   : > { %v2765_v43 = vpop.f32.mrf.mxu1  ;;  %2809 = vrot.lane.b32.xlu0 %v2689_v40, %s3286_s26 }
 0x94c   : > { %2811 = vrot.lane.b32.xlu1 %v2765_v43, %s3286_s26 }
 0x94d   : > { %v3174_v44 = vpop.f32.mrf.mxu1 }
 0x9b6   : > { %v2806_v54 = vpop.permute.xlu1 %2805 }
 0x9b7   : > { %v2827_v55 = vsel %vm2826_vm3, %v2822_v53, %v2806_v54 }
 0x9b8   : > { %2832 = vst.msk [vmem:[%s118_s29] sm:$0xff] %vm2831_vm4, %v2827_v55 }
 0x9b9   : > { %v2808_v14 = vpop.permute.xlu0 %2807 }
 0x9ba   : > { %v2828_v58 = vsel %vm2826_vm3, %v2823_v57, %v2808_v14 }
 0x9bb   : > { %2833 = vst.msk [vmem:[%s118_s29 + $0x8] sm:$0xff] %vm2831_vm4, %v2828_v58 }
 0x9bd   : > { %v2810_v60 = vpop.permute.xlu0 %2809 }
 0x9be   : > { %v2812_v61 = vpop.permute.xlu1 %2811  ;;  %v2829_v62 = vsel %vm2826_vm3, %v2824_v59, %v2810_v60 }
 0x9bf   : > { %v2830_v63 = vsel %vm2826_vm3, %v2825_v16, %v2812_v61  ;;  %2834 = vst.msk [vmem:[%s118_s29 + $0x10] sm:$0xff] %vm2831_vm4, %v2829_v62 }
 0x9c0   : > { %2835 = vst.msk [vmem:[%s118_s29 + $0x18] sm:$0xff] %vm2831_vm4, %v2830_v63 }
 0x9c1 PF: > { %s11_s6 = sadd.s32 1, %s3269_s6  }
 0x9c2   : > { %p8_p4 = scmp.ge.s32.totalorder %s11_s6, 4  }
 0x9c4   :  { %10 = sbr.rel (!%p8_p4) target bundleno = 1 (0x1), region = 54 }

</bundles_post_ra>
